<compile_context>
chip_gen: v5e
topology: v5e:2x2
jax: 0.10.0
libtpu: 0.0.40
codegen_flags: <defaults>
</compile_context>

<pallas_src>
import functools

import jax
import jax.numpy as jnp
from jax import lax
from jax.experimental import pallas as pl
from jax.experimental.pallas import tpu as pltpu

_BN_EPS = 1e-5
_INV_SQRT2 = 0.7071067811865476


def _round_up(x, m):
    return ((x + m - 1) // m) * m


def _vmem_block_bytes(shape, dtype):
    """Rough VMEM footprint of one block after (8,128) tiling of the last two dims."""
    lead = 1
    for d in shape[:-2]:
        lead *= int(d)
    sub = _round_up(int(shape[-2]), 8)
    lane = _round_up(int(shape[-1]), 128)
    return lead * sub * lane * jnp.dtype(dtype).itemsize


# --------------------------------------------------------------------------------------
# Pass 1: conv (KH*KW shifted MXU matmuls over the raw NHWC slab) + exact GELU
#         + per-image channel sum / sum-of-squares.  Output stored transposed (C, OH*OW).
# --------------------------------------------------------------------------------------
def _conv_gelu_stats_kernel(x_ref, w_ref, y_ref, stats_ref, *, taps, oh, ow, c_in,
                            compute_dtype):
    m = oh * ow
    acc = None
    for t, (ro, co, ch) in enumerate(taps):
        # Static, unit-stride slice of the padded input slab for kernel tap t.
        patch = x_ref[0, ro:ro + oh, co:co + ow, ch:ch + c_in]        # (oh, ow, c_in) f32
        # Layout note: this reshape is a no-op re-tiling when `oh` is a multiple of 8.
        patch = patch.reshape(m, c_in).astype(compute_dtype)
        part = jnp.dot(patch, w_ref[t], preferred_element_type=jnp.float32)
        acc = part if acc is None else acc + part                     # (m, c_out) f32

    # Exact GELU (PyTorch nn.GELU default): 0.5 * x * (1 + erf(x / sqrt(2))).
    g = 0.5 * acc * (1.0 + lax.erf(acc * _INV_SQRT2))

    # BatchNorm statistics computed on the *stored* (rounded) activation so the pass-2
    # normalization is exactly consistent with what it reads back.
    gq = g.astype(y_ref.dtype).astype(jnp.float32)
    stats_ref[0, 0:1, :] = jnp.sum(gq, axis=0, keepdims=True)         # per-channel sum
    stats_ref[0, 1:2, :] = jnp.sum(gq * gq, axis=0, keepdims=True)    # per-channel sumsq

    # Store already transposed -> final NCHW layout needs no separate transpose pass;
    # lane dim of the store is OH*OW (lane-dense even for small C_out).
    y_ref[0] = jnp.transpose(g, (1, 0)).astype(y_ref.dtype)


# --------------------------------------------------------------------------------------
# Pass 2: folded BatchNorm affine on the transposed activation: out = y*scale + shift.
# --------------------------------------------------------------------------------------
def _bn_affine_kernel(y_ref, scale_ref, shift_ref, o_ref):
    y = y_ref[0].astype(jnp.float32)                                   # (c_out, m)
    o_ref[0] = y * scale_ref[...] + shift_ref[...]                     # scale/shift (c_out, 1)


def _prepare_input(x, kh, kw, stride, padding):
    """NCHW -> spatially padded NHWC.  For stride>1, fold the stride into channels
    (space-to-depth) so the kernel always solves a stride-1 problem with static slices.
    Returns (x_eff, taps, oh, ow) where taps[t] = (row_off, col_off, chan_off)."""
    n, c_in, h, w = x.shape
    s = stride
    x_nhwc = jnp.transpose(x, (0, 2, 3, 1))
    h_p, w_p = h + 2 * padding, w + 2 * padding
    oh = (h_p - kh) // s + 1
    ow = (w_p - kw) // s + 1
    h_p2, w_p2 = _round_up(h_p, s), _round_up(w_p, s)
    x_pad = jnp.pad(x_nhwc, ((0, 0),
                             (padding, h_p2 - h - padding),
                             (padding, w_p2 - w - padding),
                             (0, 0)))
    if s > 1:
        x_eff = x_pad.reshape(n, h_p2 // s, s, w_p2 // s, s, c_in)
        x_eff = x_eff.transpose(0, 1, 3, 2, 4, 5).reshape(
            n, h_p2 // s, w_p2 // s, s * s * c_in)
    else:
        x_eff = x_pad
    taps = []
    for ki in range(kh):
        for kj in range(kw):
            taps.append((ki // s, kj // s, ((ki % s) * s + (kj % s)) * c_in))
    return x_eff, tuple(taps), oh, ow


@functools.partial(jax.jit, static_argnames=("stride", "padding", "compute_dtype"))
def conv_gelu_bn(x, weight, gamma, beta, *, stride=1, padding=0,
                 compute_dtype=jnp.bfloat16):
    """Forward of the PyTorch `Conv` module.

    x:      (N, C_in, H, W)       float32, NCHW
    weight: (C_out, C_in, KH, KW) float32, OIHW
    gamma, beta: (C_out,)         BatchNorm affine parameters
    compute_dtype: MXU operand / intermediate-activation dtype (bf16 fast, f32 exact)
    returns (N, C_out, OH, OW)    float32, NCHW
    """
    n, c_in, _, _ = x.shape
    c_out, _, kh, kw = weight.shape

    x_eff, taps, oh, ow = _prepare_input(x, kh, kw, stride, padding)
    _, h_s, w_s, c_eff = x_eff.shape
    m_img = oh * ow
    t_taps = kh * kw

    # Weight: (C_out, C_in, KH, KW) -> (KH*KW, C_in, C_out), cast for the MXU.
    w_r = (jnp.transpose(weight, (2, 3, 1, 0))
           .reshape(t_taps, c_in, c_out).astype(compute_dtype))

    kernel1 = functools.partial(_conv_gelu_stats_kernel, taps=taps, oh=oh, ow=ow,
                                c_in=c_in, compute_dtype=compute_dtype)

    blocks1 = [((1, h_s, w_s, c_eff), x_eff.dtype),
               ((t_taps, c_in, c_out), compute_dtype),
               ((1, c_out, m_img), compute_dtype),
               ((1, 2, c_out), jnp.float32)]
    est1 = sum(_vmem_block_bytes(s_, d_) for s_, d_ in blocks1)
    vmem1 = int(min(max(4 * est1 + (4 << 20), 32 << 20), 56 << 20))

    cost1 = pl.CostEstimate(
        flops=int(2 * n * m_img * t_taps * c_in * c_out),
        transcendentals=int(n * m_img * c_out),
        bytes_accessed=int(x_eff.size * x_eff.dtype.itemsize
                           + w_r.size * w_r.dtype.itemsize
                           + n * m_img * c_out * jnp.dtype(compute_dtype).itemsize
                           + n * 2 * c_out * 4),
    )

    # ---- Pass 1: per-image conv + GELU + stats (no resident accumulator -> parallel) ----
    y_t, stats = pl.pallas_call(
        kernel1,
        grid=(n,),
        in_specs=[
            pl.BlockSpec((1, h_s, w_s, c_eff), lambda i: (i, 0, 0, 0)),   # image slab
            pl.BlockSpec((t_taps, c_in, c_out), lambda i: (0, 0, 0)),     # resident weight
        ],
        out_specs=[
            pl.BlockSpec((1, c_out, m_img), lambda i: (i, 0, 0)),         # GELU(conv)^T
            pl.BlockSpec((1, 2, c_out), lambda i: (i, 0, 0)),             # per-image stats
        ],
        out_shape=[
            jax.ShapeDtypeStruct((n, c_out, m_img), compute_dtype),
            jax.ShapeDtypeStruct((n, 2, c_out), jnp.float32),
        ],
        compiler_params=pltpu.CompilerParams(
            dimension_semantics=("parallel",),
            vmem_limit_bytes=vmem1,
        ),
        cost_estimate=cost1,
    )(x_eff, w_r)

    # ---- Global batch statistics -> folded BN scale/shift (tiny (C,) vectors, plain JAX) ----
    m_total = float(n * m_img)
    ch_sum = jnp.sum(stats[:, 0, :], axis=0)
    ch_sq = jnp.sum(stats[:, 1, :], axis=0)
    mean = ch_sum / m_total
    var = jnp.maximum(ch_sq / m_total - mean * mean, 0.0)   # biased variance (training BN)
    scale = (gamma.astype(jnp.float32) * lax.rsqrt(var + _BN_EPS)).reshape(c_out, 1)
    shift = beta.astype(jnp.float32).reshape(c_out, 1) - mean.reshape(c_out, 1) * scale

    est2 = (_vmem_block_bytes((1, c_out, m_img), compute_dtype)
            + _vmem_block_bytes((1, c_out, m_img), jnp.float32)
            + 2 * _vmem_block_bytes((c_out, 1), jnp.float32))
    vmem2 = int(min(max(4 * est2 + (4 << 20), 32 << 20), 56 << 20))
    cost2 = pl.CostEstimate(
        flops=int(2 * n * c_out * m_img),
        transcendentals=0,
        bytes_accessed=int(n * c_out * m_img
                           * (jnp.dtype(compute_dtype).itemsize + 4) + 8 * c_out),
    )

    # ---- Pass 2: y*scale + shift, already in (N, C, OH*OW) layout (parallel over N) ----
    out_flat = pl.pallas_call(
        _bn_affine_kernel,
        grid=(n,),
        in_specs=[
            pl.BlockSpec((1, c_out, m_img), lambda i: (i, 0, 0)),
            pl.BlockSpec((c_out, 1), lambda i: (0, 0)),
            pl.BlockSpec((c_out, 1), lambda i: (0, 0)),
        ],
        out_specs=pl.BlockSpec((1, c_out, m_img), lambda i: (i, 0, 0)),
        out_shape=jax.ShapeDtypeStruct((n, c_out, m_img), jnp.float32),
        compiler_params=pltpu.CompilerParams(
            dimension_semantics=("parallel",),
            vmem_limit_bytes=vmem2,
        ),
        cost_estimate=cost2,
    )(y_t, scale, shift)

    # (N, C_out, OH*OW) -> (N, C_out, OH, OW): pure metadata reshape, no transpose pass.
    return out_flat.reshape(n, c_out, oh, ow)


def _reference(x, weight, gamma, beta, *, stride, padding):
    """Pure-JAX f32 reference matching PyTorch semantics (training-mode BN)."""
    y = lax.conv_general_dilated(
        x, weight, window_strides=(stride, stride),
        padding=[(padding, padding), (padding, padding)],
        dimension_numbers=("NCHW", "OIHW", "NCHW"))
    y = 0.5 * y * (1.0 + lax.erf(y / jnp.sqrt(2.0)))
    mean = jnp.mean(y, axis=(0, 2, 3), keepdims=True)
    var = jnp.mean((y - mean) ** 2, axis=(0, 2, 3), keepdims=True)
    y = (y - mean) / jnp.sqrt(var + _BN_EPS)
    return y * gamma.reshape(1, -1, 1, 1) + beta.reshape(1, -1, 1, 1)


if __name__ == "__main__":
    # Small, deterministic example consistent with the module's __init__:
    # Conv(in_channels=4, out_channels=8, kernel_size=3, stride=1, padding=1)
    N, C_IN, H, W = 2, 4, 16, 16
    C_OUT, KSIZE, STRIDE, PAD = 8, 3, 1, 1

    key = jax.random.PRNGKey(0)
    kx, kw_ = jax.random.split(key)
    x = jax.random.normal(kx, (N, C_IN, H, W), dtype=jnp.float32)
    fan_in = C_IN * KSIZE * KSIZE
    bound = (1.0 / fan_in) ** 0.5
    weight = jax.random.uniform(kw_, (C_OUT, C_IN, KSIZE, KSIZE),
                                dtype=jnp.float32, minval=-bound, maxval=bound)
    gamma = jnp.ones((C_OUT,), dtype=jnp.float32)   # BatchNorm2d default init
    beta = jnp.zeros((C_OUT,), dtype=jnp.float32)

    ref = _reference(x, weight, gamma, beta, stride=STRIDE, padding=PAD)

    # Exact-precision path (f32 MXU operands / f32 intermediate): matches PyTorch f32.
    out_f32 = conv_gelu_bn(x, weight, gamma, beta, stride=STRIDE, padding=PAD,
                           compute_dtype=jnp.float32)
    out_f32 = jax.block_until_ready(out_f32)
    assert out_f32.shape == (N, C_OUT, H, W), out_f32.shape
    err_f32 = float(jnp.max(jnp.abs(out_f32 - ref)))
    assert err_f32 < 1e-4, err_f32

    # Fast path (bf16 MXU operands + bf16 intermediate activation), per perf review;
    # f32 accumulation keeps the error small, tolerance loosened accordingly.
    out_bf16 = conv_gelu_bn(x, weight, gamma, beta, stride=STRIDE, padding=PAD,
                            compute_dtype=jnp.bfloat16)
    out_bf16 = jax.block_until_ready(out_bf16)
    assert out_bf16.shape == (N, C_OUT, H, W), out_bf16.shape
    err_bf16 = float(jnp.max(jnp.abs(out_bf16 - ref)))
    assert err_bf16 < 1.5e-1, err_bf16

    print("KERNEL_OK")
</pallas_src>

<mosaic_0001>
module attributes {stable_mosaic.version = 11 : i64} {
  func.func @_conv_gelu_stats_kernel(%arg0: i32, %arg1: memref<1x18x18x4xf32, #tpu.memory_space<vmem>>, %arg2: memref<9x4x8xf32, #tpu.memory_space<vmem>>, %arg3: memref<1x8x256xf32, #tpu.memory_space<vmem>>, %arg4: memref<1x2x8xf32, #tpu.memory_space<vmem>>) attributes {dimension_semantics = [#tpu.dimension_semantics<parallel>], iteration_bounds = array<i64: 2>, scalar_prefetch = 0 : i64, scratch_operands = 0 : i64, tpu.core_type = #tpu.core_type<tc>, window_params = [{transform_indices = @transform_0, window_bounds = array<i64: 1, 18, 18, 4>}, {pipeline_mode = #tpu.pipeline_mode<synchronous>, transform_indices = @transform_1, window_bounds = array<i64: 9, 4, 8>}, {transform_indices = @transform_2, window_bounds = array<i64: 1, 8, 256>}, {transform_indices = @transform_3, window_bounds = array<i64: 1, 2, 8>}]} {
    %c0 = arith.constant 0 : index
    %c0_0 = arith.constant 0 : index
    %c0_1 = arith.constant 0 : index
    %c0_2 = arith.constant 0 : index
    %0 = vector.load %arg1[%c0, %c0_0, %c0_1, %c0_2] : memref<1x18x18x4xf32, #tpu.memory_space<vmem>>, vector<1x16x16x4xf32>
    %1 = vector.shape_cast %0 : vector<1x16x16x4xf32> to vector<16x16x4xf32>
    %2 = vector.shape_cast %1 : vector<16x16x4xf32> to vector<256x4xf32>
    %c0_3 = arith.constant 0 : index
    %c0_4 = arith.constant 0 : index
    %c0_5 = arith.constant 0 : index
    %3 = vector.load %arg2[%c0_3, %c0_4, %c0_5] : memref<9x4x8xf32, #tpu.memory_space<vmem>>, vector<1x4x8xf32>
    %4 = vector.shape_cast %3 : vector<1x4x8xf32> to vector<4x8xf32>
    %cst = arith.constant dense<0.000000e+00> : vector<256x8xf32>
    %5 = tpu.matmul %2, %4, %cst {dimension_numbers = #tpu.dot_dimension_numbers<[1], [0], [0], [1], [0, 0, 1, 1], [], []>} : vector<256x4xf32>, vector<4x8xf32>, vector<256x8xf32> -> vector<256x8xf32>
    %c0_6 = arith.constant 0 : index
    %c0_7 = arith.constant 0 : index
    %c1 = arith.constant 1 : index
    %c0_8 = arith.constant 0 : index
    %6 = vector.load %arg1[%c0_6, %c0_7, %c1, %c0_8] : memref<1x18x18x4xf32, #tpu.memory_space<vmem>>, vector<1x16x16x4xf32>
    %7 = vector.shape_cast %6 : vector<1x16x16x4xf32> to vector<16x16x4xf32>
    %8 = vector.shape_cast %7 : vector<16x16x4xf32> to vector<256x4xf32>
    %c1_9 = arith.constant 1 : index
    %c0_10 = arith.constant 0 : index
    %c0_11 = arith.constant 0 : index
    %9 = vector.load %arg2[%c1_9, %c0_10, %c0_11] : memref<9x4x8xf32, #tpu.memory_space<vmem>>, vector<1x4x8xf32>
    %10 = vector.shape_cast %9 : vector<1x4x8xf32> to vector<4x8xf32>
    %cst_12 = arith.constant dense<0.000000e+00> : vector<256x8xf32>
    %11 = tpu.matmul %8, %10, %cst_12 {dimension_numbers = #tpu.dot_dimension_numbers<[1], [0], [0], [1], [0, 0, 1, 1], [], []>} : vector<256x4xf32>, vector<4x8xf32>, vector<256x8xf32> -> vector<256x8xf32>
    %12 = arith.addf %5, %11 : vector<256x8xf32>
    %c0_13 = arith.constant 0 : index
    %c0_14 = arith.constant 0 : index
    %c2 = arith.constant 2 : index
    %c0_15 = arith.constant 0 : index
    %13 = vector.load %arg1[%c0_13, %c0_14, %c2, %c0_15] : memref<1x18x18x4xf32, #tpu.memory_space<vmem>>, vector<1x16x16x4xf32>
    %14 = vector.shape_cast %13 : vector<1x16x16x4xf32> to vector<16x16x4xf32>
    %15 = vector.shape_cast %14 : vector<16x16x4xf32> to vector<256x4xf32>
    %c2_16 = arith.constant 2 : index
    %c0_17 = arith.constant 0 : index
    %c0_18 = arith.constant 0 : index
    %16 = vector.load %arg2[%c2_16, %c0_17, %c0_18] : memref<9x4x8xf32, #tpu.memory_space<vmem>>, vector<1x4x8xf32>
    %17 = vector.shape_cast %16 : vector<1x4x8xf32> to vector<4x8xf32>
    %cst_19 = arith.constant dense<0.000000e+00> : vector<256x8xf32>
    %18 = tpu.matmul %15, %17, %cst_19 {dimension_numbers = #tpu.dot_dimension_numbers<[1], [0], [0], [1], [0, 0, 1, 1], [], []>} : vector<256x4xf32>, vector<4x8xf32>, vector<256x8xf32> -> vector<256x8xf32>
    %19 = arith.addf %12, %18 : vector<256x8xf32>
    %c0_20 = arith.constant 0 : index
    %c1_21 = arith.constant 1 : index
    %c0_22 = arith.constant 0 : index
    %c0_23 = arith.constant 0 : index
    %20 = vector.load %arg1[%c0_20, %c1_21, %c0_22, %c0_23] : memref<1x18x18x4xf32, #tpu.memory_space<vmem>>, vector<1x16x16x4xf32>
    %21 = vector.shape_cast %20 : vector<1x16x16x4xf32> to vector<16x16x4xf32>
    %22 = vector.shape_cast %21 : vector<16x16x4xf32> to vector<256x4xf32>
    %c3 = arith.constant 3 : index
    %c0_24 = arith.constant 0 : index
    %c0_25 = arith.constant 0 : index
    %23 = vector.load %arg2[%c3, %c0_24, %c0_25] : memref<9x4x8xf32, #tpu.memory_space<vmem>>, vector<1x4x8xf32>
    %24 = vector.shape_cast %23 : vector<1x4x8xf32> to vector<4x8xf32>
    %cst_26 = arith.constant dense<0.000000e+00> : vector<256x8xf32>
    %25 = tpu.matmul %22, %24, %cst_26 {dimension_numbers = #tpu.dot_dimension_numbers<[1], [0], [0], [1], [0, 0, 1, 1], [], []>} : vector<256x4xf32>, vector<4x8xf32>, vector<256x8xf32> -> vector<256x8xf32>
    %26 = arith.addf %19, %25 : vector<256x8xf32>
    %c0_27 = arith.constant 0 : index
    %c1_28 = arith.constant 1 : index
    %c1_29 = arith.constant 1 : index
    %c0_30 = arith.constant 0 : index
    %27 = vector.load %arg1[%c0_27, %c1_28, %c1_29, %c0_30] : memref<1x18x18x4xf32, #tpu.memory_space<vmem>>, vector<1x16x16x4xf32>
    %28 = vector.shape_cast %27 : vector<1x16x16x4xf32> to vector<16x16x4xf32>
    %29 = vector.shape_cast %28 : vector<16x16x4xf32> to vector<256x4xf32>
    %c4 = arith.constant 4 : index
    %c0_31 = arith.constant 0 : index
    %c0_32 = arith.constant 0 : index
    %30 = vector.load %arg2[%c4, %c0_31, %c0_32] : memref<9x4x8xf32, #tpu.memory_space<vmem>>, vector<1x4x8xf32>
    %31 = vector.shape_cast %30 : vector<1x4x8xf32> to vector<4x8xf32>
    %cst_33 = arith.constant dense<0.000000e+00> : vector<256x8xf32>
    %32 = tpu.matmul %29, %31, %cst_33 {dimension_numbers = #tpu.dot_dimension_numbers<[1], [0], [0], [1], [0, 0, 1, 1], [], []>} : vector<256x4xf32>, vector<4x8xf32>, vector<256x8xf32> -> vector<256x8xf32>
    %33 = arith.addf %26, %32 : vector<256x8xf32>
    %c0_34 = arith.constant 0 : index
    %c1_35 = arith.constant 1 : index
    %c2_36 = arith.constant 2 : index
    %c0_37 = arith.constant 0 : index
    %34 = vector.load %arg1[%c0_34, %c1_35, %c2_36, %c0_37] : memref<1x18x18x4xf32, #tpu.memory_space<vmem>>, vector<1x16x16x4xf32>
    %35 = vector.shape_cast %34 : vector<1x16x16x4xf32> to vector<16x16x4xf32>
    %36 = vector.shape_cast %35 : vector<16x16x4xf32> to vector<256x4xf32>
    %c5 = arith.constant 5 : index
    %c0_38 = arith.constant 0 : index
    %c0_39 = arith.constant 0 : index
    %37 = vector.load %arg2[%c5, %c0_38, %c0_39] : memref<9x4x8xf32, #tpu.memory_space<vmem>>, vector<1x4x8xf32>
    %38 = vector.shape_cast %37 : vector<1x4x8xf32> to vector<4x8xf32>
    %cst_40 = arith.constant dense<0.000000e+00> : vector<256x8xf32>
    %39 = tpu.matmul %36, %38, %cst_40 {dimension_numbers = #tpu.dot_dimension_numbers<[1], [0], [0], [1], [0, 0, 1, 1], [], []>} : vector<256x4xf32>, vector<4x8xf32>, vector<256x8xf32> -> vector<256x8xf32>
    %40 = arith.addf %33, %39 : vector<256x8xf32>
    %c0_41 = arith.constant 0 : index
    %c2_42 = arith.constant 2 : index
    %c0_43 = arith.constant 0 : index
    %c0_44 = arith.constant 0 : index
    %41 = vector.load %arg1[%c0_41, %c2_42, %c0_43, %c0_44] : memref<1x18x18x4xf32, #tpu.memory_space<vmem>>, vector<1x16x16x4xf32>
    %42 = vector.shape_cast %41 : vector<1x16x16x4xf32> to vector<16x16x4xf32>
    %43 = vector.shape_cast %42 : vector<16x16x4xf32> to vector<256x4xf32>
    %c6 = arith.constant 6 : index
    %c0_45 = arith.constant 0 : index
    %c0_46 = arith.constant 0 : index
    %44 = vector.load %arg2[%c6, %c0_45, %c0_46] : memref<9x4x8xf32, #tpu.memory_space<vmem>>, vector<1x4x8xf32>
    %45 = vector.shape_cast %44 : vector<1x4x8xf32> to vector<4x8xf32>
    %cst_47 = arith.constant dense<0.000000e+00> : vector<256x8xf32>
    %46 = tpu.matmul %43, %45, %cst_47 {dimension_numbers = #tpu.dot_dimension_numbers<[1], [0], [0], [1], [0, 0, 1, 1], [], []>} : vector<256x4xf32>, vector<4x8xf32>, vector<256x8xf32> -> vector<256x8xf32>
    %47 = arith.addf %40, %46 : vector<256x8xf32>
    %c0_48 = arith.constant 0 : index
    %c2_49 = arith.constant 2 : index
    %c1_50 = arith.constant 1 : index
    %c0_51 = arith.constant 0 : index
    %48 = vector.load %arg1[%c0_48, %c2_49, %c1_50, %c0_51] : memref<1x18x18x4xf32, #tpu.memory_space<vmem>>, vector<1x16x16x4xf32>
    %49 = vector.shape_cast %48 : vector<1x16x16x4xf32> to vector<16x16x4xf32>
    %50 = vector.shape_cast %49 : vector<16x16x4xf32> to vector<256x4xf32>
    %c7 = arith.constant 7 : index
    %c0_52 = arith.constant 0 : index
    %c0_53 = arith.constant 0 : index
    %51 = vector.load %arg2[%c7, %c0_52, %c0_53] : memref<9x4x8xf32, #tpu.memory_space<vmem>>, vector<1x4x8xf32>
    %52 = vector.shape_cast %51 : vector<1x4x8xf32> to vector<4x8xf32>
    %cst_54 = arith.constant dense<0.000000e+00> : vector<256x8xf32>
    %53 = tpu.matmul %50, %52, %cst_54 {dimension_numbers = #tpu.dot_dimension_numbers<[1], [0], [0], [1], [0, 0, 1, 1], [], []>} : vector<256x4xf32>, vector<4x8xf32>, vector<256x8xf32> -> vector<256x8xf32>
    %54 = arith.addf %47, %53 : vector<256x8xf32>
    %c0_55 = arith.constant 0 : index
    %c2_56 = arith.constant 2 : index
    %c2_57 = arith.constant 2 : index
    %c0_58 = arith.constant 0 : index
    %55 = vector.load %arg1[%c0_55, %c2_56, %c2_57, %c0_58] : memref<1x18x18x4xf32, #tpu.memory_space<vmem>>, vector<1x16x16x4xf32>
    %56 = vector.shape_cast %55 : vector<1x16x16x4xf32> to vector<16x16x4xf32>
    %57 = vector.shape_cast %56 : vector<16x16x4xf32> to vector<256x4xf32>
    %c8 = arith.constant 8 : index
    %c0_59 = arith.constant 0 : index
    %c0_60 = arith.constant 0 : index
    %58 = vector.load %arg2[%c8, %c0_59, %c0_60] : memref<9x4x8xf32, #tpu.memory_space<vmem>>, vector<1x4x8xf32>
    %59 = vector.shape_cast %58 : vector<1x4x8xf32> to vector<4x8xf32>
    %cst_61 = arith.constant dense<0.000000e+00> : vector<256x8xf32>
    %60 = tpu.matmul %57, %59, %cst_61 {dimension_numbers = #tpu.dot_dimension_numbers<[1], [0], [0], [1], [0, 0, 1, 1], [], []>} : vector<256x4xf32>, vector<4x8xf32>, vector<256x8xf32> -> vector<256x8xf32>
    %61 = arith.addf %54, %60 : vector<256x8xf32>
    %cst_62 = arith.constant 5.000000e-01 : f32
    %62 = vector.broadcast %cst_62 : f32 to vector<256x8xf32>
    %63 = arith.mulf %62, %61 : vector<256x8xf32>
    %cst_63 = arith.constant 0.707106769 : f32
    %64 = vector.broadcast %cst_63 : f32 to vector<256x8xf32>
    %65 = arith.mulf %61, %64 : vector<256x8xf32>
    %66 = math.erf %65 : vector<256x8xf32>
    %cst_64 = arith.constant 1.000000e+00 : f32
    %67 = vector.broadcast %cst_64 : f32 to vector<256x8xf32>
    %68 = arith.addf %67, %66 : vector<256x8xf32>
    %69 = arith.mulf %63, %68 : vector<256x8xf32>
    %cst_65 = arith.constant dense<0.000000e+00> : vector<8xf32>
    %70 = vector.multi_reduction <add>, %69, %cst_65 [0] : vector<256x8xf32> to vector<8xf32>
    %71 = vector.shape_cast %70 : vector<8xf32> to vector<1x8xf32>
    %c0_66 = arith.constant 0 : index
    %c0_67 = arith.constant 0 : index
    %c0_68 = arith.constant 0 : index
    %72 = vector.load %arg4[%c0_66, %c0_67, %c0_68] : memref<1x2x8xf32, #tpu.memory_space<vmem>>, vector<1x1x8xf32>
    %73 = vector.shape_cast %72 : vector<1x1x8xf32> to vector<1x8xf32>
    %74 = vector.shape_cast %71 : vector<1x8xf32> to vector<1x1x8xf32>
    tpu.vector_store %arg4[%c0_66, %c0_67, %c0_68], %74 {strides = array<i32>} : memref<1x2x8xf32, #tpu.memory_space<vmem>>, vector<1x1x8xf32>,
    %75 = arith.mulf %69, %69 : vector<256x8xf32>
    %cst_69 = arith.constant dense<0.000000e+00> : vector<8xf32>
    %76 = vector.multi_reduction <add>, %75, %cst_69 [0] : vector<256x8xf32> to vector<8xf32>
    %77 = vector.shape_cast %76 : vector<8xf32> to vector<1x8xf32>
    %c0_70 = arith.constant 0 : index
    %c1_71 = arith.constant 1 : index
    %c0_72 = arith.constant 0 : index
    %78 = vector.load %arg4[%c0_70, %c1_71, %c0_72] : memref<1x2x8xf32, #tpu.memory_space<vmem>>, vector<1x1x8xf32>
    %79 = vector.shape_cast %78 : vector<1x1x8xf32> to vector<1x8xf32>
    %80 = vector.shape_cast %77 : vector<1x8xf32> to vector<1x1x8xf32>
    tpu.vector_store %arg4[%c0_70, %c1_71, %c0_72], %80 {strides = array<i32>} : memref<1x2x8xf32, #tpu.memory_space<vmem>>, vector<1x1x8xf32>,
    %81 = tpu.transpose %69, [1, 0] : vector<256x8xf32> -> vector<8x256xf32>
    %c0_73 = arith.constant 0 : index
    %c0_74 = arith.constant 0 : index
    %c0_75 = arith.constant 0 : index
    %82 = vector.load %arg3[%c0_73, %c0_74, %c0_75] : memref<1x8x256xf32, #tpu.memory_space<vmem>>, vector<1x8x256xf32>
    %83 = vector.shape_cast %82 : vector<1x8x256xf32> to vector<8x256xf32>
    %84 = vector.shape_cast %81 : vector<8x256xf32> to vector<1x8x256xf32>
    tpu.vector_store %arg3[%c0_73, %c0_74, %c0_75], %84 {strides = array<i32>} : memref<1x8x256xf32, #tpu.memory_space<vmem>>, vector<1x8x256xf32>,
    return
  }
  func.func @transform_0(%arg0: i32) -> (i32, i32, i32, i32) {
    %c0_i32 = arith.constant 0 : i32
    %c0_i32_0 = arith.constant 0 : i32
    %c0_i32_1 = arith.constant 0 : i32
    %c0_i32_2 = arith.constant 0 : i32
    return %arg0, %c0_i32, %c0_i32_0, %c0_i32_1 : i32, i32, i32, i32
  }
  func.func @transform_1(%arg0: i32) -> (i32, i32, i32) {
    %c0_i32 = arith.constant 0 : i32
    %c0_i32_0 = arith.constant 0 : i32
    %c0_i32_1 = arith.constant 0 : i32
    %c0_i32_2 = arith.constant 0 : i32
    return %c0_i32, %c0_i32_0, %c0_i32_1 : i32, i32, i32
  }
  func.func @transform_2(%arg0: i32) -> (i32, i32, i32) {
    %c0_i32 = arith.constant 0 : i32
    %c0_i32_0 = arith.constant 0 : i32
    %c0_i32_1 = arith.constant 0 : i32
    return %arg0, %c0_i32, %c0_i32_0 : i32, i32, i32
  }
  func.func @transform_3(%arg0: i32) -> (i32, i32, i32) {
    %c0_i32 = arith.constant 0 : i32
    %c0_i32_0 = arith.constant 0 : i32
    %c0_i32_1 = arith.constant 0 : i32
    return %arg0, %c0_i32, %c0_i32_0 : i32, i32, i32
  }
}

module attributes {stable_mosaic.version = 11 : i64} {
  func.func @_bn_affine_kernel(%arg0: i32, %arg1: memref<1x8x256xf32, #tpu.memory_space<vmem>>, %arg2: memref<8x1xf32, #tpu.memory_space<vmem>>, %arg3: memref<8x1xf32, #tpu.memory_space<vmem>>, %arg4: memref<1x8x256xf32, #tpu.memory_space<vmem>>) attributes {dimension_semantics = [#tpu.dimension_semantics<parallel>], iteration_bounds = array<i64: 2>, scalar_prefetch = 0 : i64, scratch_operands = 0 : i64, tpu.core_type = #tpu.core_type<tc>, window_params = [{transform_indices = @transform_0, window_bounds = array<i64: 1, 8, 256>}, {pipeline_mode = #tpu.pipeline_mode<synchronous>, transform_indices = @transform_1, window_bounds = array<i64: 8, 1>}, {pipeline_mode = #tpu.pipeline_mode<synchronous>, transform_indices = @transform_2, window_bounds = array<i64: 8, 1>}, {transform_indices = @transform_3, window_bounds = array<i64: 1, 8, 256>}]} {
    %c0 = arith.constant 0 : index
    %c0_0 = arith.constant 0 : index
    %c0_1 = arith.constant 0 : index
    %0 = vector.load %arg1[%c0, %c0_0, %c0_1] : memref<1x8x256xf32, #tpu.memory_space<vmem>>, vector<1x8x256xf32>
    %1 = vector.shape_cast %0 : vector<1x8x256xf32> to vector<8x256xf32>
    %c0_2 = arith.constant 0 : index
    %c0_3 = arith.constant 0 : index
    %2 = vector.load %arg2[%c0_2, %c0_3] : memref<8x1xf32, #tpu.memory_space<vmem>>, vector<8x1xf32>
    %3 = vector.broadcast %2 : vector<8x1xf32> to vector<8x256xf32>
    %4 = arith.mulf %1, %3 : vector<8x256xf32>
    %c0_4 = arith.constant 0 : index
    %c0_5 = arith.constant 0 : index
    %5 = vector.load %arg3[%c0_4, %c0_5] : memref<8x1xf32, #tpu.memory_space<vmem>>, vector<8x1xf32>
    %6 = vector.broadcast %5 : vector<8x1xf32> to vector<8x256xf32>
    %7 = arith.addf %4, %6 : vector<8x256xf32>
    %c0_6 = arith.constant 0 : index
    %c0_7 = arith.constant 0 : index
    %c0_8 = arith.constant 0 : index
    %8 = vector.load %arg4[%c0_6, %c0_7, %c0_8] : memref<1x8x256xf32, #tpu.memory_space<vmem>>, vector<1x8x256xf32>
    %9 = vector.shape_cast %8 : vector<1x8x256xf32> to vector<8x256xf32>
    %10 = vector.shape_cast %7 : vector<8x256xf32> to vector<1x8x256xf32>
    tpu.vector_store %arg4[%c0_6, %c0_7, %c0_8], %10 {strides = array<i32>} : memref<1x8x256xf32, #tpu.memory_space<vmem>>, vector<1x8x256xf32>,
    return
  }
  func.func @transform_0(%arg0: i32) -> (i32, i32, i32) {
    %c0_i32 = arith.constant 0 : i32
    %c0_i32_0 = arith.constant 0 : i32
    %c0_i32_1 = arith.constant 0 : i32
    return %arg0, %c0_i32, %c0_i32_0 : i32, i32, i32
  }
  func.func @transform_1(%arg0: i32) -> (i32, i32) {
    %c0_i32 = arith.constant 0 : i32
    %c0_i32_0 = arith.constant 0 : i32
    %c0_i32_1 = arith.constant 0 : i32
    return %c0_i32, %c0_i32_0 : i32, i32
  }
  func.func @transform_2(%arg0: i32) -> (i32, i32) {
    %c0_i32 = arith.constant 0 : i32
    %c0_i32_0 = arith.constant 0 : i32
    %c0_i32_1 = arith.constant 0 : i32
    return %c0_i32, %c0_i32_0 : i32, i32
  }
  func.func @transform_3(%arg0: i32) -> (i32, i32, i32) {
    %c0_i32 = arith.constant 0 : i32
    %c0_i32_0 = arith.constant 0 : i32
    %c0_i32_1 = arith.constant 0 : i32
    return %arg0, %c0_i32, %c0_i32_0 : i32, i32, i32
  }
}

</mosaic_0001>

<bundles_post_ra>
// kernel: conv_gelu_bn.3
= control target key start
LH: loop header
LB: loop body
LE: loop exit
PB: predicated region body
PF: predicated region fallthrough
CT: control target
= control target key end

     0   :  { %s298_s12 = smov 0   ;;  %s321_s0 = inlined_call_operand.vmem [shape: f32[2,8,256], index: 0, kind: input, shape index: {}]   ;;  %s322_s1 = inlined_call_operand.vmem [shape: f32[8,1], index: 1, kind: input, shape index: {}]   ;;  %s323_s2 = inlined_call_operand.vmem [shape: f32[8,1], index: 2, kind: input, shape index: {}]   ;;  %s324_s3 = inlined_call_operand.vmem [shape: f32[2,8,256], index: 3, kind: output, shape index: {}]  }
   0x1 LB: > { %s246_s13 = sadd.s32 4294967295, %s275_s12   ;;  %p250_p0 = scmp.ge.s32.totalorder %s275_s12, 1  ;;  %s275_s12 = sphi %s298_s12, %s13_s12  }
   0x2   : > { %p137_p1 = scmp.lt.s32.totalorder %s275_s12, 3 }
   0x4   : > { %p138_p2 = pnand %p250_p0, %p137_p1 }
   0x5   : > { %p161_p3 = scmp.lt.s32.totalorder (!%p138_p2), %s246_s13, 1 }
   0x6   : > { %141 = sbr.rel (%p138_p2) target bundleno = 140 (0x8c), region = 32 }
   0xb   : > { %v173_v0 = vld [vmem:[%s322_s1] sm:$0xff]  ;;  %v277_v1 = vmov 0   ;;  %s326_s13 = smov (!%p161_p3, %s246_s13), 1 }
   0xc   : > { %268 = vset.pattern.permute.xlu0 %v277_v1  ;;  %v181_v2 = vld [vmem:[%s323_s2] sm:$0xff]  ;;  %s257_s18 = sshll.u32 %s326_s13, 4 }
   0xd   : > { %176 = vperm.xlu0 %268, %v173_v0   ;;  %s165_s21 = scalar_lea.vmem %s321_s0, %s257_s18  ;;  %s170_s24 = scalar_lea.vmem %s324_s3, %s257_s18 }
   0xe   : > { %v171_v4 = vld [vmem:[%s165_s21] sm:$0xff]  ;;  %v172_v5 = vld [vmem:[%s165_s21 + $0x8] sm:$0xff] }
  0x15   : > { %184 = vperm.xlu0 %268, %v181_v2  }
  0x7f   : > { %v177_v3 = vpop.permute.xlu0 %176 }
  0x80   : > { %v179_v6 = vmul.f32 %v177_v3, %v171_v4  ;;  %v180_v7 = vmul.f32 %v177_v3, %v172_v5 }
  0x87   : > { %v185_v8 = vpop.permute.xlu0 %184 }
  0x88   : > { %v187_v9 = vadd.f32 %v185_v8, %v179_v6  ;;  %v188_v10 = vadd.f32 %v185_v8, %v180_v7 }
  0x8a   : > { %189 = vst [vmem:[%s170_s24] sm:$0xff] %v187_v9 }
  0x8b   : > { %190 = vst [vmem:[%s170_s24 + $0x8] sm:$0xff] %v188_v10 }
  0x8c PF: > { %s13_s12 = sadd.s32 1, %s275_s12  }
  0x8d   : > { %p10_p4 = scmp.ge.s32.totalorder %s13_s12, 4  }
  0x8f   :  { %12 = sbr.rel (!%p10_p4) target bundleno = 1 (0x1), region = 62 }

// kernel: conv_gelu_bn.2
= control target key start
LH: loop header
LB: loop body
LE: loop exit
PB: predicated region body
PF: predicated region fallthrough
CT: control target
= control target key end

     0   :  { %s5002_s12 = smov 0   ;;  %s7719_s0 = inlined_call_operand.vmem [shape: f32[2,18,18,4], index: 0, kind: input, shape index: {}]   ;;  %s7720_s1 = inlined_call_operand.vmem [shape: f32[9,4,8], index: 1, kind: input, shape index: {}]   ;;  %s7721_s2 = inlined_call_operand.vmem [shape: f32[2,8,256], index: 2, kind: output, shape index: {0}]   ;;  %s7722_s3 = inlined_call_operand.vmem [shape: f32[2,2,8], index: 3, kind: output, shape index: {1}]  }
   0x1 LB: > { %s4357_s13 = sadd.s32 4294967295, %s4980_s12   ;;  %p4361_p0 = scmp.ge.s32.totalorder %s4980_s12, 1  ;;  %s4980_s12 = sphi %s5002_s12, %s14_s12  }
   0x2   : > { %p140_p1 = scmp.lt.s32.totalorder %s4980_s12, 3 }
   0x4   : > { %p141_p2 = pnand %p4361_p0, %p140_p1 }
   0x6   : > { %144 = sbr.rel (%p141_p2) target bundleno = 960 (0x3c0), region = 28 }
   0xb   : > { %v4366_v0 = vld [vmem:[%s7720_s1 + $0x4] sm:$0xf]  ;;  %vm346_vm0 = vcmask 1043456   ;;  %p168_p3 = scmp.lt.s32.totalorder %s4357_s13, 1  ;;  %v4433_v1 = vld [vmem:[%s7720_s1 + $0x8] sm:$0xf] }
   0xc   : > { %4898 = vmatpush.msk.msra.mxu1 %vm346_vm0, %v4366_v0  ;;  %4899 = vmatpush.msk.msra.mxu2 %vm346_vm0, %v4366_v0  ;;  %v4499_v2 = vld [vmem:[%s7720_s1 + $0xc] sm:$0xf]  ;;  %v214_v3 = vld [vmem:[%s7720_s1] sm:$0xf]  ;;  %v4565_v4 = vld [vmem:[%s7720_s1 + $0x10] sm:$0xf] }
   0xd   : > { %s7910_s13 = smov (!%p168_p3, %s4357_s13), 1  ;;  %4900 = vmatpush.msk.msra.mxu3 %vm346_vm0, %v4366_v0  ;;  %4367 = vmatpush.msk.msra.mxu0 %vm346_vm0, %v4366_v0  ;;  %vm249_vm1 = vcmask 31744   ;;  %v4697_v25 = vld [vmem:[%s7720_s1 + $0x18] sm:$0xf]  ;;  %v4763_v26 = vld [vmem:[%s7720_s1 + $0x1c] sm:$0xf] }
   0xe   : > { %4434 = vmatpush.msk.msrb.mxu2 %vm346_vm0, %v4433_v1  ;;  %4400 = vmatpush.msk.msrb.mxu1 %vm346_vm0, %v214_v3  ;;  %s4901_s24 = smul.u32 432, %s7910_s13  ;;  %v4631_v27 = vld [vmem:[%s7720_s1 + $0x14] sm:$0xf]  ;;  %v4829_v32 = vld [vmem:[%s7720_s1 + $0x20] sm:$0xf]  ;;  %vm4031_vm10 = vcmask 64512  }
   0xf   : > { %4500 = vmatpush.msk.msrb.mxu3 %vm346_vm0, %v4499_v2  ;;  %4566 = vmatpush.msk.msrb.mxu0 %vm346_vm0, %v4565_v4  ;;  %s4897_s9 = sshll.u32 %s7910_s13, 4  ;;  %s4365_s10 = sshll.u32 %s7910_s13, 1 }
  0x10   : > { %s5039_s27 = scalar_lea.vmem %s7719_s0, %s4901_s24  ;;  %s177_s15 = scalar_lea.vmem %s7721_s2, %s4897_s9 }
  0x11   : > { %v5042_v5 = vld [vmem:[%s5039_s27 + $0x61] sm:$0xff]  ;;  %v5059_v9 = vld [vmem:[%s5039_s27 + $0x69] sm:$0xff]  ;;  %v5076_v13 = vld [vmem:[%s5039_s27 + $0x79] sm:$0xff]  ;;  %s181_s18 = scalar_lea.vmem %s7722_s3, %s4365_s10 }
  0x12   : > { %v5045_v6 = vld [vmem:[%s5039_s27 + $0xc1] sm:$0xff]  ;;  %4376 = vmatmul.msk.f32.vlgmr.msra.gmra.mxu1 %vm249_vm1, %v5042_v5  ;;  %v5062_v10 = vld [vmem:[%s5039_s27 + $0xc9] sm:$0xff]  ;;  %v5079_v14 = vld [vmem:[%s5039_s27 + $0xd9] sm:$0xff] }
  0x13   : > { %v5048_v7 = vld [vmem:[%s5039_s27 + $0x121] sm:$0xff]  ;;  %4384 = vmatmul.msk.f32.vlgmr.msra.gmra.mxu2 %vm249_vm1, %v5045_v6  ;;  %v5065_v11 = vld [vmem:[%s5039_s27 + $0x129] sm:$0xff]  ;;  %v5082_v15 = vld [vmem:[%s5039_s27 + $0x139] sm:$0xff]  ;;  %4632 = vmatpush.msk.msra.mxu1 %vm346_vm0, %v4631_v27 }
  0x14   : > { %v215_v8 = vld [vmem:[%s5039_s27 + $0x1] sm:$0xff]  ;;  %4392 = vmatmul.msk.f32.vlgmr.msra.gmra.mxu3 %vm249_vm1, %v5048_v7  ;;  %v216_v12 = vld [vmem:[%s5039_s27 + $0x9] sm:$0xff]  ;;  %v217_v16 = vld [vmem:[%s5039_s27 + $0x19] sm:$0xff]  ;;  %4698 = vmatpush.msk.msra.mxu2 %vm346_vm0, %v4697_v25 }
  0x15   : > { %4368 = vmatmul.msk.f32.vlgmr.msra.gmra.mxu0 %vm249_vm1, %v215_v8  ;;  %v5093_v17 = vld [vmem:[%s5039_s27 + $0x81] sm:$0xff]  ;;  %v5110_v21 = vld [vmem:[%s5039_s27 + $0x91] sm:$0xff]  ;;  %4764 = vmatpush.msk.msra.mxu3 %vm346_vm0, %v4763_v26  ;;  %v5142_v28 = vld [vmem:[%s5039_s27 + $0x99] sm:$0xff] }
  0x16   : > { %v5096_v18 = vld [vmem:[%s5039_s27 + $0xe1] sm:$0xff]  ;;  %v5113_v22 = vld [vmem:[%s5039_s27 + $0xf1] sm:$0xff]  ;;  %v5145_v29 = vld [vmem:[%s5039_s27 + $0xf9] sm:$0xff]  ;;  %4830 = vmatpush.msk.msra.mxu0 %vm346_vm0, %v4829_v32 }
  0x17   : > { %v5099_v19 = vld [vmem:[%s5039_s27 + $0x141] sm:$0xff]  ;;  %v5116_v23 = vld [vmem:[%s5039_s27 + $0x151] sm:$0xff]  ;;  %v5148_v30 = vld [vmem:[%s5039_s27 + $0x159] sm:$0xff] }
  0x18   : > { %v218_v20 = vld [vmem:[%s5039_s27 + $0x21] sm:$0xff]  ;;  %v5119_v24 = vld [vmem:[%s5039_s27 + $0x31] sm:$0xff]  ;;  %v5151_v31 = vld [vmem:[%s5039_s27 + $0x39] sm:$0xff] }
  0x19   : > { %v5166_v33 = vld [vmem:[%s5039_s27 + $0xa9] sm:$0xff]  ;;  %v5186_v37 = vld [vmem:[%s5039_s27 + $0xb1] sm:$0xff]  ;;  %v182_v41 = vld [vmem:[%s5039_s27] sm:$0xff] }
  0x1a   : > { %4377 = vmatmul.msk.f32.gmra.mxu1 %vm249_vm1, %v5059_v9  ;;  %v5169_v34 = vld [vmem:[%s5039_s27 + $0x109] sm:$0xff]  ;;  %v5189_v38 = vld [vmem:[%s5039_s27 + $0x111] sm:$0xff]  ;;  %v4468_v46 = vld [vmem:[%s5039_s27 + $0x20] sm:$0xff] }
  0x1b   : > { %4385 = vmatmul.msk.f32.gmra.mxu2 %vm249_vm1, %v5062_v10  ;;  %v5172_v35 = vld [vmem:[%s5039_s27 + $0x169] sm:$0xff]  ;;  %v5192_v39 = vld [vmem:[%s5039_s27 + $0x171] sm:$0xff]  ;;  %v5220_v47 = vld [vmem:[%s5039_s27 + $0x1a] sm:$0xff] }
  0x1c   : > { %4393 = vmatmul.msk.f32.gmra.mxu3 %vm249_vm1, %v5065_v11  ;;  %v5175_v36 = vld [vmem:[%s5039_s27 + $0x49] sm:$0xff]  ;;  %v5195_v40 = vld [vmem:[%s5039_s27 + $0x51] sm:$0xff]  ;;  %v5260_v53 = vld [vmem:[%s5039_s27 + $0x3a] sm:$0xff] }
  0x1d   : > { %4369 = vmatmul.msk.f32.gmra.mxu0 %vm249_vm1, %v216_v12  ;;  %v675_v42 = vld [vmem:[%s5039_s27 + $0x2] sm:$0xff]  ;;  %v4467_v43 = vld [vmem:[%s5039_s27 + $0x18] sm:$0xff]  ;;  %v676_v45 = vld [vmem:[%s5039_s27 + $0xa] sm:$0xff] }
  0x1e   : > { %v183_v44 = vld [vmem:[%s5039_s27 + $0x8] sm:$0xff]  ;;  %v5223_v48 = vld [vmem:[%s5039_s27 + $0x30] sm:$0xff]  ;;  %v5236_v50 = vld [vmem:[%s5039_s27 + $0x38] sm:$0xff] }
  0x1f   : > { %v5233_v49 = vld [vmem:[%s5039_s27 + $0x22] sm:$0xff]  ;;  %v5246_v51 = vld [vmem:[%s5039_s27 + $0x32] sm:$0xff]  ;;  %v5274_v55 = vld [vmem:[%s5039_s27 + $0x4a] sm:$0xff] }
  0x20   : > { %v5249_v52 = vld [vmem:[%s5039_s27 + $0x48] sm:$0xff]  ;;  %v5263_v54 = vld [vmem:[%s5039_s27 + $0x50] sm:$0xff]  ;;  %v5277_v56 = vld [vmem:[%s5039_s27 + $0x60] sm:$0xff] }
  0x21   : > { %v5288_v57 = vld [vmem:[%s5039_s27 + $0x52] sm:$0xff]  ;;  %v5291_v58 = vld [vmem:[%s5039_s27 + $0x68] sm:$0xff]  ;;  %v5329_v3 = vld [vmem:[%s5039_s27 + $0x80] sm:$0xff] }
  0x22   : > { %4378 = vmatmul.msk.f32.gmra.mxu1 %vm249_vm1, %v5076_v13  ;;  %7747 = vst [vmem:[#allocation2_spill] sm:$0xff] %v5291_v58  ;;  %v5304_v60 = vld [vmem:[%s5039_s27 + $0x62] sm:$0xff]  ;;  %v5307_v61 = vld [vmem:[%s5039_s27 + $0x78] sm:$0xff]  ;;  %v5326_v2 = vld [vmem:[%s5039_s27 + $0x6a] sm:$0xff] }
  0x23   : > { %4386 = vmatmul.msk.f32.gmra.mxu2 %vm249_vm1, %v5079_v14  ;;  %7748 = vst [vmem:[#allocation3_spill] sm:$0xff] %v5307_v61  ;;  %v5348_v12 = vld [vmem:[%s5039_s27 + $0x7a] sm:$0xff]  ;;  %v5370_v26 = vld [vmem:[%s5039_s27 + $0x82] sm:$0xff] }
  0x24   : > { %4394 = vmatmul.msk.f32.gmra.mxu3 %vm249_vm1, %v5082_v15  ;;  %7750 = vst [vmem:[#allocation5_spill] sm:$0xff] %v5326_v2  ;;  %v5373_v27 = vld [vmem:[%s5039_s27 + $0x98] sm:$0xff] }
  0x25   : > { %4370 = vmatmul.msk.f32.gmra.mxu0 %vm249_vm1, %v217_v16  ;;  %7751 = vst [vmem:[#allocation6_spill] sm:$0xff] %v5329_v3 }
  0x26   : > { %7753 = vst [vmem:[#allocation8_spill] sm:$0xff] %v5348_v12 }
  0x27   : > { %7756 = vst [vmem:[#allocation11_spill] sm:$0xff] %v5370_v26 }
  0x28   : > { %7757 = vst [vmem:[#allocation12_spill] sm:$0xff] %v5373_v27 }
  0x2a   : > { %4379 = vmatmul.msk.f32.gmra.mxu1 %vm249_vm1, %v5093_v17 }
  0x2b   : > { %4387 = vmatmul.msk.f32.gmra.mxu2 %vm249_vm1, %v5096_v18 }
  0x2c   : > { %4395 = vmatmul.msk.f32.gmra.mxu3 %vm249_vm1, %v5099_v19 }
  0x2d   : > { %4371 = vmatmul.msk.f32.gmra.mxu0 %vm249_vm1, %v218_v20 }
  0x32   : > { %4380 = vmatmul.msk.f32.gmra.mxu1 %vm249_vm1, %v5110_v21 }
  0x33   : > { %4388 = vmatmul.msk.f32.gmra.mxu2 %vm249_vm1, %v5113_v22 }
  0x34   : > { %4396 = vmatmul.msk.f32.gmra.mxu3 %vm249_vm1, %v5116_v23 }
  0x35   : > { %4372 = vmatmul.msk.f32.gmra.mxu0 %vm249_vm1, %v5119_v24 }
  0x3a   : > { %4381 = vmatmul.msk.f32.gmra.mxu1 %vm249_vm1, %v5142_v28 }
  0x3b   : > { %4389 = vmatmul.msk.f32.gmra.mxu2 %vm249_vm1, %v5145_v29 }
  0x3c   : > { %4397 = vmatmul.msk.f32.gmra.mxu3 %vm249_vm1, %v5148_v30 }
  0x3d   : > { %4373 = vmatmul.msk.f32.gmra.mxu0 %vm249_vm1, %v5151_v31 }
  0x42   : > { %4382 = vmatmul.msk.f32.gmra.mxu1 %vm249_vm1, %v5166_v33 }
  0x43   : > { %4390 = vmatmul.msk.f32.gmra.mxu2 %vm249_vm1, %v5169_v34 }
  0x44   : > { %4398 = vmatmul.msk.f32.gmra.mxu3 %vm249_vm1, %v5172_v35 }
  0x45   : > { %4374 = vmatmul.msk.f32.gmra.mxu0 %vm249_vm1, %v5175_v36 }
  0x4a   : > { %4383 = vmatmul.msk.f32.gmra.mxu1 %vm249_vm1, %v5186_v37 }
  0x4b   : > { %4391 = vmatmul.msk.f32.gmra.mxu2 %vm249_vm1, %v5189_v38 }
  0x4c   : > { %4399 = vmatmul.msk.f32.gmra.mxu3 %vm249_vm1, %v5192_v39 }
  0x4d   : > { %4375 = vmatmul.msk.f32.gmra.mxu0 %vm249_vm1, %v5195_v40 }
  0x52   : > { %4401 = vmatmul.msk.f32.vlgmr.msrb.gmra.mxu1 %vm249_vm1, %v182_v41 }
  0x53   : > { %4435 = vmatmul.msk.f32.vlgmr.msrb.gmra.mxu2 %vm249_vm1, %v675_v42 }
  0x54   : > { %4501 = vmatmul.msk.f32.vlgmr.msrb.gmra.mxu3 %vm249_vm1, %v4467_v43 }
  0x55   : > { %4567 = vmatmul.msk.f32.vlgmr.msrb.gmra.mxu0 %vm249_vm1, %v217_v16 }
  0x5a   : > { %4402 = vmatmul.msk.f32.gmra.mxu1 %vm249_vm1, %v183_v44  ;;  %v5395_v44 = vld [vmem:[%s5039_s27 + $0xa8] sm:$0xff] }
  0x5b   : > { %4436 = vmatmul.msk.f32.gmra.mxu2 %vm249_vm1, %v676_v45  ;;  %7760 = vst [vmem:[#allocation15_spill] sm:$0xff] %v5395_v44 }
  0x5c   : > { %4502 = vmatmul.msk.f32.gmra.mxu3 %vm249_vm1, %v4468_v46 }
  0x5d   : > { %4568 = vmatmul.msk.f32.gmra.mxu0 %vm249_vm1, %v218_v20 }
  0x62   : > { %4403 = vmatmul.msk.f32.gmra.mxu1 %vm249_vm1, %v4467_v43  ;;  %v5392_v43 = vld [vmem:[%s5039_s27 + $0x92] sm:$0xff] }
  0x63   : > { %4437 = vmatmul.msk.f32.gmra.mxu2 %vm249_vm1, %v5220_v47  ;;  %7759 = vst [vmem:[#allocation14_spill] sm:$0xff] %v5392_v43 }
  0x64   : > { %4503 = vmatmul.msk.f32.gmra.mxu3 %vm249_vm1, %v5223_v48 }
  0x65   : > { %4569 = vmatmul.msk.f32.gmra.mxu0 %vm249_vm1, %v5119_v24 }
  0x6a   : > { %4404 = vmatmul.msk.f32.gmra.mxu1 %vm249_vm1, %v4468_v46 }
  0x6b   : > { %4438 = vmatmul.msk.f32.gmra.mxu2 %vm249_vm1, %v5233_v49 }
  0x6c   : > { %4504 = vmatmul.msk.f32.gmra.mxu3 %vm249_vm1, %v5236_v50 }
  0x6d   : > { %4570 = vmatmul.msk.f32.gmra.mxu0 %vm249_vm1, %v5151_v31 }
  0x72   : > { %4405 = vmatmul.msk.f32.gmra.mxu1 %vm249_vm1, %v5223_v48 }
  0x73   : > { %4439 = vmatmul.msk.f32.gmra.mxu2 %vm249_vm1, %v5246_v51 }
  0x74   : > { %4505 = vmatmul.msk.f32.gmra.mxu3 %vm249_vm1, %v5249_v52 }
  0x75   : > { %4571 = vmatmul.msk.f32.gmra.mxu0 %vm249_vm1, %v5175_v36 }
  0x7a   : > { %4406 = vmatmul.msk.f32.gmra.mxu1 %vm249_vm1, %v5236_v50 }
  0x7b   : > { %4440 = vmatmul.msk.f32.gmra.mxu2 %vm249_vm1, %v5260_v53 }
  0x7c   : > { %4506 = vmatmul.msk.f32.gmra.mxu3 %vm249_vm1, %v5263_v54 }
  0x7d   : > { %4572 = vmatmul.msk.f32.gmra.mxu0 %vm249_vm1, %v5195_v40 }
  0x82   : > { %4407 = vmatmul.msk.f32.gmra.mxu1 %vm249_vm1, %v5249_v52 }
  0x83   : > { %4441 = vmatmul.msk.f32.gmra.mxu2 %vm249_vm1, %v5274_v55 }
  0x84   : > { %4507 = vmatmul.msk.f32.gmra.mxu3 %vm249_vm1, %v5277_v56 }
  0x85   : > { %4573 = vmatmul.msk.f32.gmra.mxu0 %vm249_vm1, %v5042_v5 }
  0x8a   : > { %4408 = vmatmul.msk.f32.gmra.mxu1 %vm249_vm1, %v5263_v54 }
  0x8b   : > { %4442 = vmatmul.msk.f32.gmra.mxu2 %vm249_vm1, %v5288_v57 }
  0x8c   : > { %4508 = vmatmul.msk.f32.gmra.mxu3 %vm249_vm1, %v5291_v58 }
  0x8d   : > { %4574 = vmatmul.msk.f32.gmra.mxu0 %vm249_vm1, %v5059_v9 }
  0x8f   : > { %v5301_v59 = vpop.f32.mrf.mxu1 }
  0x92   : > { %v5309_v62 = vpop.f32.mrf.mxu0  ;;  %4409 = vmatmul.msk.f32.gmra.mxu1 %vm249_vm1, %v5277_v56 }
  0x93   : > { %4443 = vmatmul.msk.f32.gmra.mxu2 %vm249_vm1, %v5304_v60 }
  0x94   : > { %4509 = vmatmul.msk.f32.gmra.mxu3 %vm249_vm1, %v5307_v61 }
  0x95   : > { %4575 = vmatmul.msk.f32.gmra.mxu0 %vm249_vm1, %v5076_v13  ;;  %v5351_v13 = vld [vmem:[%s5039_s27 + $0x90] sm:$0xff] }
  0x96   : > { %v5319_v63 = vpop.f32.mrf.mxu2  ;;  %7754 = vst [vmem:[#allocation9_spill] sm:$0xff] %v5351_v13 }
  0x97   : > { %v5321_v0 = vpop.f32.mrf.mxu3  ;;  %v5323_v1 = vpop.f32.mrf.mxu1 }
  0x98   : > { %7749 = vst [vmem:[#allocation4_spill] sm:$0xff] %v5321_v0 }
  0x9a   : > { %v5331_v4 = vpop.f32.mrf.mxu0  ;;  %4410 = vmatmul.msk.f32.gmra.mxu1 %vm249_vm1, %v5291_v58  ;;  %v5496_v58 = vld [vmem:[%s5039_s27 + $0xe0] sm:$0xff] }
  0x9b   : > { %4444 = vmatmul.msk.f32.gmra.mxu2 %vm249_vm1, %v5326_v2  ;;  %v5493_v2 = vld [vmem:[%s5039_s27 + $0xca] sm:$0xff] }
  0x9c   : > { %4510 = vmatmul.msk.f32.gmra.mxu3 %vm249_vm1, %v5329_v3 }
  0x9d   : > { %4576 = vmatmul.msk.f32.gmra.mxu0 %vm249_vm1, %v5093_v17 }
  0x9e   : > { %v5341_v5 = vpop.f32.mrf.mxu2 }
  0x9f   : > { %v5343_v8 = vpop.f32.mrf.mxu3  ;;  %v5345_v9 = vpop.f32.mrf.mxu1 }
  0xa0   : > { %7752 = vst [vmem:[#allocation7_spill] sm:$0xff] %v5343_v8  ;;  %v5417_v8 = vld [vmem:[%s5039_s27 + $0xb0] sm:$0xff] }
  0xa1   : > { %7764 = vst [vmem:[#allocation19_spill] sm:$0xff] %v5417_v8 }
  0xa2   : > { %v5353_v16 = vpop.f32.mrf.mxu0  ;;  %4411 = vmatmul.msk.f32.gmra.mxu1 %vm249_vm1, %v5307_v61  ;;  %v5481_v61 = vld [vmem:[%s5039_s27 + $0xd8] sm:$0xff] }
  0xa3   : > { %4445 = vmatmul.msk.f32.gmra.mxu2 %vm249_vm1, %v5348_v12 }
  0xa4   : > { %4511 = vmatmul.msk.f32.gmra.mxu3 %vm249_vm1, %v5351_v13 }
  0xa5   : > { %4577 = vmatmul.msk.f32.gmra.mxu0 %vm249_vm1, %v5110_v21 }
  0xa6   : > { %v5363_v17 = vpop.f32.mrf.mxu2 }
  0xa7   : > { %v5365_v20 = vpop.f32.mrf.mxu3  ;;  %v5367_v25 = vpop.f32.mrf.mxu1 }
  0xa8   : > { %7755 = vst [vmem:[#allocation10_spill] sm:$0xff] %v5365_v20  ;;  %v5414_v20 = vld [vmem:[%s5039_s27 + $0x9a] sm:$0xff] }
  0xa9   : > { %7763 = vst [vmem:[#allocation18_spill] sm:$0xff] %v5414_v20 }
  0xaa   : > { %v5375_v32 = vpop.f32.mrf.mxu0  ;;  %4412 = vmatmul.msk.f32.gmra.mxu1 %vm249_vm1, %v5329_v3  ;;  %v5458_v3 = vld [vmem:[%s5039_s27 + $0xb2] sm:$0xff] }
  0xab   : > { %4446 = vmatmul.msk.f32.gmra.mxu2 %vm249_vm1, %v5370_v26  ;;  %7771 = vst [vmem:[#allocation26_spill] sm:$0xff] %v5458_v3 }
  0xac   : > { %4512 = vmatmul.msk.f32.gmra.mxu3 %vm249_vm1, %v5373_v27 }
  0xad   : > { %4578 = vmatmul.msk.f32.gmra.mxu0 %vm249_vm1, %v5142_v28 }
  0xae   : > { %v5385_v21 = vpop.f32.mrf.mxu2 }
  0xaf   : > { %v5387_v41 = vpop.f32.mrf.mxu3  ;;  %v5389_v42 = vpop.f32.mrf.mxu1 }
  0xb0   : > { %7758 = vst [vmem:[#allocation13_spill] sm:$0xff] %v5387_v41 }
  0xb2   : > { %v5397_v45 = vpop.f32.mrf.mxu0  ;;  %4413 = vmatmul.msk.f32.gmra.mxu1 %vm249_vm1, %v5351_v13  ;;  %v5436_v13 = vld [vmem:[%s5039_s27 + $0xaa] sm:$0xff] }
  0xb3   : > { %4447 = vmatmul.msk.f32.gmra.mxu2 %vm249_vm1, %v5392_v43  ;;  %7767 = vst [vmem:[#allocation22_spill] sm:$0xff] %v5436_v13 }
  0xb4   : > { %4513 = vmatmul.msk.f32.gmra.mxu3 %vm249_vm1, %v5395_v44 }
  0xb5   : > { %4579 = vmatmul.msk.f32.gmra.mxu0 %vm249_vm1, %v5166_v33 }
  0xb6   : > { %v5407_v28 = vpop.f32.mrf.mxu2 }
  0xb7   : > { %7761 = vst [vmem:[#allocation16_spill] sm:$0xff] %v5407_v28  ;;  %v5409_v46 = vpop.f32.mrf.mxu3  ;;  %v5411_v41 = vpop.f32.mrf.mxu1 }
  0xb8   : > { %7762 = vst [vmem:[#allocation17_spill] sm:$0xff] %v5409_v46 }
  0xba   : > { %v5419_v0 = vpop.f32.mrf.mxu0  ;;  %4414 = vmatmul.msk.f32.gmra.mxu1 %vm249_vm1, %v5373_v27  ;;  %v5439_v27 = vld [vmem:[%s5039_s27 + $0xc0] sm:$0xff] }
  0xbb   : > { %4448 = vmatmul.msk.f32.gmra.mxu2 %vm249_vm1, %v5414_v20  ;;  %7768 = vst [vmem:[#allocation23_spill] sm:$0xff] %v5439_v27 }
  0xbc   : > { %4514 = vmatmul.msk.f32.gmra.mxu3 %vm249_vm1, %v5417_v8 }
  0xbd   : > { %4580 = vmatmul.msk.f32.gmra.mxu0 %vm249_vm1, %v5186_v37 }
  0xbe   : > { %v5429_v33 = vpop.f32.mrf.mxu2 }
  0xbf   : > { %7765 = vst [vmem:[#allocation20_spill] sm:$0xff] %v5429_v33  ;;  %v5431_v46 = vpop.f32.mrf.mxu3  ;;  %v5433_v43 = vpop.f32.mrf.mxu1 }
  0xc0   : > { %7766 = vst [vmem:[#allocation21_spill] sm:$0xff] %v5431_v46 }
  0xc2   : > { %v5441_v26 = vpop.f32.mrf.mxu0  ;;  %4415 = vmatmul.msk.f32.gmra.mxu1 %vm249_vm1, %v5395_v44  ;;  %v5461_v44 = vld [vmem:[%s5039_s27 + $0xc8] sm:$0xff] }
  0xc3   : > { %4449 = vmatmul.msk.f32.gmra.mxu2 %vm249_vm1, %v5436_v13 }
  0xc4   : > { %4515 = vmatmul.msk.f32.gmra.mxu3 %vm249_vm1, %v5439_v27 }
  0xc5   : > { %4581 = vmatmul.msk.f32.gmra.mxu0 %vm249_vm1, %v5045_v6 }
  0xc6   : > { %v5451_v37 = vpop.f32.mrf.mxu2 }
  0xc7   : > { %7769 = vst [vmem:[#allocation24_spill] sm:$0xff] %v5451_v37  ;;  %v5453_v46 = vpop.f32.mrf.mxu3  ;;  %v5455_v20 = vpop.f32.mrf.mxu1  ;;  %v5478_v37 = vld [vmem:[%s5039_s27 + $0xc2] sm:$0xff] }
  0xc8   : > { %7770 = vst [vmem:[#allocation25_spill] sm:$0xff] %v5453_v46 }
  0xc9   : > { %7774 = vst [vmem:[#allocation29_spill] sm:$0xff] %v5478_v37 }
  0xca   : > { %v5463_v12 = vpop.f32.mrf.mxu0  ;;  %4416 = vmatmul.msk.f32.gmra.mxu1 %vm249_vm1, %v5417_v8 }
  0xcb   : > { %4450 = vmatmul.msk.f32.gmra.mxu2 %vm249_vm1, %v5458_v3 }
  0xcc   : > { %4516 = vmatmul.msk.f32.gmra.mxu3 %vm249_vm1, %v5461_v44 }
  0xcd   : > { %4582 = vmatmul.msk.f32.gmra.mxu0 %vm249_vm1, %v5062_v10 }
  0xce   : > { %v5473_v6 = vpop.f32.mrf.mxu2 }
  0xcf   : > { %7772 = vst [vmem:[#allocation27_spill] sm:$0xff] %v5473_v6  ;;  %v5475_v46 = vpop.f32.mrf.mxu3  ;;  %v579_v13 = vpop.f32.mrf.mxu1 }
  0xd0   : > { %7773 = vst [vmem:[#allocation28_spill] sm:$0xff] %v5475_v46  ;;  %v580_v10 = vadd.f32 %v579_v13, %v5309_v62 }
  0xd2   : > { %v1382_v8 = vpop.f32.mrf.mxu0  ;;  %4417 = vmatmul.msk.f32.gmra.mxu1 %vm249_vm1, %v5439_v27 }
  0xd3   : > { %4451 = vmatmul.msk.f32.gmra.mxu2 %vm249_vm1, %v5478_v37 }
  0xd4   : > { %4517 = vmatmul.msk.f32.gmra.mxu3 %vm249_vm1, %v5481_v61 }
  0xd5   : > { %4583 = vmatmul.msk.f32.gmra.mxu0 %vm249_vm1, %v5079_v14 }
  0xd6   : > { %v825_v46 = vpop.f32.mrf.mxu2 }
  0xd7   : > { %v921_v3 = vadd.f32 %v825_v46, %v580_v10  ;;  %v1104_v6 = vpop.f32.mrf.mxu3  ;;  %v582_v33 = vpop.f32.mrf.mxu1 }
  0xd8   : > { %v583_v14 = vadd.f32 %v582_v33, %v5331_v4 }
  0xd9   : > { %v1200_v27 = vadd.f32 %v1104_v6, %v921_v3  ;;  %v5513_v6 = vld [vmem:[%s5039_s27 + $0xf0] sm:$0xff] }
  0xda   : > { %v1385_v37 = vpop.f32.mrf.mxu0  ;;  %4418 = vmatmul.msk.f32.gmra.mxu1 %vm249_vm1, %v5461_v44 }
  0xdb   : > { %v5498_v28 = vadd.f32 %v1382_v8, %v1200_v27  ;;  %4452 = vmatmul.msk.f32.gmra.mxu2 %vm249_vm1, %v5493_v2  ;;  %v5510_v27 = vld [vmem:[%s5039_s27 + $0xda] sm:$0xff] }
  0xdc   : > { %4518 = vmatmul.msk.f32.gmra.mxu3 %vm249_vm1, %v5496_v58 }
  0xdd   : > { %7775 = vst [vmem:[#allocation30_spill] sm:$0xff] %v5498_v28  ;;  %4584 = vmatmul.msk.f32.gmra.mxu0 %vm249_vm1, %v5096_v18 }
  0xde   : > { %v828_v62 = vpop.f32.mrf.mxu2 }
  0xdf   : > { %v922_v3 = vadd.f32 %v828_v62, %v583_v14  ;;  %v1107_v13 = vpop.f32.mrf.mxu3  ;;  %v585_v8 = vpop.f32.mrf.mxu1  ;;  %v5527_v62 = vld [vmem:[%s5039_s27 + $0xe2] sm:$0xff] }
  0xe0   : > { %v586_v18 = vadd.f32 %v585_v8, %v5353_v16 }
  0xe1   : > { %v1201_v46 = vadd.f32 %v1107_v13, %v922_v3  ;;  %v5530_v13 = vld [vmem:[%s5039_s27 + $0xf8] sm:$0xff] }
  0xe2   : > { %v1388_v10 = vpop.f32.mrf.mxu0  ;;  %4419 = vmatmul.msk.f32.gmra.mxu1 %vm249_vm1, %v5481_v61 }
  0xe3   : > { %v5515_v28 = vadd.f32 %v1385_v37, %v1201_v46  ;;  %4453 = vmatmul.msk.f32.gmra.mxu2 %vm249_vm1, %v5510_v27 }
  0xe4   : > { %4519 = vmatmul.msk.f32.gmra.mxu3 %vm249_vm1, %v5513_v6 }
  0xe5   : > { %7776 = vst [vmem:[#allocation31_spill] sm:$0xff] %v5515_v28  ;;  %4585 = vmatmul.msk.f32.gmra.mxu0 %vm249_vm1, %v5113_v22 }
  0xe6   : > { %v831_v4 = vpop.f32.mrf.mxu2 }
  0xe7   : > { %v923_v33 = vadd.f32 %v831_v4, %v586_v18  ;;  %v1110_v14 = vpop.f32.mrf.mxu3  ;;  %v588_v37 = vpop.f32.mrf.mxu1  ;;  %v5544_v4 = vld [vmem:[%s5039_s27 + $0xf2] sm:$0xff] }
  0xe8   : > { %v589_v22 = vadd.f32 %v588_v37, %v5375_v32 }
  0xe9   : > { %v1202_v3 = vadd.f32 %v1110_v14, %v923_v33  ;;  %v5547_v14 = vld [vmem:[%s5039_s27 + $0x108] sm:$0xff] }
  0xea   : > { %v1391_v46 = vpop.f32.mrf.mxu0  ;;  %4420 = vmatmul.msk.f32.gmra.mxu1 %vm249_vm1, %v5496_v58 }
  0xeb   : > { %v5532_v28 = vadd.f32 %v1388_v10, %v1202_v3  ;;  %4454 = vmatmul.msk.f32.gmra.mxu2 %vm249_vm1, %v5527_v62 }
  0xec   : > { %4520 = vmatmul.msk.f32.gmra.mxu3 %vm249_vm1, %v5530_v13 }
  0xed   : > { %7777 = vst [vmem:[#allocation32_spill] sm:$0xff] %v5532_v28  ;;  %4586 = vmatmul.msk.f32.gmra.mxu0 %vm249_vm1, %v5145_v29 }
  0xee   : > { %v834_v16 = vpop.f32.mrf.mxu2 }
  0xef   : > { %v924_v8 = vadd.f32 %v834_v16, %v589_v22  ;;  %v1113_v18 = vpop.f32.mrf.mxu3  ;;  %v591_v10 = vpop.f32.mrf.mxu1  ;;  %v5561_v16 = vld [vmem:[%s5039_s27 + $0xfa] sm:$0xff] }
  0xf0   : > { %v592_v29 = vadd.f32 %v591_v10, %v5397_v45 }
  0xf1   : > { %v1203_v33 = vadd.f32 %v1113_v18, %v924_v8  ;;  %v4488_v18 = vld [vmem:[%s5039_s27 + $0x110] sm:$0xff] }
  0xf2   : > { %v1394_v3 = vpop.f32.mrf.mxu0  ;;  %4421 = vmatmul.msk.f32.gmra.mxu1 %vm249_vm1, %v5513_v6 }
  0xf3   : > { %v5549_v28 = vadd.f32 %v1391_v46, %v1203_v33  ;;  %4455 = vmatmul.msk.f32.gmra.mxu2 %vm249_vm1, %v5544_v4 }
  0xf4   : > { %4521 = vmatmul.msk.f32.gmra.mxu3 %vm249_vm1, %v5547_v14 }
  0xf5   : > { %7778 = vst [vmem:[#allocation33_spill] sm:$0xff] %v5549_v28  ;;  %4587 = vmatmul.msk.f32.gmra.mxu0 %vm249_vm1, %v5169_v34 }
  0xf6   : > { %v837_v32 = vpop.f32.mrf.mxu2 }
  0xf7   : > { %v925_v37 = vadd.f32 %v837_v32, %v592_v29  ;;  %v1116_v22 = vpop.f32.mrf.mxu3  ;;  %v594_v46 = vpop.f32.mrf.mxu1 }
  0xf8   : > { %v595_v34 = vadd.f32 %v594_v46, %v5419_v0 }
  0xf9   : > { %v1204_v8 = vadd.f32 %v1116_v22, %v925_v37  ;;  %v4489_v22 = vld [vmem:[%s5039_s27 + $0x120] sm:$0xff] }
  0xfa   : > { %v1397_v33 = vpop.f32.mrf.mxu0  ;;  %4422 = vmatmul.msk.f32.gmra.mxu1 %vm249_vm1, %v5530_v13 }
  0xfb   : > { %v5564_v28 = vadd.f32 %v1394_v3, %v1204_v8  ;;  %4456 = vmatmul.msk.f32.gmra.mxu2 %vm249_vm1, %v5561_v16  ;;  %v697_v3 = vld [vmem:[%s5039_s27 + $0x10a] sm:$0xff] }
  0xfc   : > { %4522 = vmatmul.msk.f32.gmra.mxu3 %vm249_vm1, %v4488_v18 }
  0xfd   : > { %7779 = vst [vmem:[#allocation34_spill] sm:$0xff] %v5564_v28  ;;  %4588 = vmatmul.msk.f32.gmra.mxu0 %vm249_vm1, %v5189_v38 }
  0xfe   : > { %v840_v45 = vpop.f32.mrf.mxu2 }
  0xff   : > { %v926_v10 = vadd.f32 %v840_v45, %v595_v34  ;;  %v1119_v29 = vpop.f32.mrf.mxu3  ;;  %v597_v32 = vpop.f32.mrf.mxu1 }
 0x100   : > { %v598_v38 = vadd.f32 %v597_v32, %v5441_v26 }
 0x101   : > { %v1205_v37 = vadd.f32 %v1119_v29, %v926_v10  ;;  %v698_v10 = vld [vmem:[%s5039_s27 + $0x112] sm:$0xff]  ;;  %v4490_v29 = vld [vmem:[%s5039_s27 + $0x128] sm:$0xff] }
 0x102   : > { %v1400_v8 = vpop.f32.mrf.mxu0  ;;  %4423 = vmatmul.msk.f32.gmra.mxu1 %vm249_vm1, %v5547_v14 }
 0x103   : > { %v5576_v28 = vadd.f32 %v1397_v33, %v1205_v37  ;;  %4457 = vmatmul.msk.f32.gmra.mxu2 %vm249_vm1, %v697_v3 }
 0x104   : > { %4523 = vmatmul.msk.f32.gmra.mxu3 %vm249_vm1, %v4489_v22 }
 0x105   : > { %7780 = vst [vmem:[#allocation35_spill] sm:$0xff] %v5576_v28  ;;  %4589 = vmatmul.msk.f32.gmra.mxu0 %vm249_vm1, %v5048_v7 }
 0x106   : > { %v843_v0 = vpop.f32.mrf.mxu2 }
 0x107   : > { %v927_v46 = vadd.f32 %v843_v0, %v598_v38  ;;  %v1122_v34 = vpop.f32.mrf.mxu3  ;;  %v600_v45 = vpop.f32.mrf.mxu1  ;;  %v699_v0 = vld [vmem:[%s5039_s27 + $0x122] sm:$0xff] }
 0x108   : > { %v601_v7 = vadd.f32 %v600_v45, %v5463_v12 }
 0x109   : > { %v1206_v33 = vadd.f32 %v1122_v34, %v927_v46  ;;  %v4491_v46 = vld [vmem:[%s5039_s27 + $0x138] sm:$0xff] }
 0x10a   : > { %v1403_v37 = vpop.f32.mrf.mxu0  ;;  %4424 = vmatmul.msk.f32.gmra.mxu1 %vm249_vm1, %v4488_v18 }
 0x10b   : > { %v5587_v28 = vadd.f32 %v1400_v8, %v1206_v33  ;;  %4458 = vmatmul.msk.f32.gmra.mxu2 %vm249_vm1, %v698_v10 }
 0x10c   : > { %4524 = vmatmul.msk.f32.gmra.mxu3 %vm249_vm1, %v4490_v29 }
 0x10d   : > { %4590 = vmatmul.msk.f32.gmra.mxu0 %vm249_vm1, %v5065_v11 }
 0x10e   : > { %v846_v26 = vpop.f32.mrf.mxu2 }
 0x10f   : > { %v928_v32 = vadd.f32 %v846_v26, %v601_v7  ;;  %v1125_v3 = vpop.f32.mrf.mxu3  ;;  %v603_v38 = vpop.f32.mrf.mxu1  ;;  %v700_v7 = vld [vmem:[%s5039_s27 + $0x12a] sm:$0xff]  ;;  %v4492_v26 = vld [vmem:[%s5039_s27 + $0x140] sm:$0xff] }
 0x110   : > { %v604_v11 = vadd.f32 %v603_v38, %v5301_v59 }
 0x111   : > { %v1207_v8 = vadd.f32 %v1125_v3, %v928_v32 }
 0x112   : > { %v1406_v34 = vpop.f32.mrf.mxu0  ;;  %4425 = vmatmul.msk.f32.gmra.mxu1 %vm249_vm1, %v4489_v22 }
 0x113   : > { %v5597_v18 = vadd.f32 %v1403_v37, %v1207_v8  ;;  %4459 = vmatmul.msk.f32.gmra.mxu2 %vm249_vm1, %v699_v0  ;;  %v701_v8 = vld [vmem:[%s5039_s27 + $0x13a] sm:$0xff] }
 0x114   : > { %4525 = vmatmul.msk.f32.gmra.mxu3 %vm249_vm1, %v4491_v46 }
 0x115   : > { %4591 = vmatmul.msk.f32.gmra.mxu0 %vm249_vm1, %v5082_v15 }
 0x116   : > { %v849_v12 = vpop.f32.mrf.mxu2 }
 0x117   : > { %v929_v45 = vadd.f32 %v849_v12, %v604_v11  ;;  %v1128_v10 = vpop.f32.mrf.mxu3  ;;  %v606_v33 = vpop.f32.mrf.mxu1  ;;  %v4493_v11 = vld [vmem:[%s5039_s27 + $0x150] sm:$0xff] }
 0x118   : > { %v607_v15 = vadd.f32 %v606_v33, %v5323_v1 }
 0x119   : > { %v1208_v37 = vadd.f32 %v1128_v10, %v929_v45 }
 0x11a   : > { %v1409_v32 = vpop.f32.mrf.mxu0  ;;  %4426 = vmatmul.msk.f32.gmra.mxu1 %vm249_vm1, %v4490_v29 }
 0x11b   : > { %v5607_v22 = vadd.f32 %v1406_v34, %v1208_v37  ;;  %4460 = vmatmul.msk.f32.gmra.mxu2 %vm249_vm1, %v700_v7  ;;  %v702_v7 = vld [vmem:[%s5039_s27 + $0x142] sm:$0xff] }
 0x11c   : > { %4526 = vmatmul.msk.f32.gmra.mxu3 %vm249_vm1, %v4492_v26 }
 0x11d   : > { %4592 = vmatmul.msk.f32.gmra.mxu0 %vm249_vm1, %v5099_v19 }
 0x11e   : > { %v852_v59 = vpop.f32.mrf.mxu2 }
 0x11f   : > { %v930_v3 = vadd.f32 %v852_v59, %v607_v15  ;;  %v1131_v38 = vpop.f32.mrf.mxu3  ;;  %v609_v0 = vpop.f32.mrf.mxu1 }
 0x120   : > { %v610_v19 = vadd.f32 %v609_v0, %v5345_v9  ;;  %v703_v0 = vld [vmem:[%s5039_s27 + $0x152] sm:$0xff] }
 0x121   : > { %v1209_v34 = vadd.f32 %v1131_v38, %v930_v3 }
 0x122   : > { %v1412_v12 = vpop.f32.mrf.mxu0  ;;  %4427 = vmatmul.msk.f32.gmra.mxu1 %vm249_vm1, %v4491_v46 }
 0x123   : > { %v5617_v29 = vadd.f32 %v1409_v32, %v1209_v34  ;;  %4461 = vmatmul.msk.f32.gmra.mxu2 %vm249_vm1, %v701_v8  ;;  %v4494_v32 = vld [vmem:[%s5039_s27 + $0x158] sm:$0xff]  ;;  %v4495_v34 = vld [vmem:[%s5039_s27 + $0x168] sm:$0xff] }
 0x124   : > { %4527 = vmatmul.msk.f32.gmra.mxu3 %vm249_vm1, %v4493_v11 }
 0x125   : > { %4593 = vmatmul.msk.f32.gmra.mxu0 %vm249_vm1, %v5116_v23 }
 0x126   : > { %v855_v1 = vpop.f32.mrf.mxu2 }
 0x127   : > { %v931_v45 = vadd.f32 %v855_v1, %v610_v19  ;;  %v1134_v10 = vpop.f32.mrf.mxu3  ;;  %v612_v33 = vpop.f32.mrf.mxu1 }
 0x128   : > { %v613_v23 = vadd.f32 %v612_v33, %v5367_v25 }
 0x129   : > { %v1210_v37 = vadd.f32 %v1134_v10, %v931_v45  ;;  %v704_v10 = vld [vmem:[%s5039_s27 + $0x15a] sm:$0xff] }
 0x12a   : > { %v1415_v15 = vpop.f32.mrf.mxu0  ;;  %4428 = vmatmul.msk.f32.gmra.mxu1 %vm249_vm1, %v4492_v26 }
 0x12b   : > { %v5627_v46 = vadd.f32 %v1412_v12, %v1210_v37  ;;  %4462 = vmatmul.msk.f32.gmra.mxu2 %vm249_vm1, %v702_v7  ;;  %v4496_v7 = vld [vmem:[%s5039_s27 + $0x170] sm:$0xff] }
 0x12c   : > { %4528 = vmatmul.msk.f32.gmra.mxu3 %vm249_vm1, %v4494_v32 }
 0x12d   : > { %4594 = vmatmul.msk.f32.gmra.mxu0 %vm249_vm1, %v5148_v30 }
 0x12e   : > { %v858_v9 = vpop.f32.mrf.mxu2 }
 0x12f   : > { %v932_v59 = vadd.f32 %v858_v9, %v613_v23  ;;  %v1137_v3 = vpop.f32.mrf.mxu3  ;;  %v615_v38 = vpop.f32.mrf.mxu1 }
 0x130   : > { %v616_v30 = vadd.f32 %v615_v38, %v5389_v42  ;;  %v4497_v38 = vld [vmem:[%s5039_s27 + $0x180] sm:$0xff] }
 0x131   : > { %v1211_v8 = vadd.f32 %v1137_v3, %v932_v59  ;;  %v705_v59 = vld [vmem:[%s5039_s27 + $0x16a] sm:$0xff] }
 0x132   : > { %v1418_v12 = vpop.f32.mrf.mxu0  ;;  %4429 = vmatmul.msk.f32.gmra.mxu1 %vm249_vm1, %v4493_v11 }
 0x133   : > { %v5637_v26 = vadd.f32 %v1415_v15, %v1211_v8  ;;  %4463 = vmatmul.msk.f32.gmra.mxu2 %vm249_vm1, %v703_v0 }
 0x134   : > { %4529 = vmatmul.msk.f32.gmra.mxu3 %vm249_vm1, %v4495_v34 }
 0x135   : > { %4595 = vmatmul.msk.f32.gmra.mxu0 %vm249_vm1, %v5172_v35 }
 0x136   : > { %v861_v25 = vpop.f32.mrf.mxu2 }
 0x137   : > { %v933_v19 = vadd.f32 %v861_v25, %v616_v30  ;;  %v1140_v1 = vpop.f32.mrf.mxu3  ;;  %v618_v45 = vpop.f32.mrf.mxu1 }
 0x138   : > { %v619_v35 = vadd.f32 %v618_v45, %v5411_v41  ;;  %v4498_v45 = vld [vmem:[%s5039_s27 + $0x188] sm:$0xff] }
 0x139   : > { %v1212_v33 = vadd.f32 %v1140_v1, %v933_v19  ;;  %v706_v19 = vld [vmem:[%s5039_s27 + $0x172] sm:$0xff] }
 0x13a   : > { %v1421_v11 = vpop.f32.mrf.mxu0  ;;  %4430 = vmatmul.msk.f32.gmra.mxu1 %vm249_vm1, %v4494_v32  ;;  %v4563_v32 = vld [vmem:[%s5039_s27 + $0x181] sm:$0xff] }
 0x13b   : > { %v5647_v37 = vadd.f32 %v1418_v12, %v1212_v33  ;;  %4464 = vmatmul.msk.f32.gmra.mxu2 %vm249_vm1, %v704_v10  ;;  %v4564_v33 = vld [vmem:[%s5039_s27 + $0x189] sm:$0xff] }
 0x13c   : > { %4530 = vmatmul.msk.f32.gmra.mxu3 %vm249_vm1, %v4496_v7 }
 0x13d   : > { %4596 = vmatmul.msk.f32.gmra.mxu0 %vm249_vm1, %v5192_v39 }
 0x13e   : > { %v864_v42 = vpop.f32.mrf.mxu2 }
 0x13f   : > { %v934_v15 = vadd.f32 %v864_v42, %v619_v35  ;;  %v1143_v23 = vpop.f32.mrf.mxu3  ;;  %v621_v9 = vpop.f32.mrf.mxu1 }
 0x140   : > { %v622_v39 = vadd.f32 %v621_v9, %v5433_v43 }
 0x141   : > { %v1213_v3 = vadd.f32 %v1143_v23, %v934_v15 }
 0x142   : > { %v1424_v0 = vpop.f32.mrf.mxu0  ;;  %4431 = vmatmul.msk.f32.gmra.mxu1 %vm249_vm1, %v4495_v34 }
 0x143   : > { %v5658_v8 = vadd.f32 %v1421_v11, %v1213_v3  ;;  %4465 = vmatmul.msk.f32.gmra.mxu2 %vm249_vm1, %v705_v59 }
 0x144   : > { %4531 = vmatmul.msk.f32.gmra.mxu3 %vm249_vm1, %v4497_v38 }
 0x145   : > { %4597 = vmatmul.msk.f32.gmra.mxu0 %vm249_vm1, %v4563_v32 }
 0x146   : > { %v867_v41 = vpop.f32.mrf.mxu2 }
 0x147   : > { %v935_v12 = vadd.f32 %v867_v41, %v622_v39  ;;  %v1146_v30 = vpop.f32.mrf.mxu3  ;;  %v624_v25 = vpop.f32.mrf.mxu1 }
 0x148   : > { %v625_v43 = vadd.f32 %v624_v25, %v5455_v20 }
 0x149   : > { %v1214_v1 = vadd.f32 %v1146_v30, %v935_v12 }
 0x14a   : > { %v1427_v10 = vpop.f32.mrf.mxu0  ;;  %4432 = vmatmul.msk.f32.gmra.mxu1 %vm249_vm1, %v4496_v7 }
 0x14b   : > { %v5668_v11 = vadd.f32 %v1424_v0, %v1214_v1  ;;  %4466 = vmatmul.msk.f32.gmra.mxu2 %vm249_vm1, %v706_v19 }
 0x14c   : > { %4532 = vmatmul.msk.f32.gmra.mxu3 %vm249_vm1, %v4498_v45 }
 0x14d   : > { %4598 = vmatmul.msk.f32.gmra.mxu0 %vm249_vm1, %v4564_v33 }
 0x14e   : > { %v870_v34 = vpop.f32.mrf.mxu2 }
 0x14f   : > { %v936_v35 = vadd.f32 %v870_v34, %v625_v43  ;;  %v1149_v42 = vpop.f32.mrf.mxu3  ;;  %v627_v15 = vpop.f32.mrf.mxu1 }
 0x150   : > { %v628_v20 = vadd.f32 %v627_v15, %v5319_v63 }
 0x151   : > { %v1215_v23 = vadd.f32 %v1149_v42, %v936_v35  ;;  %v4735_v35 = vld [vmem:[%s5039_s27 + $0x61] sm:$0xff] }
 0x152   : > { %v1430_v9 = vpop.f32.mrf.mxu0  ;;  %4633 = vmatmul.msk.f32.vlgmr.msra.gmra.mxu1 %vm249_vm1, %v5220_v47 }
 0x153   : > { %v5675_v59 = vadd.f32 %v1427_v10, %v1215_v23  ;;  %4699 = vmatmul.msk.f32.vlgmr.msra.gmra.mxu2 %vm249_vm1, %v5223_v48 }
 0x154   : > { %4765 = vmatmul.msk.f32.vlgmr.msra.gmra.mxu3 %vm249_vm1, %v5119_v24 }
 0x155   : > { %4831 = vmatmul.msk.f32.vlgmr.msra.gmra.mxu0 %vm249_vm1, %v5246_v51 }
 0x156   : > { %v873_v7 = vpop.f32.mrf.mxu2 }
 0x157   : > { %v937_v3 = vadd.f32 %v873_v7, %v628_v20  ;;  %v1152_v38 = vpop.f32.mrf.mxu3  ;;  %v630_v0 = vpop.f32.mrf.mxu1  ;;  %v4736_v7 = vld [vmem:[%s5039_s27 + $0x69] sm:$0xff] }
 0x158   : > { %v631_v24 = vadd.f32 %v630_v0, %v5341_v5  ;;  %v7784_v0 = vld [vmem:[#allocation20_spill] sm:$0xff] }
 0x159   : > { %v1216_v32 = vadd.f32 %v1152_v38, %v937_v3 }
 0x15a   : > { %v1433_v39 = vpop.f32.mrf.mxu0  ;;  %4634 = vmatmul.msk.f32.gmra.mxu1 %vm249_vm1, %v5233_v49 }
 0x15b   : > { %v5686_v41 = vadd.f32 %v1430_v9, %v1216_v32  ;;  %4700 = vmatmul.msk.f32.gmra.mxu2 %vm249_vm1, %v5236_v50 }
 0x15c   : > { %4766 = vmatmul.msk.f32.gmra.mxu3 %vm249_vm1, %v5151_v31 }
 0x15d   : > { %4832 = vmatmul.msk.f32.gmra.mxu0 %vm249_vm1, %v5260_v53 }
 0x15e   : > { %v876_v47 = vpop.f32.mrf.mxu2 }
 0x15f   : > { %v938_v48 = vadd.f32 %v876_v47, %v631_v24  ;;  %v1155_v63 = vpop.f32.mrf.mxu3  ;;  %v633_v12 = vpop.f32.mrf.mxu1 }
 0x160   : > { %v634_v31 = vadd.f32 %v633_v12, %v5363_v17  ;;  %v4737_v12 = vld [vmem:[%s5039_s27 + $0x79] sm:$0xff] }
 0x161   : > { %v1217_v30 = vadd.f32 %v1155_v63, %v938_v48 }
 0x162   : > { %v1436_v25 = vpop.f32.mrf.mxu0  ;;  %4635 = vmatmul.msk.f32.gmra.mxu1 %vm249_vm1, %v5246_v51 }
 0x163   : > { %v5697_v19 = vadd.f32 %v1433_v39, %v1217_v30  ;;  %4701 = vmatmul.msk.f32.gmra.mxu2 %vm249_vm1, %v5249_v52 }
 0x164   : > { %4767 = vmatmul.msk.f32.gmra.mxu3 %vm249_vm1, %v5175_v36 }
 0x165   : > { %4833 = vmatmul.msk.f32.gmra.mxu0 %vm249_vm1, %v5274_v55 }
 0x166   : > { %v879_v49 = vpop.f32.mrf.mxu2 }
 0x167   : > { %v939_v50 = vadd.f32 %v879_v49, %v634_v31  ;;  %v1158_v5 = vpop.f32.mrf.mxu3  ;;  %v636_v1 = vpop.f32.mrf.mxu1  ;;  %v7786_v31 = vld [vmem:[#allocation8_spill] sm:$0xff] }
 0x168   : > { %v637_v36 = vadd.f32 %v636_v1, %v5385_v21  ;;  %v7787_v49 = vld [vmem:[#allocation24_spill] sm:$0xff] }
 0x169   : > { %v1218_v45 = vadd.f32 %v1158_v5, %v939_v50 }
 0x16a   : > { %v1439_v10 = vpop.f32.mrf.mxu0  ;;  %4636 = vmatmul.msk.f32.gmra.mxu1 %vm249_vm1, %v5260_v53 }
 0x16b   : > { %v5708_v33 = vadd.f32 %v1436_v25, %v1218_v45  ;;  %4702 = vmatmul.msk.f32.gmra.mxu2 %vm249_vm1, %v5263_v54 }
 0x16c   : > { %4768 = vmatmul.msk.f32.gmra.mxu3 %vm249_vm1, %v5195_v40  ;;  %v7781_v40 = vld [vmem:[#allocation16_spill] sm:$0xff] }
 0x16d   : > { %4834 = vmatmul.msk.f32.gmra.mxu0 %vm249_vm1, %v5288_v57 }
 0x16e   : > { %v882_v51 = vpop.f32.mrf.mxu2 }
 0x16f   : > { %v940_v52 = vadd.f32 %v882_v51, %v637_v36  ;;  %v1161_v17 = vpop.f32.mrf.mxu3  ;;  %v639_v43 = vpop.f32.mrf.mxu1  ;;  %v4738_v51 = vld [vmem:[%s5039_s27 + $0x81] sm:$0xff] }
 0x170   : > { %v640_v54 = vadd.f32 %v639_v43, %v7781_v40  ;;  %v7790_v43 = vld [vmem:[#allocation11_spill] sm:$0xff] }
 0x171   : > { %v1219_v34 = vadd.f32 %v1161_v17, %v940_v52 }
 0x172   : > { %v1442_v42 = vpop.f32.mrf.mxu0  ;;  %4637 = vmatmul.msk.f32.gmra.mxu1 %vm249_vm1, %v5274_v55  ;;  %v7782_v55 = vld [vmem:[#allocation2_spill] sm:$0xff] }
 0x173   : > { %v5720_v53 = vadd.f32 %v1439_v10, %v1219_v34  ;;  %4703 = vmatmul.msk.f32.gmra.mxu2 %vm249_vm1, %v5277_v56  ;;  %v7783_v56 = vld [vmem:[#allocation5_spill] sm:$0xff]  ;;  %v7791_v34 = vld [vmem:[#allocation27_spill] sm:$0xff] }
 0x174   : > { %4769 = vmatmul.msk.f32.gmra.mxu3 %vm249_vm1, %v4735_v35 }
 0x175   : > { %4835 = vmatmul.msk.f32.gmra.mxu0 %vm249_vm1, %v5304_v60 }
 0x176   : > { %v885_v21 = vpop.f32.mrf.mxu2 }
 0x177   : > { %v941_v15 = vadd.f32 %v885_v21, %v640_v54  ;;  %v1164_v23 = vpop.f32.mrf.mxu3  ;;  %v642_v9 = vpop.f32.mrf.mxu1 }
 0x178   : > { %v643_v32 = vadd.f32 %v642_v9, %v7784_v0 }
 0x179   : > { %v1220_v20 = vadd.f32 %v1164_v23, %v941_v15  ;;  %v4739_v23 = vld [vmem:[%s5039_s27 + $0x91] sm:$0xff] }
 0x17a   : > { %v1445_v3 = vpop.f32.mrf.mxu0  ;;  %4638 = vmatmul.msk.f32.gmra.mxu1 %vm249_vm1, %v5288_v57  ;;  %v7785_v57 = vld [vmem:[#allocation3_spill] sm:$0xff] }
 0x17b   : > { %v5731_v38 = vadd.f32 %v1442_v42, %v1220_v20  ;;  %4704 = vmatmul.msk.f32.gmra.mxu2 %vm249_vm1, %v7782_v55  ;;  %v7795_v55 = vld [vmem:[#allocation4_spill] sm:$0xff] }
 0x17c   : > { %4770 = vmatmul.msk.f32.gmra.mxu3 %vm249_vm1, %v4736_v7  ;;  %v7793_v7 = vld [vmem:[#allocation9_spill] sm:$0xff] }
 0x17d   : > { %4836 = vmatmul.msk.f32.gmra.mxu0 %vm249_vm1, %v7783_v56 }
 0x17e   : > { %v888_v39 = vpop.f32.mrf.mxu2 }
 0x17f   : > { %v942_v24 = vadd.f32 %v888_v39, %v643_v32  ;;  %v1167_v47 = vpop.f32.mrf.mxu3  ;;  %v645_v48 = vpop.f32.mrf.mxu1 }
 0x180   : > { %v646_v50 = vadd.f32 %v645_v48, %v7787_v49  ;;  %v4740_v48 = vld [vmem:[%s5039_s27 + $0x99] sm:$0xff] }
 0x181   : > { %v1221_v63 = vadd.f32 %v1167_v47, %v942_v24 }
 0x182   : > { %v1448_v30 = vpop.f32.mrf.mxu0  ;;  %4639 = vmatmul.msk.f32.gmra.mxu1 %vm249_vm1, %v5304_v60  ;;  %v7789_v60 = vld [vmem:[#allocation6_spill] sm:$0xff] }
 0x183   : > { %v5742_v25 = vadd.f32 %v1445_v3, %v1221_v63  ;;  %4705 = vmatmul.msk.f32.gmra.mxu2 %vm249_vm1, %v7785_v57  ;;  %v7794_v3 = vld [vmem:[#allocation14_spill] sm:$0xff] }
 0x184   : > { %4771 = vmatmul.msk.f32.gmra.mxu3 %vm249_vm1, %v4737_v12  ;;  %v7798_v57 = vld [vmem:[#allocation18_spill] sm:$0xff] }
 0x185   : > { %4837 = vmatmul.msk.f32.gmra.mxu0 %vm249_vm1, %v7786_v31 }
 0x186   : > { %v891_v5 = vpop.f32.mrf.mxu2 }
 0x187   : > { %v943_v1 = vadd.f32 %v891_v5, %v646_v50  ;;  %v1170_v45 = vpop.f32.mrf.mxu3  ;;  %v648_v10 = vpop.f32.mrf.mxu1 }
 0x188   : > { %v649_v35 = vadd.f32 %v648_v10, %v7791_v34  ;;  %v7803_v34 = vld [vmem:[#allocation10_spill] sm:$0xff] }
 0x189   : > { %v1222_v36 = vadd.f32 %v1170_v45, %v943_v1 }
 0x18a   : > { %v1451_v52 = vpop.f32.mrf.mxu0  ;;  %4640 = vmatmul.msk.f32.gmra.mxu1 %vm249_vm1, %v7783_v56 }
 0x18b   : > { %v5753_v17 = vadd.f32 %v1448_v30, %v1222_v36  ;;  %4706 = vmatmul.msk.f32.gmra.mxu2 %vm249_vm1, %v7789_v60  ;;  %v7797_v30 = vld [vmem:[#allocation12_spill] sm:$0xff]  ;;  %v7801_v60 = vld [vmem:[#allocation15_spill] sm:$0xff] }
 0x18c   : > { %4772 = vmatmul.msk.f32.gmra.mxu3 %vm249_vm1, %v4738_v51  ;;  %v4741_v36 = vld [vmem:[%s5039_s27 + $0xa9] sm:$0xff] }
 0x18d   : > { %7788 = vst [vmem:[#allocation16_spill] sm:$0xff] %v5753_v17  ;;  %4838 = vmatmul.msk.f32.gmra.mxu0 %vm249_vm1, %v7790_v43 }
 0x18e   : > { %v894_v42 = vpop.f32.mrf.mxu2 }
 0x18f   : > { %v944_v40 = vadd.f32 %v894_v42, %v649_v35  ;;  %v1173_v54 = vpop.f32.mrf.mxu3  ;;  %v651_v21 = vpop.f32.mrf.mxu1 }
 0x190   : > { %v652_v56 = vadd.f32 %v651_v21, %v7795_v55  ;;  %v7806_v55 = vld [vmem:[#allocation26_spill] sm:$0xff] }
 0x191   : > { %v1223_v15 = vadd.f32 %v1173_v54, %v944_v40 }
 0x192   : > { %v1454_v9 = vpop.f32.mrf.mxu0  ;;  %4641 = vmatmul.msk.f32.gmra.mxu1 %vm249_vm1, %v7786_v31  ;;  %v7799_v31 = vld [vmem:[#allocation7_spill] sm:$0xff] }
 0x193   : > { %v5764_v20 = vadd.f32 %v1451_v52, %v1223_v15  ;;  %4707 = vmatmul.msk.f32.gmra.mxu2 %vm249_vm1, %v7793_v7 }
 0x194   : > { %4773 = vmatmul.msk.f32.gmra.mxu3 %vm249_vm1, %v4739_v23  ;;  %v4742_v23 = vld [vmem:[%s5039_s27 + $0xb1] sm:$0xff] }
 0x195   : > { %7792 = vst [vmem:[#allocation2_spill] sm:$0xff] %v5764_v20  ;;  %4839 = vmatmul.msk.f32.gmra.mxu0 %vm249_vm1, %v7794_v3 }
 0x196   : > { %v897_v0 = vpop.f32.mrf.mxu2 }
 0x197   : > { %v945_v32 = vadd.f32 %v897_v0, %v652_v56  ;;  %v1176_v39 = vpop.f32.mrf.mxu3  ;;  %v654_v24 = vpop.f32.mrf.mxu1  ;;  %v7807_v56 = vld [vmem:[#allocation13_spill] sm:$0xff] }
 0x198   : > { %v655_v49 = vadd.f32 %v654_v24, %v7799_v31 }
 0x199   : > { %v1224_v47 = vadd.f32 %v1176_v39, %v945_v32 }
 0x19a   : > { %v1457_v63 = vpop.f32.mrf.mxu0  ;;  %4642 = vmatmul.msk.f32.gmra.mxu1 %vm249_vm1, %v7790_v43  ;;  %v7802_v43 = vld [vmem:[#allocation22_spill] sm:$0xff] }
 0x19b   : > { %v5775_v12 = vadd.f32 %v1454_v9, %v1224_v47  ;;  %4708 = vmatmul.msk.f32.gmra.mxu2 %vm249_vm1, %v7797_v30 }
 0x19c   : > { %4774 = vmatmul.msk.f32.gmra.mxu3 %vm249_vm1, %v4740_v48 }
 0x19d   : > { %7796 = vst [vmem:[#allocation5_spill] sm:$0xff] %v5775_v12  ;;  %4840 = vmatmul.msk.f32.gmra.mxu0 %vm249_vm1, %v7798_v57 }
 0x19e   : > { %v900_v50 = vpop.f32.mrf.mxu2 }
 0x19f   : > { %v946_v5 = vadd.f32 %v900_v50, %v655_v49  ;;  %v1179_v1 = vpop.f32.mrf.mxu3  ;;  %v657_v45 = vpop.f32.mrf.mxu1  ;;  %v7810_v49 = vld [vmem:[#allocation29_spill] sm:$0xff] }
 0x1a0   : > { %v658_v35 = vadd.f32 %v657_v45, %v7803_v34  ;;  %v7811_v50 = vld [vmem:[#allocation17_spill] sm:$0xff] }
 0x1a1   : > { %v1225_v10 = vadd.f32 %v1179_v1, %v946_v5 }
 0x1a2   : > { %v1460_v51 = vpop.f32.mrf.mxu0  ;;  %4643 = vmatmul.msk.f32.gmra.mxu1 %vm249_vm1, %v7794_v3  ;;  %v7805_v3 = vld [vmem:[#allocation19_spill] sm:$0xff] }
 0x1a3   : > { %v5786_v52 = vadd.f32 %v1457_v63, %v1225_v10  ;;  %4709 = vmatmul.msk.f32.gmra.mxu2 %vm249_vm1, %v7801_v60  ;;  %v4743_v63 = vld [vmem:[%s5039_s27 + $0xc1] sm:$0xff]  ;;  %v4744_v60 = vld [vmem:[%s5039_s27 + $0xc9] sm:$0xff] }
 0x1a4   : > { %4775 = vmatmul.msk.f32.gmra.mxu3 %vm249_vm1, %v4741_v36 }
 0x1a5   : > { %7800 = vst [vmem:[#allocation20_spill] sm:$0xff] %v5786_v52  ;;  %4841 = vmatmul.msk.f32.gmra.mxu0 %vm249_vm1, %v7802_v43 }
 0x1a6   : > { %v903_v42 = vpop.f32.mrf.mxu2 }
 0x1a7   : > { %v947_v40 = vadd.f32 %v903_v42, %v658_v35  ;;  %v1182_v54 = vpop.f32.mrf.mxu3  ;;  %v660_v21 = vpop.f32.mrf.mxu1 }
 0x1a8   : > { %v661_v0 = vadd.f32 %v660_v21, %v7807_v56 }
 0x1a9   : > { %v1226_v15 = vadd.f32 %v1182_v54, %v947_v40 }
 0x1aa   : > { %v1463_v9 = vpop.f32.mrf.mxu0  ;;  %4644 = vmatmul.msk.f32.gmra.mxu1 %vm249_vm1, %v7798_v57  ;;  %v7809_v57 = vld [vmem:[#allocation23_spill] sm:$0xff] }
 0x1ab   : > { %v5797_v7 = vadd.f32 %v1460_v51, %v1226_v15  ;;  %4710 = vmatmul.msk.f32.gmra.mxu2 %vm249_vm1, %v7805_v3 }
 0x1ac   : > { %4776 = vmatmul.msk.f32.gmra.mxu3 %vm249_vm1, %v4742_v23 }
 0x1ad   : > { %7804 = vst [vmem:[#allocation3_spill] sm:$0xff] %v5797_v7  ;;  %4842 = vmatmul.msk.f32.gmra.mxu0 %vm249_vm1, %v7806_v55 }
 0x1ae   : > { %v906_v32 = vpop.f32.mrf.mxu2 }
 0x1af   : > { %v948_v39 = vadd.f32 %v906_v32, %v661_v0  ;;  %v1185_v24 = vpop.f32.mrf.mxu3  ;;  %v663_v47 = vpop.f32.mrf.mxu1 }
 0x1b0   : > { %v664_v5 = vadd.f32 %v663_v47, %v7811_v50 }
 0x1b1   : > { %v1227_v48 = vadd.f32 %v1185_v24, %v948_v39 }
 0x1b2   : > { %v1466_v30 = vpop.f32.mrf.mxu0  ;;  %4645 = vmatmul.msk.f32.gmra.mxu1 %vm249_vm1, %v7802_v43  ;;  %v7813_v43 = vld [vmem:[#allocation21_spill] sm:$0xff] }
 0x1b3   : > { %v5808_v31 = vadd.f32 %v1463_v9, %v1227_v48  ;;  %4711 = vmatmul.msk.f32.gmra.mxu2 %vm249_vm1, %v7809_v57  ;;  %v4745_v9 = vld [vmem:[%s5039_s27 + $0xd9] sm:$0xff]  ;;  %v4746_v48 = vld [vmem:[%s5039_s27 + $0xe1] sm:$0xff] }
 0x1b4   : > { %4777 = vmatmul.msk.f32.gmra.mxu3 %vm249_vm1, %v4743_v63 }
 0x1b5   : > { %7808 = vst [vmem:[#allocation8_spill] sm:$0xff] %v5808_v31  ;;  %4843 = vmatmul.msk.f32.gmra.mxu0 %vm249_vm1, %v7810_v49 }
 0x1b6   : > { %v909_v1 = vpop.f32.mrf.mxu2 }
 0x1b7   : > { %v949_v45 = vadd.f32 %v909_v1, %v664_v5  ;;  %v1188_v10 = vpop.f32.mrf.mxu3  ;;  %v666_v36 = vpop.f32.mrf.mxu1 }
 0x1b8   : > { %v667_v42 = vadd.f32 %v666_v36, %v7813_v43 }
 0x1b9   : > { %v1228_v51 = vadd.f32 %v1188_v10, %v949_v45  ;;  %v4747_v10 = vld [vmem:[%s5039_s27 + $0xf1] sm:$0xff] }
 0x1ba   : > { %v1469_v34 = vpop.f32.mrf.mxu0  ;;  %4646 = vmatmul.msk.f32.gmra.mxu1 %vm249_vm1, %v7806_v55 }
 0x1bb   : > { %v5819_v35 = vadd.f32 %v1466_v30, %v1228_v51  ;;  %4712 = vmatmul.msk.f32.gmra.mxu2 %vm249_vm1, %v5461_v44  ;;  %v7815_v44 = vld [vmem:[#allocation25_spill] sm:$0xff] }
 0x1bc   : > { %4778 = vmatmul.msk.f32.gmra.mxu3 %vm249_vm1, %v4744_v60 }
 0x1bd   : > { %7812 = vst [vmem:[#allocation24_spill] sm:$0xff] %v5819_v35  ;;  %4844 = vmatmul.msk.f32.gmra.mxu0 %vm249_vm1, %v5493_v2 }
 0x1be   : > { %v912_v40 = vpop.f32.mrf.mxu2 }
 0x1bf   : > { %v950_v54 = vadd.f32 %v912_v40, %v667_v42  ;;  %v1191_v21 = vpop.f32.mrf.mxu3  ;;  %v669_v15 = vpop.f32.mrf.mxu1 }
 0x1c0   : > { %v670_v55 = vadd.f32 %v669_v15, %v7815_v44 }
 0x1c1   : > { %v1229_v23 = vadd.f32 %v1191_v21, %v950_v54  ;;  %v4748_v54 = vld [vmem:[%s5039_s27 + $0xf9] sm:$0xff] }
 0x1c2   : > { %v1472_v3 = vpop.f32.mrf.mxu0  ;;  %4647 = vmatmul.msk.f32.gmra.mxu1 %vm249_vm1, %v7810_v49 }
 0x1c3   : > { %v5830_v56 = vadd.f32 %v1469_v34, %v1229_v23  ;;  %4713 = vmatmul.msk.f32.gmra.mxu2 %vm249_vm1, %v5481_v61  ;;  %v7817_v61 = vld [vmem:[#allocation28_spill] sm:$0xff] }
 0x1c4   : > { %4779 = vmatmul.msk.f32.gmra.mxu3 %vm249_vm1, %v4745_v9 }
 0x1c5   : > { %7814 = vst [vmem:[#allocation6_spill] sm:$0xff] %v5830_v56  ;;  %4845 = vmatmul.msk.f32.gmra.mxu0 %vm249_vm1, %v5510_v27 }
 0x1c6   : > { %v915_v0 = vpop.f32.mrf.mxu2 }
 0x1c7   : > { %v951_v32 = vadd.f32 %v915_v0, %v670_v55  ;;  %v1194_v39 = vpop.f32.mrf.mxu3  ;;  %v672_v24 = vpop.f32.mrf.mxu1 }
 0x1c8   : > { %v673_v57 = vadd.f32 %v672_v24, %v7817_v61  ;;  %v4815_v24 = vld [vmem:[%s5039_s27 + $0x10a] sm:$0xff] }
 0x1c9   : > { %v1230_v47 = vadd.f32 %v1194_v39, %v951_v32  ;;  %v4749_v32 = vld [vmem:[%s5039_s27 + $0x109] sm:$0xff] }
 0x1ca   : > { %v1475_v63 = vpop.f32.mrf.mxu0  ;;  %4648 = vmatmul.msk.f32.gmra.mxu1 %vm249_vm1, %v5493_v2  ;;  %v7821_v61 = vld [vmem:[#allocation32_spill] sm:$0xff] }
 0x1cb   : > { %v5841_v30 = vadd.f32 %v1472_v3, %v1230_v47  ;;  %4714 = vmatmul.msk.f32.gmra.mxu2 %vm249_vm1, %v5496_v58  ;;  %v7819_v58 = vld [vmem:[#allocation30_spill] sm:$0xff] }
 0x1cc   : > { %4780 = vmatmul.msk.f32.gmra.mxu3 %vm249_vm1, %v4746_v48 }
 0x1cd   : > { %7816 = vst [vmem:[#allocation11_spill] sm:$0xff] %v5841_v30  ;;  %4846 = vmatmul.msk.f32.gmra.mxu0 %vm249_vm1, %v5527_v62 }
 0x1ce   : > { %v918_v49 = vpop.f32.mrf.mxu2 }
 0x1cf   : > { %v952_v50 = vadd.f32 %v918_v49, %v673_v57  ;;  %v1197_v5 = vpop.f32.mrf.mxu3  ;;  %v1660_v1 = vpop.f32.mrf.mxu1 }
 0x1d0   : > { %v1756_v2 = vadd.f32 %v1660_v1, %v7819_v58  ;;  %v4684_v58 = vld [vmem:[%s5039_s27 + $0x110] sm:$0xff] }
 0x1d1   : > { %v1231_v45 = vadd.f32 %v1197_v5, %v952_v50 }
 0x1d2   : > { %v2495_v36 = vpop.f32.mrf.mxu0  ;;  %4649 = vmatmul.msk.f32.gmra.mxu1 %vm249_vm1, %v5510_v27  ;;  %v7820_v27 = vld [vmem:[#allocation31_spill] sm:$0xff] }
 0x1d3   : > { %v5852_v51 = vadd.f32 %v1475_v63, %v1231_v45  ;;  %4715 = vmatmul.msk.f32.gmra.mxu2 %vm249_vm1, %v5513_v6 }
 0x1d4   : > { %4781 = vmatmul.msk.f32.gmra.mxu3 %vm249_vm1, %v4747_v10 }
 0x1d5   : > { %7818 = vst [vmem:[#allocation27_spill] sm:$0xff] %v5852_v51  ;;  %4847 = vmatmul.msk.f32.gmra.mxu0 %vm249_vm1, %v5544_v4 }
 0x1d6   : > { %v1939_v60 = vpop.f32.mrf.mxu2 }
 0x1d7   : > { %v2035_v34 = vadd.f32 %v1939_v60, %v1756_v2  ;;  %v2217_v43 = vpop.f32.mrf.mxu3  ;;  %v1663_v42 = vpop.f32.mrf.mxu1 }
 0x1d8   : > { %v1757_v6 = vadd.f32 %v1663_v42, %v7820_v27  ;;  %v4750_v42 = vld [vmem:[%s5039_s27 + $0x111] sm:$0xff] }
 0x1d9   : > { %v2313_v40 = vadd.f32 %v2217_v43, %v2035_v34 }
 0x1da   : > { %v2498_v21 = vpop.f32.mrf.mxu0  ;;  %4650 = vmatmul.msk.f32.gmra.mxu1 %vm249_vm1, %v5527_v62 }
 0x1db   : > { %v5863_v15 = vadd.f32 %v2495_v36, %v2313_v40  ;;  %4716 = vmatmul.msk.f32.gmra.mxu2 %vm249_vm1, %v5530_v13  ;;  %v4618_v36 = vld [vmem:[%s5039_s27 + $0xfa] sm:$0xff] }
 0x1dc   : > { %4782 = vmatmul.msk.f32.gmra.mxu3 %vm249_vm1, %v4748_v54  ;;  %v5906_v54 = vld [vmem:[%s5039_s27 + $0x112] sm:$0xff] }
 0x1dd   : > { %4848 = vmatmul.msk.f32.gmra.mxu0 %vm249_vm1, %v5561_v16  ;;  %v5874_v23 = vmul.f32 0.70710677, %v5863_v15 }
 0x1de   : > { %v1942_v9 = vpop.f32.mrf.mxu2 }
 0x1df   : > { %v2687_v3 = vmul.f32 %v5874_v23, %v5874_v23  ;;  %v2036_v44 = vadd.f32 %v1942_v9, %v1757_v6  ;;  %v2220_v55 = vpop.f32.mrf.mxu3  ;;  %v1666_v62 = vpop.f32.mrf.mxu1 }
 0x1e0   : > { %v1758_v57 = vadd.f32 %v1666_v62, %v7821_v61  ;;  %v7822_v62 = vld [vmem:[#allocation33_spill] sm:$0xff] }
 0x1e1   : > { %v5878_v0 = vmin.f32 %v2687_v3, 16.0  ;;  %v2314_v13 = vadd.f32 %v2220_v55, %v2036_v44 }
 0x1e2   : > { %v2501_v39 = vpop.f32.mrf.mxu0  ;;  %4651 = vmatmul.msk.f32.gmra.mxu1 %vm249_vm1, %v5544_v4 }
 0x1e3   : > { %v2689_v16 = vmul.f32 2.1237322e-06, %v5878_v0  ;;  %v5883_v47 = vadd.f32 %v2498_v21, %v2314_v13  ;;  %4717 = vmatmul.msk.f32.gmra.mxu2 %vm249_vm1, %v5547_v14  ;;  %v2700_v48 = vmul.f32 3.8918573e-05, %v5878_v0 }
 0x1e4   : > { %4783 = vmatmul.msk.f32.gmra.mxu3 %vm249_vm1, %v4749_v32 }
 0x1e5   : > { %4849 = vmatmul.msk.f32.gmra.mxu0 %vm249_vm1, %v4815_v24  ;;  %v2690_v63 = vadd.f32 0.00028619796, %v2689_v16  ;;  %v5894_v49 = vmul.f32 0.70710677, %v5883_v47  ;;  %v2701_v4 = vadd.f32 0.001143296, %v2700_v48 }
 0x1e6   : > { %v1945_v50 = vpop.f32.mrf.mxu2 }
 0x1e7   : > { %v2691_v5 = vmul.f32 %v2690_v63, %v5878_v0  ;;  %v2727_v14 = vmul.f32 %v5894_v49, %v5894_v49  ;;  %v2037_v1 = vadd.f32 %v1945_v50, %v1758_v57  ;;  %v2223_v45 = vpop.f32.mrf.mxu3  ;;  %v1669_v10 = vpop.f32.mrf.mxu1  ;;  %v2702_v2 = vmul.f32 %v2701_v4, %v5878_v0 }
 0x1e8   : > { %v1759_v13 = vadd.f32 %v1669_v10, %v7822_v62  ;;  %v4751_v10 = vld [vmem:[%s5039_s27 + $0x121] sm:$0xff] }
 0x1e9   : > { %v2692_v60 = vadd.f32 0.0036580483, %v2691_v5  ;;  %v5902_v34 = vmin.f32 %v2727_v14, 16.0  ;;  %v2315_v43 = vadd.f32 %v2223_v45, %v2037_v1  ;;  %v2703_v21 = vadd.f32 0.014752088, %v2702_v2  ;;  %v4685_v5 = vld [vmem:[%s5039_s27 + $0x120] sm:$0xff] }
 0x1ea   : > { %v2504_v40 = vpop.f32.mrf.mxu0  ;;  %4652 = vmatmul.msk.f32.gmra.mxu1 %vm249_vm1, %v4618_v36 }
 0x1eb   : > { %v2729_v27 = vmul.f32 2.1237322e-06, %v5902_v34  ;;  %v5909_v6 = vadd.f32 %v2501_v39, %v2315_v43  ;;  %4718 = vmatmul.msk.f32.gmra.mxu2 %vm249_vm1, %v4684_v58  ;;  %v2740_v9 = vmul.f32 3.8918573e-05, %v5902_v34  ;;  %v2704_v3 = vmul.f32 %v2703_v21, %v5878_v0  ;;  %v5930_v58 = vld [vmem:[%s5039_s27 + $0x122] sm:$0xff] }
 0x1ec   : > { %4784 = vmatmul.msk.f32.gmra.mxu3 %vm249_vm1, %v4750_v42  ;;  %v2693_v44 = vmul.f32 %v2692_v60, %v5878_v0 }
 0x1ed   : > { %4850 = vmatmul.msk.f32.gmra.mxu0 %vm249_vm1, %v5906_v54  ;;  %v2730_v55 = vadd.f32 0.00028619796, %v2729_v27  ;;  %v5921_v32 = vmul.f32 0.70710677, %v5909_v6  ;;  %v2705_v16 = vadd.f32 0.112945676, %v2704_v3 }
 0x1ee   : > { %v1948_v39 = vpop.f32.mrf.mxu2  ;;  %v2741_v61 = vadd.f32 0.001143296, %v2740_v9  ;;  %v2694_v1 = vadd.f32 0.05243302, %v2693_v44 }
 0x1ef   : > { %v2038_v48 = vadd.f32 %v1948_v39, %v1759_v13  ;;  %v2226_v63 = vpop.f32.mrf.mxu3  ;;  %v2731_v57 = vmul.f32 %v2730_v55, %v5902_v34  ;;  %v2767_v50 = vmul.f32 %v5921_v32, %v5921_v32  ;;  %v1672_v4 = vpop.f32.mrf.mxu1  ;;  %v2706_v14 = vmul.f32 %v2705_v16, %v5878_v0 }
 0x1f0   : > { %v2742_v43 = vmul.f32 %v2741_v61, %v5902_v34  ;;  %v2695_v44 = vmul.f32 %v2694_v1, %v5878_v0  ;;  %v4752_v1 = vld [vmem:[%s5039_s27 + $0x129] sm:$0xff] }
 0x1f1   : > { %v2316_v45 = vadd.f32 %v2226_v63, %v2038_v48  ;;  %v5932_v2 = vmin.f32 %v2767_v50, 16.0  ;;  %v2707_v60 = vadd.f32 0.4994258, %v2706_v14  ;;  %v2732_v21 = vadd.f32 0.0036580483, %v2731_v57 }
 0x1f2   : > { %v2507_v36 = vpop.f32.mrf.mxu0  ;;  %4653 = vmatmul.msk.f32.gmra.mxu1 %vm249_vm1, %v4815_v24  ;;  %v2743_v3 = vadd.f32 0.014752088, %v2742_v43 }
 0x1f3   : > { %v5935_v42 = vadd.f32 %v2504_v40, %v2316_v45  ;;  %4719 = vmatmul.msk.f32.gmra.mxu2 %vm249_vm1, %v4685_v5  ;;  %v2769_v27 = vmul.f32 2.1237322e-06, %v5932_v2  ;;  %v2708_v9 = vmul.f32 %v2707_v60, %v5878_v0  ;;  %v7823_v40 = vld [vmem:[#allocation34_spill] sm:$0xff]  ;;  %v2780_v61 = vmul.f32 3.8918573e-05, %v5932_v2  ;;  %v4686_v5 = vld [vmem:[%s5039_s27 + $0x128] sm:$0xff] }
 0x1f4   : > { %4785 = vmatmul.msk.f32.gmra.mxu3 %vm249_vm1, %v4751_v10  ;;  %v1760_v55 = vadd.f32 %v1672_v4, %v7823_v40  ;;  %v2744_v16 = vmul.f32 %v2743_v3, %v5902_v34  ;;  %v2733_v57 = vmul.f32 %v2732_v21, %v5902_v34  ;;  %v5961_v10 = vld [vmem:[%s5039_s27 + $0x12a] sm:$0xff]  ;;  %v2696_v60 = vadd.f32 0.18741608, %v2695_v44 }
 0x1f5   : > { %4851 = vmatmul.msk.f32.gmra.mxu0 %vm249_vm1, %v5930_v58  ;;  %v2770_v24 = vadd.f32 0.00028619796, %v2769_v27  ;;  %v5947_v62 = vmul.f32 0.70710677, %v5935_v42  ;;  %v5949_v39 = vadd.f32 1.0, %v2708_v9 }
 0x1f6   : > { %v1951_v13 = vpop.f32.mrf.mxu2  ;;  %v2745_v27 = vadd.f32 0.112945676, %v2744_v16  ;;  %v2781_v21 = vadd.f32 0.001143296, %v2780_v61  ;;  %v2734_v9 = vadd.f32 0.05243302, %v2733_v57 }
 0x1f7   : > { %v2039_v48 = vadd.f32 %v1951_v13, %v1760_v55  ;;  %v2229_v63 = vpop.f32.mrf.mxu3  ;;  %v1675_v50 = vpop.f32.mrf.mxu1  ;;  %4910 = vrcp.f32 %v5949_v39  ;;  %v2771_v4 = vmul.f32 %v2770_v24, %v5932_v2  ;;  %v2807_v43 = vmul.f32 %v5947_v62, %v5947_v62  ;;  %v7824_v13 = vld [vmem:[#allocation35_spill] sm:$0xff] }
 0x1f8   : > { %v2746_v3 = vmul.f32 %v2745_v27, %v5902_v34  ;;  %v2697_v24 = vmul.f32 %v2696_v60, %v5878_v0  ;;  %v1761_v16 = vadd.f32 %v1675_v50, %v7824_v13  ;;  %v4753_v50 = vld [vmem:[%s5039_s27 + $0x139] sm:$0xff]  ;;  %vm2715_vm3 = vweird.f32 %v5949_v39 }
 0x1f9   : > { %v2317_v14 = vadd.f32 %v2229_v63, %v2039_v48  ;;  %v2772_v44 = vadd.f32 0.0036580483, %v2771_v4  ;;  %v2735_v4 = vmul.f32 %v2734_v9, %v5902_v34  ;;  %v2721_v9 = vand.u32 2147483648, %v5949_v39 }
 0x1fa   : > { %v5958_v45 = vpop.f32.mrf.mxu0  ;;  %4654 = vmatmul.msk.f32.gmra.mxu1 %vm249_vm1, %v5906_v54  ;;  %v5975_v54 = vmin.f32 %v2807_v43, 16.0  ;;  %v2747_v63 = vadd.f32 0.4994258, %v2746_v3  ;;  %v5989_v43 = vld [vmem:[%s5039_s27 + $0x13a] sm:$0xff]  ;;  %v2698_v13 = vadd.f32 1.1283791, %v2697_v24 }
 0x1fb   : > { %4720 = vmatmul.msk.f32.gmra.mxu2 %vm249_vm1, %v4686_v5  ;;  %v5972_v40 = vadd.f32 %v2507_v36, %v2317_v14  ;;  %v2782_v5 = vmul.f32 %v2781_v21, %v5932_v2  ;;  %v2773_v0 = vmul.f32 %v2772_v44, %v5932_v2  ;;  %v2736_v30 = vadd.f32 0.18741608, %v2735_v4 }
 0x1fc   : > { %4786 = vmatmul.msk.f32.gmra.mxu3 %vm249_vm1, %v4752_v1  ;;  %v4687_v1 = vld [vmem:[%s5039_s27 + $0x138] sm:$0xff]  ;;  %v2748_v27 = vmul.f32 %v2747_v63, %v5902_v34  ;;  %v2809_v51 = vmul.f32 2.1237322e-06, %v5975_v54 }
 0x1fd   : > { %4852 = vmatmul.msk.f32.gmra.mxu0 %vm249_vm1, %v5961_v10  ;;  %v4911_v55 = vpop.eup %4910  ;;  %v5985_v60 = vmul.f32 0.70710677, %v5972_v40  ;;  %v2783_v63 = vadd.f32 0.014752088, %v2782_v5  ;;  %v2774_v24 = vadd.f32 0.05243302, %v2773_v0  ;;  %v2699_v0 = vmul.f32 %v2698_v13, %v5874_v23 }
 0x1fe   : > { %v1954_v48 = vpop.f32.mrf.mxu2  ;;  %v2711_v57 = vmul.f32 %v4911_v55, %v5949_v39  ;;  %vm2716_vm2 = vweird.f32 %v4911_v55  ;;  %v2810_v5 = vadd.f32 0.00028619796, %v2809_v51  ;;  %v2737_v56 = vmul.f32 %v2736_v30, %v5902_v34 }
 0x1ff   : > { %v2232_v61 = vpop.f32.mrf.mxu3  ;;  %v2040_v36 = vadd.f32 %v1954_v48, %v1761_v16  ;;  %v1678_v14 = vpop.f32.mrf.mxu1  ;;  %v5993_v16 = vadd.f32 1.0, %v2748_v27  ;;  %v2719_v48 = vand.u32 2147483647, %v5949_v39  ;;  %vm2717_vm4 = vmor %vm2715_vm3, %vm2716_vm2  ;;  %v2775_v35 = vmul.f32 %v2774_v24, %v5932_v2 }
 0x200   : > { %v2712_v3 = vsub.f32 1.0, %v2711_v57 }
 0x201   : > { %v2318_v57 = vadd.f32 %v2232_v61, %v2040_v36  ;;  %4912 = vrcp.f32 %v5993_v16  ;;  %v2722_v61 = vor.u32 1.1754944e-38, %v2721_v9  ;;  %v2784_v36 = vmul.f32 %v2783_v63, %v5932_v2  ;;  %v4754_v63 = vld [vmem:[%s5039_s27 + $0x141] sm:$0xff] }
 0x202   : > { %v2513_v21 = vpop.f32.mrf.mxu0  ;;  %4655 = vmatmul.msk.f32.gmra.mxu1 %vm249_vm1, %v5930_v58  ;;  %v2713_v44 = vmul.f32 %v4911_v55, %v2712_v3  ;;  %v2847_v58 = vmul.f32 %v5985_v60, %v5985_v60  ;;  %vm2720_vm5 = vcmp.eq.f32.partialorder %v2719_v48, 8.507059e+37  ;;  %v2811_v48 = vmul.f32 %v2810_v5, %v5975_v54 }
 0x203   : > { %4721 = vmatmul.msk.f32.gmra.mxu2 %vm249_vm1, %v4687_v1  ;;  %v1762_v1 = vadd.f32 %v1678_v14, %v5587_v28  ;;  %v6012_v28 = vadd.f32 %v5958_v45, %v2318_v57  ;;  %v4688_v14 = vld [vmem:[%s5039_s27 + $0x140] sm:$0xff]  ;;  %v2785_v13 = vadd.f32 0.112945676, %v2784_v36  ;;  %v2623_v45 = vmul.f32 0.5, %v5863_v15 }
 0x204   : > { %4787 = vmatmul.msk.f32.gmra.mxu3 %vm249_vm1, %v4753_v50  ;;  %v2714_v27 = vadd.f32 %v4911_v55, %v2713_v44  ;;  %v6016_v9 = vmin.f32 %v2847_v58, 16.0  ;;  %v2738_v57 = vadd.f32 1.1283791, %v2737_v56  ;;  %vm2755_vm7 = vweird.f32 %v5993_v16 }
 0x205   : > { %4853 = vmatmul.msk.f32.gmra.mxu0 %vm249_vm1, %v5989_v43  ;;  %v6031_v24 = vmul.f32 0.70710677, %v6012_v28  ;;  %v2786_v36 = vmul.f32 %v2785_v13, %v5932_v2  ;;  %v6051_v13 = vld [vmem:[%s5039_s27 + $0x152] sm:$0xff] }
 0x206   : > { %v1957_v4 = vpop.f32.mrf.mxu2  ;;  %v2718_v3 = vsel %vm2717_vm4, %v4911_v55, %v2714_v27 }
 0x207   : > { %v2041_v39 = vadd.f32 %v1957_v4, %v1762_v1  ;;  %v2235_v50 = vpop.f32.mrf.mxu3  ;;  %v1681_v51 = vpop.f32.mrf.mxu1  ;;  %v2723_v44 = vsel %vm2720_vm5, %v2722_v61, %v2718_v3  ;;  %v6020_v1 = vld [vmem:[%s5039_s27 + $0x142] sm:$0xff]  ;;  %v2812_v4 = vadd.f32 0.0036580483, %v2811_v48 }
 0x208   : > { %v4913_v55 = vpop.eup %4912  ;;  %v2724_v23 = vmul.f32 %v2723_v44, %v2699_v0  ;;  %v2761_v0 = vand.u32 2147483648, %v5993_v16  ;;  %v4689_v44 = vld [vmem:[%s5039_s27 + $0x150] sm:$0xff] }
 0x209   : > { %v2319_v31 = vadd.f32 %v2235_v50, %v2041_v39  ;;  %v2751_v34 = vmul.f32 %v4913_v55, %v5993_v16  ;;  %vm2756_vm6 = vweird.f32 %v4913_v55 }
 0x20a   : > { %4656 = vmatmul.msk.f32.gmra.mxu1 %vm249_vm1, %v5961_v10  ;;  %v4863_v58 = vclamps-f32 %v2724_v23, 1.0  ;;  %v2516_v27 = vpop.f32.mrf.mxu0  ;;  %v2849_v10 = vmul.f32 2.1237322e-06, %v6016_v9  ;;  %vm2757_vm8 = vmor %vm2755_vm7, %vm2756_vm6 }
 0x20b   : > { %v6023_v30 = vadd.f32 %v2513_v21, %v2319_v31  ;;  %4722 = vmatmul.msk.f32.gmra.mxu2 %vm249_vm1, %v4688_v14  ;;  %v2776_v31 = vadd.f32 0.18741608, %v2775_v35  ;;  %v1763_v21 = vadd.f32 %v1681_v51, %v5597_v18  ;;  %v2752_v5 = vsub.f32 1.0, %v2751_v34  ;;  %v4755_v34 = vld [vmem:[%s5039_s27 + $0x151] sm:$0xff] }
 0x20c   : > { %4788 = vmatmul.msk.f32.gmra.mxu3 %vm249_vm1, %v4754_v63  ;;  %v3967_v61 = vadd.f32 1.0, %v4863_v58  ;;  %v2759_v35 = vand.u32 2147483647, %v5993_v16  ;;  %v2887_v18 = vmul.f32 %v6031_v24, %v6031_v24  ;;  %v2787_v63 = vadd.f32 0.4994258, %v2786_v36 }
 0x20d   : > { %4854 = vmatmul.msk.f32.gmra.mxu0 %vm249_vm1, %v6020_v1  ;;  %v6039_v56 = vmul.f32 0.70710677, %v6023_v30  ;;  %v2753_v3 = vmul.f32 %v4913_v55, %v2752_v5  ;;  %v2850_v48 = vadd.f32 0.00028619796, %v2849_v10  ;;  %v2739_v58 = vmul.f32 %v2738_v57, %v5894_v49 }
 0x20e   : > { %v1960_v15 = vpop.f32.mrf.mxu2  ;;  %v6046_v14 = vmul.f32 %v3967_v61, %v2623_v45  ;;  %v2777_v45 = vmul.f32 %v2776_v31, %v5932_v2  ;;  %v2762_v49 = vor.u32 1.1754944e-38, %v2761_v0  ;;  %v6066_v57 = vmin.f32 %v2887_v18, 16.0 }
 0x20f   : > { %v2042_v39 = vadd.f32 %v1960_v15, %v1763_v21  ;;  %v2238_v50 = vpop.f32.mrf.mxu3  ;;  %v1684_v51 = vpop.f32.mrf.mxu1  ;;  %v2927_v21 = vmul.f32 %v6039_v56, %v6039_v56  ;;  %v2754_v5 = vadd.f32 %v4913_v55, %v2753_v3  ;;  %v2813_v15 = vmul.f32 %v2812_v4, %v5975_v54 }
 0x210   : > { %4205 = vxpose.xlu0.b32.start [1/16] (narrow) %v6046_v14, 8  ;;  %vm2760_vm9 = vcmp.eq.f32.partialorder %v2759_v35, 8.507059e+37  ;;  %v2788_v16 = vmul.f32 %v2787_v63, %v5932_v2  ;;  %v2778_v35 = vadd.f32 1.1283791, %v2777_v45 }
 0x211   : > { %v2320_v23 = vadd.f32 %v2238_v50, %v2042_v39  ;;  %v2758_v10 = vsel %vm2757_vm8, %v4913_v55, %v2754_v5  ;;  %v6074_v4 = vmin.f32 %v2927_v21, 16.0  ;;  %v2814_v2 = vadd.f32 0.05243302, %v2813_v15  ;;  %v4756_v21 = vld [vmem:[%s5039_s27 + $0x159] sm:$0xff] }
 0x212   : > { %4657 = vmatmul.msk.f32.gmra.mxu1 %vm249_vm1, %v5989_v43  ;;  %v1764_v43 = vadd.f32 %v1684_v51, %v5607_v22  ;;  %v2763_v31 = vsel %vm2760_vm9, %v2762_v49, %v2758_v10  ;;  %v2519_v55 = vpop.f32.mrf.mxu0  ;;  %v6079_v3 = vadd.f32 1.0, %v2788_v16  ;;  %v2820_v22 = vmul.f32 3.8918573e-05, %v5975_v54  ;;  %v6090_v5 = vld [vmem:[%s5039_s27 + $0x15a] sm:$0xff] }
 0x213   : > { %v6060_v61 = vadd.f32 %v2516_v27, %v2320_v23  ;;  %4723 = vmatmul.msk.f32.gmra.mxu2 %vm249_vm1, %v4689_v44  ;;  %v2851_v27 = vmul.f32 %v2850_v48, %v6016_v9  ;;  %v2764_v50 = vmul.f32 %v2763_v31, %v2739_v58  ;;  %v2889_v51 = vmul.f32 2.1237322e-06, %v6066_v57  ;;  %v4690_v48 = vld [vmem:[%s5039_s27 + $0x158] sm:$0xff] }
 0x214   : > { %4789 = vmatmul.msk.f32.gmra.mxu3 %vm249_vm1, %v4755_v34  ;;  %4914 = vrcp.f32 %v6079_v3  ;;  %v2624_v23 = vmul.f32 0.5, %v5883_v47  ;;  %v2929_v45 = vmul.f32 2.1237322e-06, %v6074_v4  ;;  %v6096_v16 = vmul.f32 0.5, %v5909_v6 }
 0x215   : > { %4855 = vmatmul.msk.f32.gmra.mxu0 %vm249_vm1, %v6051_v13  ;;  %v6077_v36 = vmul.f32 0.70710677, %v6060_v61  ;;  %v4864_v63 = vclamps-f32 %v2764_v50, 1.0  ;;  %v2852_v34 = vadd.f32 0.0036580483, %v2851_v27  ;;  %v6107_v27 = vmul.f32 %v2814_v2, %v5975_v54 }
 0x216   : > { %v1963_v39 = vpop.f32.mrf.mxu2  ;;  %v2821_v47 = vadd.f32 0.001143296, %v2820_v22  ;;  %v4103_v50 = vmul.f32 %v6046_v14, %v6046_v14  ;;  %vm2795_vm12 = vweird.f32 %v6079_v3 }
 0x217   : > { %v2043_v0 = vadd.f32 %v1963_v39, %v1764_v43  ;;  %v2241_v18 = vpop.f32.mrf.mxu3  ;;  %v2967_v44 = vmul.f32 %v6077_v36, %v6077_v36  ;;  %v1687_v49 = vpop.f32.mrf.mxu1  ;;  %v3968_v10 = vadd.f32 1.0, %v4864_v63  ;;  %v6099_v43 = vmul.f32 %v2778_v35, %v5921_v32 }
 0x218   : > { %v2890_v39 = vadd.f32 0.00028619796, %v2889_v51  ;;  %v2853_v32 = vmul.f32 %v2852_v34, %v6016_v9 }
 0x219   : > { %v2321_v58 = vadd.f32 %v2241_v18, %v2043_v0  ;;  %v6093_v15 = vmin.f32 %v2967_v44, 16.0  ;;  %v4000_v6 = vmul.f32 %v3968_v10, %v2624_v23  ;;  %v2930_v0 = vadd.f32 0.00028619796, %v2929_v45  ;;  %v4691_v10 = vld [vmem:[%s5039_s27 + $0x168] sm:$0xff] }
 0x21a   : > { %4658 = vmatmul.msk.f32.gmra.mxu1 %vm249_vm1, %v6020_v1  ;;  %v4032_v1 = vsel %vm4031_vm10, %v6046_v14, 0.0  ;;  %v4915_v2 = vpop.eup %4914  ;;  %v2822_v23 = vmul.f32 %v2821_v47, %v5975_v54  ;;  %v2891_v34 = vmul.f32 %v2890_v39, %v6066_v57  ;;  %v2801_v39 = vand.u32 2147483648, %v6079_v3 }
 0x21b   : > { %v6101_v31 = vadd.f32 %v2519_v55, %v2321_v58  ;;  %4724 = vmatmul.msk.f32.gmra.mxu2 %vm249_vm1, %v4690_v48  ;;  %v1765_v55 = vadd.f32 %v1687_v49, %v5617_v29  ;;  %v2969_v18 = vmul.f32 2.1237322e-06, %v6093_v15  ;;  %v4033_v22 = vsel %vm4031_vm10, %v4000_v6, 0.0  ;;  %4206 = vxpose.xlu0.b32.cont [2/16] (narrow) %v4000_v6, 8  ;;  %v2522_v49 = vpop.f32.mrf.mxu0 }
 0x21c   : > { %4790 = vmatmul.msk.f32.gmra.mxu3 %vm249_vm1, %v4756_v21  ;;  %v4104_v51 = vmul.f32 %v4000_v6, %v4000_v6  ;;  %v6123_v63 = vadd.f32 %v4033_v22, %v4032_v1  ;;  %v4135_v58 = vsel %vm4031_vm10, %v4103_v50, 0.0  ;;  %v2791_v45 = vmul.f32 %v4915_v2, %v6079_v3 }
 0x21d   : > { %4856 = vmatmul.msk.f32.gmra.mxu0 %vm249_vm1, %v6090_v5  ;;  %v6119_v35 = vmul.f32 0.70710677, %v6101_v31  ;;  %v2854_v6 = vadd.f32 0.05243302, %v2853_v32  ;;  %v2970_v47 = vadd.f32 0.00028619796, %v2969_v18  ;;  %vm2796_vm11 = vweird.f32 %v4915_v2 }
 0x21e   : > { %v1966_v44 = vpop.f32.mrf.mxu2  ;;  %v4136_v21 = vsel %vm4031_vm10, %v4104_v51, 0.0  ;;  %v2792_v52 = vsub.f32 1.0, %v2791_v45  ;;  %v2823_v32 = vadd.f32 0.014752088, %v2822_v23  ;;  %v2802_v45 = vor.u32 1.1754944e-38, %v2801_v39  ;;  %vm2797_vm13 = vmor %vm2795_vm12, %vm2796_vm11 }
 0x21f   : > { %v3007_v14 = vmul.f32 %v6119_v35, %v6119_v35  ;;  %v2044_v29 = vadd.f32 %v1966_v44, %v1765_v55  ;;  %v2244_v48 = vpop.f32.mrf.mxu3  ;;  %v6133_v1 = vadd.f32 %v4136_v21, %v4135_v58  ;;  %v4757_v55 = vld [vmem:[%s5039_s27 + $0x169] sm:$0xff]  ;;  %v2931_v44 = vmul.f32 %v2930_v0, %v6074_v4 }
 0x220   : > { %v2799_v0 = vand.u32 2147483647, %v6079_v3  ;;  %v2971_v23 = vmul.f32 %v2970_v47, %v6093_v15 }
 0x221   : > { %v6135_v22 = vmin.f32 %v3007_v14, 16.0  ;;  %v2322_v7 = vadd.f32 %v2244_v48, %v2044_v29  ;;  %v2892_v14 = vadd.f32 0.0036580483, %v2891_v34  ;;  %v2793_v29 = vmul.f32 %v4915_v2, %v2792_v52 }
 0x222   : > { %4659 = vmatmul.msk.f32.gmra.mxu1 %vm249_vm1, %v6051_v13  ;;  %v2932_v58 = vadd.f32 0.0036580483, %v2931_v44  ;;  %vm2800_vm14 = vcmp.eq.f32.partialorder %v2799_v0, 8.507059e+37  ;;  %v2816_v44 = vadd.f32 0.18741608, %v6107_v27 }
 0x223   : > { %v3009_v50 = vmul.f32 2.1237322e-06, %v6135_v22  ;;  %v3020_v51 = vmul.f32 3.8918573e-05, %v6135_v22  ;;  %v6142_v12 = vadd.f32 %v2522_v49, %v2322_v7  ;;  %4725 = vmatmul.msk.f32.gmra.mxu2 %vm249_vm1, %v4691_v10  ;;  %v2824_v7 = vmul.f32 %v2823_v32, %v5975_v54 }
 0x224   : > { %4791 = vmatmul.msk.f32.gmra.mxu3 %vm249_vm1, %v4757_v55  ;;  %v2794_v21 = vadd.f32 %v4915_v2, %v2793_v29  ;;  %v2860_v49 = vmul.f32 3.8918573e-05, %v6016_v9  ;;  %v2893_v10 = vmul.f32 %v2892_v14, %v6066_v57  ;;  %v2855_v32 = vmul.f32 %v2854_v6, %v6016_v9 }
 0x225   : > { %v3010_v18 = vadd.f32 0.00028619796, %v3009_v50  ;;  %v3021_v48 = vadd.f32 0.001143296, %v3020_v51  ;;  %v6152_v13 = vmul.f32 0.70710677, %v6142_v12  ;;  %v1690_v51 = vpop.f32.mrf.mxu1  ;;  %v2933_v29 = vmul.f32 %v2932_v58, %v6074_v4 }
 0x226   : > { %v2825_v34 = vadd.f32 0.112945676, %v2824_v7  ;;  %v2798_v55 = vsel %vm2797_vm13, %v4915_v2, %v2794_v21  ;;  %v2972_v2 = vadd.f32 0.0036580483, %v2971_v23  ;;  %v1969_v0 = vpop.f32.mrf.mxu2  ;;  %v2861_v27 = vadd.f32 0.001143296, %v2860_v49 }
 0x227   : > { %v3022_v52 = vmul.f32 %v3021_v48, %v6135_v22  ;;  %v3047_v3 = vmul.f32 %v6152_v13, %v6152_v13  ;;  %v3011_v39 = vmul.f32 %v3010_v18, %v6135_v22  ;;  %v2803_v47 = vsel %vm2800_vm14, %v2802_v45, %v2798_v55  ;;  %v2247_v17 = vpop.f32.mrf.mxu3 }
 0x228   : > { %v2804_v48 = vmul.f32 %v2803_v47, %v6099_v43  ;;  %v2826_v21 = vmul.f32 %v2825_v34, %v5975_v54  ;;  %v2894_v18 = vadd.f32 0.05243302, %v2893_v10  ;;  %v1766_v45 = vadd.f32 %v1690_v51, %v5627_v46 }
 0x229   : > { %v3023_v50 = vadd.f32 0.014752088, %v3022_v52  ;;  %v6165_v7 = vmin.f32 %v3047_v3, 16.0  ;;  %v3012_v52 = vadd.f32 0.0036580483, %v3011_v39  ;;  %v2973_v34 = vmul.f32 %v2972_v2, %v6093_v15 }
 0x22a   : > { %4660 = vmatmul.msk.f32.gmra.mxu1 %vm249_vm1, %v6090_v5  ;;  %v4865_v6 = vclamps-f32 %v2804_v48, 1.0  ;;  %v2827_v55 = vadd.f32 0.4994258, %v2826_v21  ;;  %v2934_v23 = vadd.f32 0.05243302, %v2933_v29  ;;  %v2045_v47 = vadd.f32 %v1969_v0, %v1766_v45  ;;  %v2525_v45 = vpop.f32.mrf.mxu0 }
 0x22b   : > { %v3024_v14 = vmul.f32 %v3023_v50, %v6135_v22  ;;  %v3060_v58 = vmul.f32 3.8918573e-05, %v6165_v7  ;;  %v3049_v43 = vmul.f32 2.1237322e-06, %v6165_v7  ;;  %v2862_v46 = vmul.f32 %v2861_v27, %v6016_v9 }
 0x22c   : > { %v3969_v50 = vadd.f32 1.0, %v4865_v6  ;;  %v2828_v5 = vmul.f32 %v2827_v55, %v5975_v54  ;;  %v2817_v49 = vmul.f32 %v2816_v44, %v5975_v54  ;;  %v2856_v10 = vadd.f32 0.18741608, %v2855_v32  ;;  %v4692_v44 = vld [vmem:[%s5039_s27 + $0x170] sm:$0xff] }
 0x22d   : > { %v3025_v3 = vadd.f32 0.112945676, %v3024_v14  ;;  %v3061_v20 = vadd.f32 0.001143296, %v3060_v58  ;;  %v2895_v39 = vmul.f32 %v2894_v18, %v6066_v57  ;;  %v3013_v29 = vmul.f32 %v3012_v52, %v6135_v22  ;;  %4726 = vmatmul.msk.f32.gmra.mxu2 %vm249_vm1, %v4692_v44  ;;  %v4758_v52 = vld [vmem:[%s5039_s27 + $0x171] sm:$0xff] }
 0x22e   : > { %v4001_v51 = vmul.f32 %v3969_v50, %v6096_v16  ;;  %v3050_v48 = vadd.f32 0.00028619796, %v3049_v43  ;;  %v6182_v2 = vadd.f32 1.0, %v2828_v5  ;;  %v2323_v54 = vadd.f32 %v2247_v17, %v2045_v47  ;;  %v4823_v43 = vld [vmem:[%s5039_s27 + $0x16a] sm:$0xff]  ;;  %4792 = vmatmul.msk.f32.gmra.mxu3 %vm249_vm1, %v4758_v52 }
 0x22f   : > { %v3062_v14 = vmul.f32 %v3061_v20, %v6165_v7  ;;  %v3026_v0 = vmul.f32 %v3025_v3, %v6135_v22  ;;  %v2935_v32 = vmul.f32 %v2934_v23, %v6074_v4  ;;  %v2974_v16 = vadd.f32 0.05243302, %v2973_v34  ;;  %4857 = vmatmul.msk.f32.gmra.mxu0 %vm249_vm1, %v4823_v43 }
 0x230   : > { %v4035_v21 = vsel %vm4031_vm10, %v4001_v51, 0.0  ;;  %v4105_v27 = vmul.f32 %v4001_v51, %v4001_v51  ;;  %4207 = vxpose.xlu0.b32.cont [3/16] (narrow) %v4001_v51, 8  ;;  %v2863_v20 = vadd.f32 0.014752088, %v2862_v46  ;;  %4916 = vrcp.f32 %v6182_v2 }
 0x231   : > { %v6189_v18 = vadd.f32 %v4035_v21, %v6123_v63  ;;  %v3063_v58 = vadd.f32 0.014752088, %v3062_v14  ;;  %v3014_v55 = vadd.f32 0.05243302, %v3013_v29  ;;  %v3051_v23 = vmul.f32 %v3050_v48, %v6165_v7  ;;  %v1693_v14 = vpop.f32.mrf.mxu1 }
 0x232   : > { %v4138_v6 = vsel %vm4031_vm10, %v4105_v27, 0.0  ;;  %v2818_v63 = vadd.f32 1.1283791, %v2817_v49  ;;  %v2857_v3 = vmul.f32 %v2856_v10, %v6016_v9  ;;  %v3027_v50 = vadd.f32 0.4994258, %v3026_v0  ;;  %4661 = vmatmul.msk.f32.gmra.mxu1 %vm249_vm1, %v4823_v43 }
 0x233   : > { %v6197_v17 = vadd.f32 %v4138_v6, %v6133_v1  ;;  %v6203_v47 = vadd.f32 %v2525_v45, %v2323_v54  ;;  %v2896_v34 = vadd.f32 0.18741608, %v2895_v39  ;;  %v2936_v5 = vadd.f32 0.18741608, %v2935_v32  ;;  %v1972_v45 = vpop.f32.mrf.mxu2 }
 0x234   : > { %v6207_v46 = vmul.f32 0.5, %v5935_v42  ;;  %v2975_v1 = vmul.f32 %v2974_v16, %v6093_v15  ;;  %v3064_v51 = vmul.f32 %v3063_v58, %v6165_v7  ;;  %v2864_v29 = vmul.f32 %v2863_v20, %v6016_v9 }
 0x235   : > { %v6213_v49 = vmul.f32 0.5, %v5972_v40  ;;  %v3015_v10 = vmul.f32 %v3014_v55, %v6135_v22  ;;  %v3052_v48 = vadd.f32 0.0036580483, %v3051_v23  ;;  %v6217_v0 = vmul.f32 0.70710677, %v6203_v47 }
 0x236   : > { %v4917_v39 = vpop.eup %4916  ;;  %v2819_v42 = vmul.f32 %v2818_v63, %v5947_v62  ;;  %v6220_v21 = vadd.f32 1.1283791, %v2857_v3  ;;  %v6223_v27 = vmul.f32 0.5, %v6012_v28  ;;  %v3028_v54 = vmul.f32 %v3027_v50, %v6135_v22 }
 0x237   : > { %v2897_v40 = vmul.f32 %v2896_v34, %v6066_v57  ;;  %v2937_v44 = vmul.f32 %v2936_v5, %v6074_v4  ;;  %v2831_v32 = vmul.f32 %v4917_v39, %v6182_v2  ;;  %v3087_v16 = vmul.f32 %v6217_v0, %v6217_v0 }
 0x238   : > { %v2976_v20 = vadd.f32 0.18741608, %v2975_v1  ;;  %v3065_v6 = vadd.f32 0.112945676, %v3064_v51  ;;  %v1767_v62 = vadd.f32 %v1693_v14, %v5637_v26  ;;  %v2865_v58 = vadd.f32 0.112945676, %v2864_v29 }
 0x239   : > { %v3016_v52 = vadd.f32 0.18741608, %v3015_v10  ;;  %v3053_v28 = vmul.f32 %v3052_v48, %v6165_v7  ;;  %v2832_v43 = vsub.f32 1.0, %v2831_v32  ;;  %v6233_v55 = vmin.f32 %v3087_v16, 16.0  ;;  %v2250_v48 = vpop.f32.mrf.mxu3 }
 0x23a   : > { %v6235_v23 = vadd.f32 1.0, %v3028_v54  ;;  %v2839_v63 = vand.u32 2147483647, %v6182_v2  ;;  %v2841_v3 = vand.u32 2147483648, %v6182_v2  ;;  %v2046_v50 = vadd.f32 %v1972_v45, %v1767_v62 }
 0x23b   : > { %v2833_v34 = vmul.f32 %v4917_v39, %v2832_v43  ;;  %vm2836_vm15 = vweird.f32 %v4917_v39  ;;  %v3100_v5 = vmul.f32 3.8918573e-05, %v6233_v55  ;;  %v2866_v26 = vmul.f32 %v2865_v58, %v6016_v9 }
 0x23c   : > { %v2898_v1 = vadd.f32 1.1283791, %v2897_v40  ;;  %v2938_v51 = vadd.f32 1.1283791, %v2937_v44  ;;  %v2977_v29 = vmul.f32 %v2976_v20, %v6093_v15  ;;  %v3066_v10 = vmul.f32 %v3065_v6, %v6165_v7 }
 0x23d   : > { %v2834_v14 = vadd.f32 %v4917_v39, %v2833_v34  ;;  %vm2835_vm0 = vweird.f32 %v6182_v2  ;;  %v3101_v54 = vadd.f32 0.001143296, %v3100_v5  ;;  %v2867_v32 = vadd.f32 0.4994258, %v2866_v26  ;;  %v2528_v34 = vpop.f32.mrf.mxu0 }
 0x23e   : > { %v3017_v16 = vmul.f32 %v3016_v52, %v6135_v22  ;;  %4918 = vrcp.f32 %v6235_v23  ;;  %v3054_v45 = vadd.f32 0.05243302, %v3053_v28  ;;  %vm2837_vm2 = vmor %vm2835_vm0, %vm2836_vm15  ;;  %v2842_v40 = vor.u32 1.1754944e-38, %v2841_v3  ;;  %v4693_v3 = vld [vmem:[%s5039_s27 + $0x180] sm:$0xff] }
 0x23f   : > { %v2838_v44 = vsel %vm2837_vm2, %v4917_v39, %v2834_v14  ;;  %vm2840_vm3 = vcmp.eq.f32.partialorder %v2839_v63, 8.507059e+37  ;;  %v3102_v20 = vmul.f32 %v3101_v54, %v6233_v55  ;;  %v2324_v6 = vadd.f32 %v2250_v48, %v2046_v50  ;;  %4727 = vmatmul.msk.f32.gmra.mxu2 %vm249_vm1, %v4693_v3  ;;  %v4759_v48 = vld [vmem:[%s5039_s27 + $0x181] sm:$0xff]  ;;  %v4824_v14 = vld [vmem:[%s5039_s27 + $0x172] sm:$0xff] }
 0x240   : > { %v3067_v62 = vadd.f32 0.4994258, %v3066_v10  ;;  %v2843_v58 = vsel %vm2840_vm3, %v2842_v40, %v2838_v44  ;;  %v3089_v2 = vmul.f32 2.1237322e-06, %v6233_v55  ;;  %v2868_v43 = vmul.f32 %v2867_v32, %v6016_v9  ;;  %4793 = vmatmul.msk.f32.gmra.mxu3 %vm249_vm1, %v4759_v48  ;;  %4858 = vmatmul.msk.f32.gmra.mxu0 %vm249_vm1, %v4824_v14 }
 0x241   : > { %v6251_v22 = vmul.f32 0.5, %v6023_v30  ;;  %v2844_v52 = vmul.f32 %v2843_v58, %v2819_v42  ;;  %v3103_v28 = vadd.f32 0.014752088, %v3102_v20  ;;  %v2900_v39 = vmul.f32 3.8918573e-05, %v6066_v57  ;;  %4662 = vmatmul.msk.f32.gmra.mxu1 %vm249_vm1, %v4824_v14 }
 0x242   : > { %v6256_v63 = vmul.f32 0.5, %v6060_v61  ;;  %v2978_v50 = vadd.f32 1.1283791, %v2977_v29  ;;  %v3018_v5 = vadd.f32 1.1283791, %v3017_v16  ;;  %v6258_v26 = vadd.f32 1.0, %v2868_v43 }
 0x243   : > { %v3055_v9 = vmul.f32 %v3054_v45, %v6165_v7  ;;  %v4866_v30 = vclamps-f32 %v2844_v52, 1.0  ;;  %v3104_v10 = vmul.f32 %v3103_v28, %v6233_v55  ;;  %v6263_v42 = vadd.f32 %v2528_v34, %v2324_v6 }
 0x244   : > { %v6267_v54 = vpop.eup %4918  ;;  %v6271_v61 = vmul.f32 %v6220_v21, %v5985_v60  ;;  %v6274_v29 = vmul.f32 0.5, %v6101_v31  ;;  %v3090_v32 = vadd.f32 0.00028619796, %v3089_v2  ;;  %4920 = vrcp.f32 %v6258_v26 }
 0x245   : > { %v6280_v16 = vmul.f32 %v2898_v1, %v6031_v24  ;;  %v3068_v45 = vmul.f32 %v3067_v62, %v6165_v7  ;;  %v3970_v40 = vadd.f32 1.0, %v4866_v30  ;;  %v2901_v44 = vadd.f32 0.001143296, %v2900_v39  ;;  %v1696_v62 = vpop.f32.mrf.mxu1 }
 0x246   : > { %v6285_v60 = vmul.f32 %v2938_v51, %v6039_v56  ;;  %v6288_v31 = vmul.f32 %v2978_v50, %v6077_v36  ;;  %v6291_v21 = vmul.f32 0.5, %v6142_v12  ;;  %v3105_v20 = vadd.f32 0.112945676, %v3104_v10 }
 0x247   : > { %v6294_v6 = vmul.f32 %v3018_v5, %v6119_v35  ;;  %v3056_v24 = vadd.f32 0.18741608, %v3055_v9  ;;  %v4002_v1 = vmul.f32 %v3970_v40, %v6207_v46  ;;  %v6298_v58 = vmul.f32 0.70710677, %v6263_v42 }
 0x248   : > { %v3031_v56 = vmul.f32 %v6267_v54, %v6235_v23  ;;  %v3039_v36 = vand.u32 2147483647, %v6235_v23  ;;  %v3091_v51 = vmul.f32 %v3090_v32, %v6233_v55  ;;  %v3106_v12 = vmul.f32 %v3105_v20, %v6233_v55 }
 0x249   : > { %v6305_v2 = vadd.f32 1.0, %v3068_v45  ;;  %v4037_v35 = vsel %vm4031_vm10, %v4002_v1, 0.0  ;;  %v4106_v43 = vmul.f32 %v4002_v1, %v4002_v1  ;;  %4208 = vxpose.xlu0.b32.cont [4/16] (narrow) %v4002_v1, 8  ;;  %v2902_v46 = vmul.f32 %v2901_v44, %v6066_v57 }
 0x24a   : > { %v4921_v52 = vpop.eup %4920  ;;  %v3041_v28 = vand.u32 2147483648, %v6235_v23  ;;  %v6311_v34 = vadd.f32 %v4037_v35, %v6189_v18  ;;  %v1768_v3 = vadd.f32 %v1696_v62, %v5647_v37  ;;  %v3127_v39 = vmul.f32 %v6298_v58, %v6298_v58 }
 0x24b   : > { %v3057_v50 = vmul.f32 %v3056_v24, %v6165_v7  ;;  %v4140_v5 = vsel %vm4031_vm10, %v4106_v43, 0.0  ;;  %v3107_v9 = vadd.f32 0.4994258, %v3106_v12  ;;  %v2871_v30 = vmul.f32 %v4921_v52, %v6258_v26  ;;  %v1975_v24 = vpop.f32.mrf.mxu2 }
 0x24c   : > { %v3032_v10 = vsub.f32 1.0, %v3031_v56  ;;  %v6320_v48 = vadd.f32 %v4140_v5, %v6197_v17  ;;  %v3092_v14 = vadd.f32 0.0036580483, %v3091_v51  ;;  %v6322_v32 = vmin.f32 %v3127_v39, 16.0 }
 0x24d   : > { %4922 = vrcp.f32 %v6305_v2  ;;  %v2872_v37 = vsub.f32 1.0, %v2871_v30  ;;  %v2879_v18 = vand.u32 2147483647, %v6258_v26  ;;  %v2903_v45 = vadd.f32 0.014752088, %v2902_v46 }
 0x24e   : > { %vm3036_vm4 = vweird.f32 %v6267_v54  ;;  %v2881_v7 = vand.u32 2147483648, %v6258_v26  ;;  %v3140_v40 = vmul.f32 3.8918573e-05, %v6322_v32  ;;  %v2940_v44 = vmul.f32 3.8918573e-05, %v6074_v4 }
 0x24f   : > { %vm3035_vm5 = vweird.f32 %v6235_v23  ;;  %v3108_v17 = vmul.f32 %v3107_v9, %v6233_v55  ;;  %v2873_v20 = vmul.f32 %v4921_v52, %v2872_v37  ;;  %vm2876_vm6 = vweird.f32 %v4921_v52 }
 0x250   : > { %v2904_v1 = vmul.f32 %v2903_v45, %v6066_v57  ;;  %v3033_v62 = vmul.f32 %v6267_v54, %v3032_v10  ;;  %v3058_v56 = vadd.f32 1.1283791, %v3057_v50  ;;  %v3093_v51 = vmul.f32 %v3092_v14, %v6233_v55  ;;  %vm6362_vm12 = vmor %vm3035_vm5, %vm3036_vm4 }
 0x251   : > { %vm2875_vm7 = vweird.f32 %v6258_v26  ;;  %v2874_v12 = vadd.f32 %v4921_v52, %v2873_v20  ;;  %vm2880_vm8 = vcmp.eq.f32.partialorder %v2879_v18, 8.507059e+37  ;;  %v3141_v35 = vadd.f32 0.001143296, %v3140_v40 }
 0x252   : > { %v2905_v43 = vadd.f32 0.112945676, %v2904_v1  ;;  %vm2877_vm9 = vmor %vm2875_vm7, %vm2876_vm6  ;;  %v2882_v46 = vor.u32 1.1754944e-38, %v2881_v7  ;;  %v2047_v39 = vadd.f32 %v1975_v24, %v1768_v3  ;;  %v2941_v5 = vadd.f32 0.001143296, %v2940_v44  ;;  %v2253_v3 = vpop.f32.mrf.mxu3 }
 0x253   : > { %v2980_v9 = vmul.f32 3.8918573e-05, %v6093_v15  ;;  %v6337_v30 = vpop.eup %4922  ;;  %v6339_v37 = vadd.f32 1.0, %v3108_v17  ;;  %v2878_v10 = vsel %vm2877_vm9, %v4921_v52, %v2874_v12  ;;  %v3142_v50 = vmul.f32 %v3141_v35, %v6322_v32 }
 0x254   : > { %v2906_v14 = vmul.f32 %v2905_v43, %v6066_v57  ;;  %vm6343_vm11 = vcmp.eq.f32.partialorder %v3039_v36, 8.507059e+37  ;;  %v2883_v18 = vsel %vm2880_vm8, %v2882_v46, %v2878_v10  ;;  %v3129_v45 = vmul.f32 2.1237322e-06, %v6322_v32 }
 0x255   : > { %v2942_v7 = vmul.f32 %v2941_v5, %v6074_v4  ;;  %v2981_v40 = vadd.f32 0.001143296, %v2980_v9  ;;  %v3034_v44 = vadd.f32 %v6267_v54, %v3033_v62  ;;  %v2884_v17 = vmul.f32 %v2883_v18, %v6271_v61  ;;  %v2531_v9 = vpop.f32.mrf.mxu0 }
 0x256   : > { %v3143_v52 = vadd.f32 0.014752088, %v3142_v50  ;;  %v2907_v20 = vadd.f32 0.4994258, %v2906_v14  ;;  %v3071_v24 = vmul.f32 %v6337_v30, %v6305_v2  ;;  %v6354_v36 = vmul.f32 0.5, %v6203_v47  ;;  %v4694_v14 = vld [vmem:[%s5039_s27 + $0x188] sm:$0xff] }
 0x257   : > { %v3094_v1 = vadd.f32 0.05243302, %v3093_v51  ;;  %v2943_v12 = vadd.f32 0.014752088, %v2942_v7  ;;  %4924 = vrcp.f32 %v6339_v37  ;;  %v4867_v35 = vclamps-f32 %v2884_v17, 1.0  ;;  %4728 = vmatmul.msk.f32.gmra.mxu2 %vm249_vm1, %v4694_v14 }
 0x258   : > { %v2325_v43 = vadd.f32 %v2253_v3, %v2047_v39  ;;  %v2982_v46 = vmul.f32 %v2981_v40, %v6093_v15  ;;  %v3042_v62 = vor.u32 1.1754944e-38, %v3041_v28  ;;  %v3130_v47 = vadd.f32 0.00028619796, %v3129_v45  ;;  %v1699_v45 = vpop.f32.mrf.mxu1 }
 0x259   : > { %v3144_v51 = vmul.f32 %v3143_v52, %v6322_v32  ;;  %v2908_v5 = vmul.f32 %v2907_v20, %v6066_v57  ;;  %v3038_v39 = vsel %vm6362_vm12, %v6267_v54, %v3034_v44  ;;  %v6372_v10 = vmul.f32 %v3058_v56, %v6152_v13  ;;  %v4760_v13 = vld [vmem:[%s5039_s27 + $0x189] sm:$0xff] }
 0x25a   : > { %v3079_v23 = vand.u32 2147483647, %v6305_v2  ;;  %v3971_v50 = vadd.f32 1.0, %v4867_v35  ;;  %v3072_v28 = vsub.f32 1.0, %v3071_v24  ;;  %v2944_v57 = vmul.f32 %v2943_v12, %v6074_v4  ;;  %v4825_v56 = vld [vmem:[%s5039_s27 + $0x182] sm:$0xff]  ;;  %4794 = vmatmul.msk.f32.gmra.mxu3 %vm249_vm1, %v4760_v13 }
 0x25b   : > { %v3145_v18 = vadd.f32 0.112945676, %v3144_v51  ;;  %v6376_v3 = vadd.f32 1.0, %v2908_v5  ;;  %v3095_v7 = vmul.f32 %v3094_v1, %v6233_v55  ;;  %v6382_v40 = vadd.f32 %v2531_v9, %v2325_v43  ;;  %4859 = vmatmul.msk.f32.gmra.mxu0 %vm249_vm1, %v4825_v56  ;;  %4663 = vmatmul.msk.f32.gmra.mxu1 %vm249_vm1, %v4825_v56 }
 0x25c   : > { %v4003_v54 = vmul.f32 %v3971_v50, %v6213_v49  ;;  %v2983_v44 = vadd.f32 0.014752088, %v2982_v46  ;;  %v3081_v17 = vand.u32 2147483648, %v6305_v2  ;;  %v3131_v52 = vmul.f32 %v3130_v47, %v6322_v32 }
 0x25d   : > { %v3146_v20 = vmul.f32 %v3145_v18, %v6322_v32  ;;  %4926 = vrcp.f32 %v6376_v3  ;;  %v6392_v24 = vpop.eup %4924  ;;  %v3043_v49 = vsel %vm6343_vm11, %v3042_v62, %v3038_v39  ;;  %v1769_v35 = vadd.f32 %v1699_v45, %v5658_v8  ;;  %v1978_v62 = vpop.f32.mrf.mxu2 }
 0x25e   : > { %v4039_v1 = vsel %vm4031_vm10, %v4003_v54, 0.0  ;;  %v4107_v12 = vmul.f32 %v4003_v54, %v4003_v54  ;;  %4209 = vxpose.xlu0.b32.cont [5/16] (narrow) %v4003_v54, 8  ;;  %v3073_v43 = vmul.f32 %v6337_v30, %v3072_v28  ;;  %v2945_v47 = vadd.f32 0.112945676, %v2944_v57 }
 0x25f   : > { %v6401_v46 = vadd.f32 %v4039_v1, %v6311_v34  ;;  %v3147_v61 = vadd.f32 0.4994258, %v3146_v20  ;;  %v3096_v51 = vadd.f32 0.18741608, %v3095_v7  ;;  %v6405_v26 = vmul.f32 0.70710677, %v6382_v40 }
 0x260   : > { %v4142_v5 = vsel %vm4031_vm10, %v4107_v12, 0.0  ;;  %v2984_v9 = vmul.f32 %v2983_v44, %v6093_v15  ;;  %v3111_v8 = vmul.f32 %v6392_v24, %v6339_v37  ;;  %v3132_v50 = vadd.f32 0.0036580483, %v3131_v52  ;;  %v2256_v44 = vpop.f32.mrf.mxu3 }
 0x261   : > { %v6411_v39 = vadd.f32 %v4142_v5, %v6320_v48  ;;  %v3148_v34 = vmul.f32 %v3147_v61, %v6322_v32  ;;  %v6415_v14 = vmul.f32 %v3043_v49, %v6294_v6  ;;  %vm3075_vm13 = vweird.f32 %v6305_v2 }
 0x262   : > { %v3082_v28 = vor.u32 1.1754944e-38, %v3081_v17  ;;  %v3167_v18 = vmul.f32 %v6405_v26, %v6405_v26  ;;  %vm3076_vm14 = vweird.f32 %v6337_v30  ;;  %vm6421_vm15 = vcmp.eq.f32.partialorder %v3079_v23, 8.507059e+37 }
 0x263   : > { %v4927_v45 = vpop.eup %4926  ;;  %v6425_v48 = vadd.f32 1.0, %v3148_v34  ;;  %v2048_v7 = vadd.f32 %v1978_v62, %v1769_v35  ;;  %v2946_v54 = vmul.f32 %v2945_v47, %v6074_v4  ;;  %v6429_v6 = vmul.f32 0.5, %v6263_v42  ;;  %vm6446_vm0 = vmor %vm3075_vm13, %vm3076_vm14 }
 0x264   : > { %v2911_v13 = vmul.f32 %v4927_v45, %v6376_v3  ;;  %v6432_v56 = vmin.f32 %v3167_v18, 16.0  ;;  %v2985_v17 = vadd.f32 0.112945676, %v2984_v9  ;;  %v3074_v52 = vadd.f32 %v6337_v30, %v3073_v43 }
 0x265   : > { %v3097_v23 = vmul.f32 %v3096_v51, %v6233_v55  ;;  %v3112_v20 = vsub.f32 1.0, %v3111_v8  ;;  %v3133_v49 = vmul.f32 %v3132_v50, %v6322_v32  ;;  %4928 = vrcp.f32 %v6425_v48 }
 0x266   : > { %v2912_v1 = vsub.f32 1.0, %v2911_v13  ;;  %v3169_v12 = vmul.f32 2.1237322e-06, %v6432_v56  ;;  %v3180_v42 = vmul.f32 3.8918573e-05, %v6432_v56  ;;  %v2921_v61 = vand.u32 2147483648, %v6376_v3 }
 0x267   : > { %v2919_v35 = vand.u32 2147483647, %v6376_v3  ;;  %v2326_v47 = vadd.f32 %v2256_v44, %v2048_v7  ;;  %v2947_v5 = vadd.f32 0.4994258, %v2946_v54  ;;  %vm2916_vm2 = vweird.f32 %v4927_v45  ;;  %v2534_v54 = vpop.f32.mrf.mxu0  ;;  %v4695_v13 = vld [vmem:[%s5039_s27 + $0x198] sm:$0xff] }
 0x268   : > { %v2913_v43 = vmul.f32 %v4927_v45, %v2912_v1  ;;  %v3181_v51 = vadd.f32 0.001143296, %v3180_v42  ;;  %v2986_v62 = vmul.f32 %v2985_v17, %v6093_v15  ;;  %v3078_v9 = vsel %vm6446_vm0, %v6337_v30, %v3074_v52  ;;  %4729 = vmatmul.msk.f32.gmra.mxu2 %vm249_vm1, %v4695_v13 }
 0x269   : > { %v3098_v8 = vadd.f32 1.1283791, %v3097_v23  ;;  %v3134_v50 = vadd.f32 0.05243302, %v3133_v49  ;;  %v2948_v34 = vmul.f32 %v2947_v5, %v6074_v4  ;;  %vm2915_vm3 = vweird.f32 %v6376_v3  ;;  %v4761_v23 = vld [vmem:[%s5039_s27 + $0x199] sm:$0xff]  ;;  %v4826_v49 = vld [vmem:[%s5039_s27 + $0x18a] sm:$0xff] }
 0x26a   : > { %v2914_v18 = vadd.f32 %v4927_v45, %v2913_v43  ;;  %v3170_v2 = vadd.f32 0.00028619796, %v3169_v12  ;;  %v3182_v7 = vmul.f32 %v3181_v51, %v6432_v56  ;;  %v3113_v44 = vmul.f32 %v6392_v24, %v3112_v20  ;;  %vm2917_vm4 = vmor %vm2915_vm3, %vm2916_vm2  ;;  %4795 = vmatmul.msk.f32.gmra.mxu3 %vm249_vm1, %v4761_v23  ;;  %4860 = vmatmul.msk.f32.gmra.mxu0 %vm249_vm1, %v4826_v49  ;;  %v1702_v51 = vpop.f32.mrf.mxu1 }
 0x26b   : > { %v2922_v17 = vor.u32 1.1754944e-38, %v2921_v61  ;;  %v6459_v1 = vadd.f32 1.0, %v2948_v34  ;;  %v6461_v30 = vadd.f32 %v2534_v54, %v2326_v47  ;;  %v6464_v4 = vpop.eup %4928  ;;  %v3083_v3 = vsel %vm6421_vm15, %v3082_v28, %v3078_v9  ;;  %4664 = vmatmul.msk.f32.gmra.mxu1 %vm249_vm1, %v4826_v49 }
 0x26c   : > { %v2918_v52 = vsel %vm2917_vm4, %v4927_v45, %v2914_v18  ;;  %vm2920_vm5 = vcmp.eq.f32.partialorder %v2919_v35, 8.507059e+37  ;;  %v2987_v12 = vadd.f32 0.4994258, %v2986_v62  ;;  %v3135_v20 = vmul.f32 %v3134_v50, %v6322_v32 }
 0x26d   : > { %v2923_v42 = vsel %vm2920_vm5, %v2922_v17, %v2918_v52  ;;  %v3183_v61 = vadd.f32 0.014752088, %v3182_v7  ;;  %4930 = vrcp.f32 %v6459_v1  ;;  %vm3116_vm6 = vweird.f32 %v6392_v24 }
 0x26e   : > { %v3121_v57 = vand.u32 2147483648, %v6339_v37  ;;  %v2924_v28 = vmul.f32 %v2923_v42, %v6280_v16  ;;  %v3171_v45 = vmul.f32 %v3170_v2, %v6432_v56  ;;  %v3114_v35 = vadd.f32 %v6392_v24, %v3113_v44  ;;  %v1981_v44 = vpop.f32.mrf.mxu2 }
 0x26f   : > { %v3151_v47 = vmul.f32 %v6464_v4, %v6425_v48  ;;  %v3184_v5 = vmul.f32 %v3183_v61, %v6432_v56  ;;  %v6484_v55 = vmul.f32 0.70710677, %v6461_v30  ;;  %v6487_v43 = vmul.f32 %v3083_v3, %v6372_v10  ;;  %v2537_v10 = vpop.f32.mrf.mxu0 }
 0x270   : > { %vm3115_vm7 = vweird.f32 %v6339_v37  ;;  %v4868_v16 = vclamps-f32 %v2924_v28, 1.0  ;;  %v2988_v62 = vmul.f32 %v2987_v12, %v6093_v15  ;;  %v3119_v9 = vand.u32 2147483647, %v6339_v37 }
 0x271   : > { %v3136_v50 = vadd.f32 0.18741608, %v3135_v20  ;;  %v3185_v34 = vadd.f32 0.112945676, %v3184_v5  ;;  %v3207_v18 = vmul.f32 %v6484_v55, %v6484_v55  ;;  %v3099_v2 = vmul.f32 %v3098_v8, %v6217_v0  ;;  %vm6497_vm8 = vmor %vm3115_vm7, %vm3116_vm6 }
 0x272   : > { %v3122_v7 = vor.u32 1.1754944e-38, %v3121_v57  ;;  %v3972_v54 = vadd.f32 1.0, %v4868_v16  ;;  %v3172_v13 = vadd.f32 0.0036580483, %v3171_v45  ;;  %v3118_v37 = vsel %vm6497_vm8, %v6392_v24, %v3114_v35  ;;  %v2259_v57 = vpop.f32.mrf.mxu3  ;;  %v4696_v16 = vld [vmem:[%s5039_s27 + $0x1a0] sm:$0xff] }
 0x273   : > { %v6501_v15 = vpop.eup %4930  ;;  %v3152_v17 = vsub.f32 1.0, %v3151_v47  ;;  %v3186_v3 = vmul.f32 %v3185_v34, %v6432_v56  ;;  %v1770_v0 = vadd.f32 %v1702_v51, %v5668_v11  ;;  %v6511_v23 = vmin.f32 %v3207_v18, 16.0  ;;  %4730 = vmatmul.msk.f32.gmra.mxu2 %vm249_vm1, %v4696_v16 }
 0x274   : > { %v4004_v8 = vmul.f32 %v3972_v54, %v6223_v27  ;;  %v2951_v52 = vmul.f32 %v6501_v15, %v6459_v1  ;;  %v6513_v49 = vadd.f32 1.0, %v2988_v62  ;;  %vm3120_vm9 = vcmp.eq.f32.partialorder %v3119_v9, 8.507059e+37  ;;  %v4827_v54 = vld [vmem:[%s5039_s27 + $0x19a] sm:$0xff] }
 0x275   : > { %v3137_v12 = vmul.f32 %v3136_v50, %v6322_v32  ;;  %v6517_v20 = vmul.f32 0.5, %v6382_v40  ;;  %v2049_v24 = vadd.f32 %v1981_v44, %v1770_v0  ;;  %v3123_v42 = vsel %vm3120_vm9, %v3122_v7, %v3118_v37  ;;  %v4762_v7 = vld [vmem:[%s5039_s27 + $0x1a1] sm:$0xff]  ;;  %4861 = vmatmul.msk.f32.gmra.mxu0 %vm249_vm1, %v4827_v54 }
 0x276   : > { %v4041_v11 = vsel %vm4031_vm10, %v4004_v8, 0.0  ;;  %v4108_v61 = vmul.f32 %v4004_v8, %v4004_v8  ;;  %4210 = vxpose.xlu0.b32.cont [6/16] (narrow) %v4004_v8, 8  ;;  %v3173_v27 = vmul.f32 %v3172_v13, %v6432_v56  ;;  %v3153_v28 = vmul.f32 %v6464_v4, %v3152_v17  ;;  %4796 = vmatmul.msk.f32.gmra.mxu3 %vm249_vm1, %v4762_v7  ;;  %v1705_v8 = vpop.f32.mrf.mxu1 }
 0x277   : > { %v6523_v45 = vadd.f32 %v4041_v11, %v6401_v46  ;;  %v2952_v35 = vsub.f32 1.0, %v2951_v52  ;;  %v2961_v32 = vand.u32 2147483648, %v6459_v1  ;;  %v3187_v47 = vadd.f32 0.4994258, %v3186_v3 }
 0x278   : > { %v4144_v40 = vsel %vm4031_vm10, %v4108_v61, 0.0  ;;  %v3220_v5 = vmul.f32 3.8918573e-05, %v6511_v23  ;;  %4932 = vrcp.f32 %v6513_v49  ;;  %v3209_v46 = vmul.f32 2.1237322e-06, %v6511_v23 }
 0x279   : > { %v6531_v51 = vadd.f32 %v4144_v40, %v6411_v39  ;;  %v2953_v62 = vmul.f32 %v6501_v15, %v2952_v35  ;;  %v2327_v9 = vadd.f32 %v2259_v57, %v2049_v24  ;;  %v6536_v50 = vmul.f32 %v3123_v42, %v3099_v2  ;;  %v2540_v35 = vpop.f32.mrf.mxu0 }
 0x27a   : > { %vm2956_vm11 = vweird.f32 %v6501_v15  ;;  %v2959_v34 = vand.u32 2147483647, %v6459_v1  ;;  %v3221_v18 = vadd.f32 0.001143296, %v3220_v5  ;;  %v6542_v13 = vadd.f32 1.1283791, %v3137_v12 }
 0x27b   : > { %vm3155_vm12 = vweird.f32 %v6425_v48  ;;  %vm3156_vm13 = vweird.f32 %v6464_v4  ;;  %v3174_v39 = vadd.f32 0.05243302, %v3173_v27  ;;  %v3188_v2 = vmul.f32 %v3187_v47, %v6432_v56 }
 0x27c   : > { %v2954_v44 = vadd.f32 %v6501_v15, %v2953_v62  ;;  %vm2955_vm14 = vweird.f32 %v6459_v1  ;;  %v3222_v37 = vmul.f32 %v3221_v18, %v6511_v23  ;;  %v6553_v17 = vadd.f32 %v6464_v4, %v3153_v28  ;;  %v1984_v28 = vpop.f32.mrf.mxu2  ;;  %vm6568_vm2 = vmor %vm3155_vm12, %vm3156_vm13  ;;  %v4828_v18 = vld [vmem:[%s5039_s27 + $0x1a2] sm:$0xff] }
 0x27d   : > { %vm2957_vm15 = vmor %vm2955_vm14, %vm2956_vm11  ;;  %v2962_v3 = vor.u32 1.1754944e-38, %v2961_v32  ;;  %v3210_v0 = vadd.f32 0.00028619796, %v3209_v46  ;;  %v6557_v52 = vadd.f32 %v2537_v10, %v2327_v9  ;;  %v3159_v24 = vand.u32 2147483647, %v6425_v48  ;;  %4862 = vmatmul.msk.f32.gmra.mxu0 %vm249_vm1, %v4828_v18 }
 0x27e   : > { %v4933_v12 = vpop.eup %4932  ;;  %v2958_v42 = vsel %vm2957_vm15, %v6501_v15, %v2954_v44  ;;  %vm2960_vm0 = vcmp.eq.f32.partialorder %v2959_v34, 8.507059e+37  ;;  %v3223_v1 = vadd.f32 0.014752088, %v3222_v37  ;;  %v3161_v11 = vand.u32 2147483648, %v6425_v48 }
 0x27f   : > { %v3175_v61 = vmul.f32 %v3174_v39, %v6432_v56  ;;  %v2963_v27 = vsel %vm2960_vm0, %v2962_v3, %v2958_v42  ;;  %v2991_v57 = vmul.f32 %v4933_v12, %v6513_v49  ;;  %v6572_v15 = vadd.f32 1.0, %v3188_v2  ;;  %v2262_v2 = vpop.f32.mrf.mxu3 }
 0x280   : > { %v2964_v32 = vmul.f32 %v2963_v27, %v6285_v60  ;;  %v3224_v40 = vmul.f32 %v3223_v1, %v6511_v23  ;;  %v1771_v47 = vadd.f32 %v1705_v8, %v5675_v59  ;;  %v3158_v5 = vsel %vm6568_vm2, %v6464_v4, %v6553_v17 }
 0x281   : > { %v3211_v16 = vmul.f32 %v3210_v0, %v6511_v23  ;;  %v2992_v48 = vsub.f32 1.0, %v2991_v57  ;;  %v6583_v62 = vmul.f32 0.70710677, %v6557_v52  ;;  %v2999_v9 = vand.u32 2147483647, %v6513_v49 }
 0x282   : > { %v4869_v46 = vclamps-f32 %v2964_v32, 1.0  ;;  %v3001_v60 = vand.u32 2147483648, %v6513_v49  ;;  %v2050_v34 = vadd.f32 %v1984_v28, %v1771_v47  ;;  %vm6588_vm3 = vcmp.eq.f32.partialorder %v3159_v24, 8.507059e+37 }
 0x283   : > { %v3225_v10 = vadd.f32 0.112945676, %v3224_v40  ;;  %v2993_v7 = vmul.f32 %v4933_v12, %v2992_v48  ;;  %vm2996_vm4 = vweird.f32 %v4933_v12  ;;  %v3247_v4 = vmul.f32 %v6583_v62, %v6583_v62 }
 0x284   : > { %v3176_v54 = vadd.f32 0.18741608, %v3175_v61  ;;  %4934 = vrcp.f32 %v6572_v15  ;;  %v3973_v39 = vadd.f32 1.0, %v4869_v46  ;;  %v4871_v44 = vclamps-f32 %v6415_v14, 1.0 }
 0x285   : > { %v3226_v37 = vmul.f32 %v3225_v10, %v6511_v23  ;;  %v2994_v17 = vadd.f32 %v4933_v12, %v2993_v7  ;;  %vm2995_vm5 = vweird.f32 %v6513_v49  ;;  %v6599_v3 = vmin.f32 %v3247_v4, 16.0 }
 0x286   : > { %v4005_v0 = vmul.f32 %v3973_v39, %v6251_v22  ;;  %v3212_v8 = vadd.f32 0.0036580483, %v3211_v16  ;;  %vm6602_vm6 = vmor %vm2995_vm5, %vm2996_vm4  ;;  %vm3000_vm1 = vcmp.eq.f32.partialorder %v2999_v9, 8.507059e+37  ;;  %v3002_v42 = vor.u32 1.1754944e-38, %v3001_v60 }
 0x287   : > { %v3227_v1 = vadd.f32 0.4994258, %v3226_v37  ;;  %v2998_v14 = vsel %vm6602_vm6, %v4933_v12, %v2994_v17  ;;  %v3249_v61 = vmul.f32 2.1237322e-06, %v6599_v3  ;;  %v2328_v27 = vadd.f32 %v2262_v2, %v2050_v34 }
 0x288   : > { %v4043_v49 = vsel %vm4031_vm10, %v4005_v0, 0.0  ;;  %v4109_v57 = vmul.f32 %v4005_v0, %v4005_v0  ;;  %4211 = vxpose.xlu0.b32.cont [7/16] (narrow) %v4005_v0, 8  ;;  %v3260_v22 = vmul.f32 3.8918573e-05, %v6599_v3  ;;  %v3975_v28 = vadd.f32 1.0, %v4871_v44  ;;  %v1987_v44 = vpop.f32.mrf.mxu2 }
 0x289   : > { %v4044_v32 = vadd.f32 %v4043_v49, %v6523_v45  ;;  %v3228_v40 = vmul.f32 %v3227_v1, %v6511_v23  ;;  %v3003_v47 = vsel %vm3000_vm1, %v3002_v42, %v2998_v14  ;;  %v3250_v16 = vadd.f32 0.00028619796, %v3249_v61  ;;  %v1708_v45 = vpop.f32.mrf.mxu1  ;;  %v2265_v1 = vpop.f32.mrf.mxu3 }
 0x28a   : > { %v6613_v48 = vpop.eup %4934  ;;  %v3162_v12 = vor.u32 1.1754944e-38, %v3161_v11  ;;  %v3177_v46 = vmul.f32 %v3176_v54, %v6432_v56  ;;  %v4146_v9 = vsel %vm4031_vm10, %v4109_v57, 0.0  ;;  %v3004_v60 = vmul.f32 %v3003_v47, %v6288_v31 }
 0x28b   : > { %v4147_v34 = vadd.f32 %v4146_v9, %v6531_v51  ;;  %v3213_v18 = vmul.f32 %v3212_v8, %v6511_v23  ;;  %v3251_v10 = vmul.f32 %v3250_v16, %v6599_v3  ;;  %v6621_v7 = vadd.f32 %v2540_v35, %v2328_v27 }
 0x28c   : > { %v3163_v4 = vsel %vm6588_vm3, %v3162_v12, %v3158_v5  ;;  %v4870_v39 = vclamps-f32 %v3004_v60, 1.0  ;;  %v3261_v11 = vadd.f32 0.001143296, %v3260_v22  ;;  %v4007_v56 = vmul.f32 %v3975_v28, %v6274_v29 }
 0x28d   : > { %v3139_v54 = vmul.f32 %v6542_v13, %v6298_v58  ;;  %v3191_v31 = vmul.f32 %v6613_v48, %v6572_v15  ;;  %v6631_v51 = vmul.f32 0.5, %v6461_v30  ;;  %v6633_v2 = vadd.f32 1.0, %v3228_v40 }
 0x28e   : > { %v3178_v37 = vadd.f32 1.1283791, %v3177_v46  ;;  %v3974_v17 = vadd.f32 1.0, %v4870_v39  ;;  %v3262_v5 = vmul.f32 %v3261_v11, %v6599_v3  ;;  %v1772_v59 = vadd.f32 %v1708_v45, %v5686_v41  ;;  %v2543_v46 = vpop.f32.mrf.mxu0 }
 0x28f   : > { %v6637_v0 = vmul.f32 %v3163_v4, %v3139_v54  ;;  %v3214_v29 = vadd.f32 0.05243302, %v3213_v18  ;;  %v3252_v8 = vadd.f32 0.0036580483, %v3251_v10  ;;  %v6640_v58 = vmul.f32 0.70710677, %v6621_v7 }
 0x290   : > { %v4006_v13 = vmul.f32 %v3974_v17, %v6256_v63  ;;  %v3263_v30 = vadd.f32 0.014752088, %v3262_v5  ;;  %v4111_v24 = vmul.f32 %v4007_v56, %v4007_v56  ;;  %v2051_v42 = vadd.f32 %v1987_v44, %v1772_v59 }
 0x291   : > { %v3192_v14 = vsub.f32 1.0, %v3191_v31  ;;  %4936 = vrcp.f32 %v6633_v2  ;;  %v3287_v61 = vmul.f32 %v6640_v58, %v6640_v58  ;;  %v4872_v41 = vclamps-f32 %v6487_v43, 1.0  ;;  %v1711_v17 = vpop.f32.mrf.mxu1 }
 0x292   : > { %v4045_v27 = vsel %vm4031_vm10, %v4006_v13, 0.0  ;;  %v4110_v49 = vmul.f32 %v4006_v13, %v4006_v13  ;;  %4212 = vxpose.xlu0.b32.cont [8/16] (narrow) %v4006_v13, 8  ;;  %v3264_v57 = vmul.f32 %v3263_v30, %v6599_v3  ;;  %v4047_v63 = vsel %vm4031_vm10, %v4007_v56, 0.0 }
 0x293   : > { %v4046_v22 = vadd.f32 %v4045_v27, %v4044_v32  ;;  %v6650_v28 = vmin.f32 %v3287_v61, 16.0  ;;  %v2329_v35 = vadd.f32 %v2265_v1, %v2051_v42  ;;  %v3976_v40 = vadd.f32 1.0, %v4872_v41  ;;  %v1990_v27 = vpop.f32.mrf.mxu2 }
 0x294   : > { %v3215_v47 = vmul.f32 %v3214_v29, %v6511_v23  ;;  %v4148_v16 = vsel %vm4031_vm10, %v4110_v49, 0.0  ;;  %v3253_v12 = vmul.f32 %v3252_v8, %v6599_v3  ;;  %v4150_v43 = vsel %vm4031_vm10, %v4111_v24, 0.0 }
 0x295   : > { %v4149_v9 = vadd.f32 %v4148_v16, %v4147_v34  ;;  %v3265_v60 = vadd.f32 0.112945676, %v3264_v57  ;;  %v4048_v18 = vadd.f32 %v4047_v63, %v4046_v22  ;;  %v3289_v10 = vmul.f32 2.1237322e-06, %v6650_v28 }
 0x296   : > { %v3193_v32 = vmul.f32 %v6613_v48, %v3192_v14  ;;  %v3199_v45 = vand.u32 2147483647, %v6572_v15  ;;  %v3300_v4 = vmul.f32 3.8918573e-05, %v6650_v28  ;;  %v4008_v39 = vmul.f32 %v3976_v40, %v6291_v21 }
 0x297   : > { %v6661_v11 = vpop.eup %4936  ;;  %v3266_v54 = vmul.f32 %v3265_v60, %v6599_v3  ;;  %v4151_v31 = vadd.f32 %v4150_v43, %v4149_v9  ;;  %v3290_v44 = vadd.f32 0.00028619796, %v3289_v10  ;;  %v6664_v34 = vadd.f32 %v2543_v46, %v2329_v35 }
 0x298   : > { %v6667_v5 = vmul.f32 %v3178_v37, %v6405_v26  ;;  %v3216_v59 = vadd.f32 0.18741608, %v3215_v47  ;;  %v3301_v29 = vadd.f32 0.001143296, %v3300_v4  ;;  %v4049_v8 = vsel %vm4031_vm10, %v4008_v39, 0.0  ;;  %v2268_v47 = vpop.f32.mrf.mxu3  ;;  %v2546_v4 = vpop.f32.mrf.mxu0 }
 0x299   : > { %v3254_v13 = vadd.f32 0.05243302, %v3253_v12  ;;  %v3267_v30 = vadd.f32 0.4994258, %v3266_v54  ;;  %v4112_v24 = vmul.f32 %v4008_v39, %v4008_v39  ;;  %v6670_v21 = vadd.f32 %v4049_v8, %v4048_v18 }
 0x29a   : > { %vm3196_vm7 = vweird.f32 %v6613_v48  ;;  %v3201_v42 = vand.u32 2147483648, %v6572_v15  ;;  %v3231_v1 = vmul.f32 %v6661_v11, %v6633_v2  ;;  %4213 = vxpose.xlu0.b32.cont [9/16] (narrow) %v4007_v56, 8  ;;  %v3302_v26 = vmul.f32 %v3301_v29, %v6650_v28 }
 0x29b   : > { %v3194_v37 = vadd.f32 %v6613_v48, %v3193_v32  ;;  %v3291_v14 = vmul.f32 %v3290_v44, %v6650_v28  ;;  %v4152_v61 = vsel %vm4031_vm10, %v4112_v24, 0.0  ;;  %v6681_v41 = vmul.f32 0.70710677, %v6664_v34 }
 0x29c   : > { %v3268_v49 = vmul.f32 %v3267_v30, %v6599_v3  ;;  %v3303_v57 = vadd.f32 0.014752088, %v3302_v26  ;;  %v1773_v63 = vadd.f32 %v1711_v17, %v5697_v19  ;;  %v6685_v22 = vadd.f32 %v4152_v61, %v4151_v31  ;;  %v1714_v17 = vpop.f32.mrf.mxu1 }
 0x29d   : > { %vm3195_vm8 = vweird.f32 %v6572_v15  ;;  %v3217_v56 = vmul.f32 %v3216_v59, %v6511_v23  ;;  %v3255_v35 = vmul.f32 %v3254_v13, %v6599_v3  ;;  %v3327_v40 = vmul.f32 %v6681_v41, %v6681_v41 }
 0x29e   : > { %vm6694_vm9 = vmor %vm3195_vm8, %vm3196_vm7  ;;  %vm6698_vm11 = vcmp.eq.f32.partialorder %v3199_v45, 8.507059e+37  ;;  %v3232_v12 = vsub.f32 1.0, %v3231_v1  ;;  %v3304_v15 = vmul.f32 %v3303_v57, %v6650_v28  ;;  %v2052_v23 = vadd.f32 %v1990_v27, %v1773_v63 }
 0x29f   : > { %v3198_v43 = vsel %vm6694_vm9, %v6613_v48, %v3194_v37  ;;  %v3202_v46 = vor.u32 1.1754944e-38, %v3201_v42  ;;  %v6707_v9 = vmul.f32 0.5, %v6557_v52  ;;  %v3292_v60 = vadd.f32 0.0036580483, %v3291_v14  ;;  %v1993_v14 = vpop.f32.mrf.mxu2 }
 0x2a0   : > { %v6709_v18 = vadd.f32 1.0, %v3268_v49  ;;  %v3305_v10 = vadd.f32 0.112945676, %v3304_v15  ;;  %v6711_v32 = vmin.f32 %v3327_v40, 16.0  ;;  %v2330_v45 = vadd.f32 %v2268_v47, %v2052_v23 }
 0x2a1   : > { %v3218_v54 = vadd.f32 1.1283791, %v3217_v56  ;;  %v3256_v31 = vadd.f32 0.18741608, %v3255_v35  ;;  %v6714_v44 = vmul.f32 0.5, %v6621_v7  ;;  %v4873_v48 = vclamps-f32 %v6536_v50, 1.0 }
 0x2a2   : > { %v3233_v59 = vmul.f32 %v6661_v11, %v3232_v12  ;;  %v3306_v52 = vmul.f32 %v3305_v10, %v6650_v28  ;;  %4214 = vxpose.xlu0.b32.cont [10/16] (narrow) %v4008_v39, 8  ;;  %v3329_v29 = vmul.f32 2.1237322e-06, %v6711_v32  ;;  %v3340_v8 = vmul.f32 3.8918573e-05, %v6711_v32  ;;  %v2271_v10 = vpop.f32.mrf.mxu3 }
 0x2a3   : > { %v3203_v13 = vsel %vm6698_vm11, %v3202_v46, %v3198_v43  ;;  %v3241_v30 = vand.u32 2147483648, %v6633_v2  ;;  %v3977_v24 = vadd.f32 1.0, %v4873_v48  ;;  %v6724_v7 = vadd.f32 %v2546_v4, %v2330_v45 }
 0x2a4   : > { %4938 = vrcp.f32 %v6709_v18  ;;  %v3293_v50 = vmul.f32 %v3292_v60, %v6650_v28  ;;  %v3307_v42 = vadd.f32 0.4994258, %v3306_v52  ;;  %v3330_v1 = vadd.f32 0.00028619796, %v3329_v29 }
 0x2a5   : > { %vm3236_vm12 = vweird.f32 %v6661_v11  ;;  %v3341_v39 = vadd.f32 0.001143296, %v3340_v8  ;;  %v4009_v26 = vmul.f32 %v3977_v24, %v6354_v36  ;;  %v6731_v37 = vmul.f32 0.70710677, %v6724_v7  ;;  %v2549_v24 = vpop.f32.mrf.mxu0 }
 0x2a6   : > { %v3234_v61 = vadd.f32 %v6661_v11, %v3233_v59  ;;  %v3257_v27 = vmul.f32 %v3256_v31, %v6599_v3  ;;  %v3308_v49 = vmul.f32 %v3307_v42, %v6650_v28  ;;  %v1774_v57 = vadd.f32 %v1714_v17, %v5708_v33 }
 0x2a7   : > { %v3331_v63 = vmul.f32 %v3330_v1, %v6711_v32  ;;  %v3342_v56 = vmul.f32 %v3341_v39, %v6711_v32  ;;  %v4051_v35 = vsel %vm4031_vm10, %v4009_v26, 0.0  ;;  %v4113_v40 = vmul.f32 %v4009_v26, %v4009_v26 }
 0x2a8   : > { %vm3235_vm13 = vweird.f32 %v6633_v2  ;;  %v3294_v36 = vadd.f32 0.05243302, %v3293_v50  ;;  %v4052_v47 = vadd.f32 %v4051_v35, %v6670_v21  ;;  %v2053_v16 = vadd.f32 %v1993_v14, %v1774_v57  ;;  %v1996_v57 = vpop.f32.mrf.mxu2 }
 0x2a9   : > { %v3332_v19 = vadd.f32 0.0036580483, %v3331_v63  ;;  %v3343_v12 = vadd.f32 0.014752088, %v3342_v56  ;;  %v4154_v3 = vsel %vm4031_vm10, %v4113_v40, 0.0  ;;  %v3367_v33 = vmul.f32 %v6731_v37, %v6731_v37  ;;  %vm6753_vm14 = vmor %vm3235_vm13, %vm3236_vm12 }
 0x2aa   : > { %v6745_v15 = vpop.eup %4938  ;;  %v6748_v23 = vmul.f32 %v3203_v13, %v6667_v5  ;;  %v3219_v43 = vmul.f32 %v3218_v54, %v6484_v55  ;;  %v3239_v21 = vand.u32 2147483647, %v6633_v2  ;;  %v3242_v60 = vor.u32 1.1754944e-38, %v3241_v30  ;;  %4215 = vxpose.xlu0.b32.cont [11/16] (narrow) %v4009_v26, 8  ;;  %v1717_v54 = vpop.f32.mrf.mxu1 }
 0x2ab   : > { %v3238_v45 = vsel %vm6753_vm14, %v6661_v11, %v3234_v61  ;;  %v3258_v4 = vadd.f32 1.1283791, %v3257_v27  ;;  %v6761_v5 = vadd.f32 1.0, %v3308_v49  ;;  %v3344_v55 = vmul.f32 %v3343_v12, %v6711_v32 }
 0x2ac   : > { %v3295_v31 = vmul.f32 %v3294_v36, %v6650_v28  ;;  %v4155_v17 = vadd.f32 %v4154_v3, %v6685_v22  ;;  %v6766_v48 = vmin.f32 %v3367_v33, 16.0  ;;  %v4874_v2 = vclamps-f32 %v6637_v0, 1.0 }
 0x2ad   : > { %v3271_v59 = vmul.f32 %v6745_v15, %v6709_v18  ;;  %v3333_v52 = vmul.f32 %v3332_v19, %v6711_v32  ;;  %v3345_v11 = vadd.f32 0.112945676, %v3344_v55  ;;  %v2331_v29 = vadd.f32 %v2271_v10, %v2053_v16 }
 0x2ae   : > { %vm3240_vm15 = vcmp.eq.f32.partialorder %v3239_v21, 8.507059e+37  ;;  %v3369_v8 = vmul.f32 2.1237322e-06, %v6766_v48  ;;  %v3380_v13 = vmul.f32 3.8918573e-05, %v6766_v48  ;;  %v3978_v30 = vadd.f32 1.0, %v4874_v2 }
 0x2af   : > { %v3243_v50 = vsel %vm3240_vm15, %v3242_v60, %v3238_v45  ;;  %4940 = vrcp.f32 %v6761_v5  ;;  %v6776_v22 = vmul.f32 0.5, %v6664_v34  ;;  %v3346_v0 = vmul.f32 %v3345_v11, %v6711_v32 }
 0x2b0   : > { %v3296_v42 = vadd.f32 0.18741608, %v3295_v31  ;;  %v3370_v1 = vadd.f32 0.00028619796, %v3369_v8  ;;  %v3381_v39 = vadd.f32 0.001143296, %v3380_v13  ;;  %v4010_v26 = vmul.f32 %v3978_v30, %v6429_v6 }
 0x2b1   : > { %v3272_v14 = vsub.f32 1.0, %v3271_v59  ;;  %v3334_v61 = vadd.f32 0.05243302, %v3333_v52  ;;  %v3347_v27 = vadd.f32 0.4994258, %v3346_v0  ;;  %v6780_v49 = vadd.f32 %v2549_v24, %v2331_v29  ;;  %v2552_v24 = vpop.f32.mrf.mxu0 }
 0x2b2   : > { %v3371_v63 = vmul.f32 %v3370_v1, %v6766_v48  ;;  %v3382_v56 = vmul.f32 %v3381_v39, %v6766_v48  ;;  %v4053_v34 = vsel %vm4031_vm10, %v4010_v26, 0.0  ;;  %v4114_v35 = vmul.f32 %v4010_v26, %v4010_v26  ;;  %4216 = vxpose.xlu0.b32.cont [12/16] (narrow) %v4010_v26, 8  ;;  %v1720_v55 = vpop.f32.mrf.mxu1  ;;  %v1999_v39 = vpop.f32.mrf.mxu2 }
 0x2b3   : > { %v3279_v40 = vand.u32 2147483647, %v6709_v18  ;;  %v3281_v36 = vand.u32 2147483648, %v6709_v18  ;;  %v3348_v6 = vmul.f32 %v3347_v27, %v6711_v32  ;;  %v4054_v16 = vadd.f32 %v4053_v34, %v4052_v47  ;;  %v2274_v47 = vpop.f32.mrf.mxu3 }
 0x2b4   : > { %v3297_v19 = vmul.f32 %v3296_v42, %v6650_v28  ;;  %v3383_v12 = vadd.f32 0.014752088, %v3382_v56  ;;  %v1775_v3 = vadd.f32 %v1717_v54, %v5720_v53  ;;  %v4156_v33 = vsel %vm4031_vm10, %v4114_v35, 0.0 }
 0x2b5   : > { %v6791_v46 = vpop.eup %4940  ;;  %v6794_v21 = vmul.f32 %v3258_v4, %v6583_v62  ;;  %v3273_v60 = vmul.f32 %v6745_v15, %v3272_v14  ;;  %v3335_v10 = vmul.f32 %v3334_v61, %v6711_v32  ;;  %v6798_v45 = vadd.f32 %v4156_v33, %v4155_v17 }
 0x2b6   : > { %v3372_v31 = vadd.f32 0.0036580483, %v3371_v63  ;;  %v3384_v28 = vmul.f32 %v3383_v12, %v6766_v48  ;;  %v6802_v53 = vmul.f32 0.70710677, %v6780_v49  ;;  %v2054_v54 = vadd.f32 %v1996_v57, %v1775_v3 }
 0x2b7   : > { %v6804_v2 = vmul.f32 %v3243_v50, %v3219_v43  ;;  %vm3275_vm0 = vweird.f32 %v6709_v18  ;;  %v3282_v62 = vor.u32 1.1754944e-38, %v3281_v36  ;;  %v6807_v4 = vadd.f32 1.0, %v3348_v6 }
 0x2b8   : > { %vm6809_vm2 = vcmp.eq.f32.partialorder %v3279_v40, 8.507059e+37  ;;  %v3298_v17 = vadd.f32 1.1283791, %v3297_v19  ;;  %v3311_v52 = vmul.f32 %v6791_v46, %v6761_v5  ;;  %v3407_v11 = vmul.f32 %v6802_v53, %v6802_v53 }
 0x2b9   : > { %v1776_v29 = vadd.f32 %v1720_v55, %v5731_v38  ;;  %v6819_v43 = vmul.f32 0.5, %v6724_v7  ;;  %v3385_v8 = vadd.f32 0.112945676, %v3384_v28  ;;  %v2332_v13 = vadd.f32 %v2274_v47, %v2054_v54 }
 0x2ba   : > { %v4875_v30 = vclamps-f32 %v6748_v23, 1.0  ;;  %v3274_v50 = vadd.f32 %v6745_v15, %v3273_v60  ;;  %vm3276_vm3 = vweird.f32 %v6745_v15  ;;  %v3336_v0 = vadd.f32 0.18741608, %v3335_v10 }
 0x2bb   : > { %v3373_v42 = vmul.f32 %v3372_v31, %v6766_v48  ;;  %4942 = vrcp.f32 %v6807_v4  ;;  %v3386_v1 = vmul.f32 %v3385_v8, %v6766_v48  ;;  %v6827_v38 = vmin.f32 %v3407_v11, 16.0  ;;  %vm6837_vm4 = vmor %vm3275_vm0, %vm3276_vm3  ;;  %v2277_v3 = vpop.f32.mrf.mxu3 }
 0x2bc   : > { %v3979_v7 = vadd.f32 1.0, %v4875_v30  ;;  %v6830_v26 = vmul.f32 %v3298_v17, %v6640_v58  ;;  %v3312_v23 = vsub.f32 1.0, %v3311_v52  ;;  %v3321_v14 = vand.u32 2147483648, %v6761_v5 }
 0x2bd   : > { %v6833_v61 = vadd.f32 %v2552_v24, %v2332_v13  ;;  %v3387_v57 = vadd.f32 0.4994258, %v3386_v1  ;;  %v3409_v63 = vmul.f32 2.1237322e-06, %v6827_v38  ;;  %v3420_v56 = vmul.f32 3.8918573e-05, %v6827_v38 }
 0x2be   : > { %v4011_v34 = vmul.f32 %v3979_v7, %v6517_v20  ;;  %v3278_v58 = vsel %vm6837_vm4, %v6745_v15, %v3274_v50  ;;  %vm3315_vm5 = vweird.f32 %v6761_v5  ;;  %v3337_v35 = vmul.f32 %v3336_v0, %v6711_v32 }
 0x2bf   : > { %v3374_v18 = vadd.f32 0.05243302, %v3373_v42  ;;  %v2055_v40 = vadd.f32 %v1999_v39, %v1776_v29  ;;  %v3388_v36 = vmul.f32 %v3387_v57, %v6766_v48  ;;  %v3410_v6 = vadd.f32 0.00028619796, %v3409_v63 }
 0x2c0   : > { %v3421_v19 = vadd.f32 0.001143296, %v3420_v56  ;;  %v4055_v12 = vsel %vm4031_vm10, %v4011_v34, 0.0  ;;  %4217 = vxpose.xlu0.b32.cont [13/16] (narrow) %v4011_v34, 8  ;;  %v3313_v20 = vmul.f32 %v6791_v46, %v3312_v23  ;;  %v3319_v33 = vand.u32 2147483647, %v6761_v5 }
 0x2c1   : > { %v4115_v60 = vmul.f32 %v4011_v34, %v4011_v34  ;;  %v4056_v15 = vadd.f32 %v4055_v12, %v4054_v16  ;;  %v6853_v10 = vpop.eup %4942  ;;  %v3283_v32 = vsel %vm6809_vm2, %v3282_v62, %v3278_v58  ;;  %v6857_v55 = vadd.f32 1.0, %v3388_v36  ;;  %v2555_v62 = vpop.f32.mrf.mxu0 }
 0x2c2   : > { %v3422_v47 = vmul.f32 %v3421_v19, %v6827_v38  ;;  %v6861_v31 = vmul.f32 0.70710677, %v6833_v61  ;;  %v3375_v28 = vmul.f32 %v3374_v18, %v6766_v48  ;;  %v3411_v54 = vmul.f32 %v3410_v6, %v6827_v38 }
 0x2c3   : > { %v4158_v17 = vsel %vm4031_vm10, %v4115_v60, 0.0  ;;  %v2333_v52 = vadd.f32 %v2277_v3, %v2055_v40  ;;  %vm3316_vm6 = vweird.f32 %v6791_v46  ;;  %v3322_v16 = vor.u32 1.1754944e-38, %v3321_v14 }
 0x2c4   : > { %v3338_v11 = vadd.f32 1.1283791, %v3337_v35  ;;  %4944 = vrcp.f32 %v6857_v55  ;;  %v3314_v59 = vadd.f32 %v6791_v46, %v3313_v20  ;;  %v3351_v29 = vmul.f32 %v6853_v10, %v6807_v4  ;;  %vm6892_vm7 = vmor %vm3315_vm5, %vm3316_vm6 }
 0x2c5   : > { %v3423_v8 = vadd.f32 0.014752088, %v3422_v47  ;;  %v4159_v13 = vadd.f32 %v4158_v17, %v6798_v45  ;;  %v6873_v30 = vmul.f32 %v3283_v32, %v6794_v21  ;;  %v6876_v24 = vmul.f32 0.5, %v6780_v49  ;;  %v1723_v45 = vpop.f32.mrf.mxu1 }
 0x2c6   : > { %v3447_v50 = vmul.f32 %v6861_v31, %v6861_v31  ;;  %v4876_v0 = vclamps-f32 %v6804_v2, 1.0  ;;  %vm6881_vm1 = vcmp.eq.f32.partialorder %v3319_v33, 8.507059e+37  ;;  %v3376_v1 = vadd.f32 0.18741608, %v3375_v28 }
 0x2c7   : > { %v3412_v7 = vadd.f32 0.0036580483, %v3411_v54  ;;  %v3424_v39 = vmul.f32 %v3423_v8, %v6827_v38  ;;  %v6886_v23 = vadd.f32 %v2555_v62, %v2333_v52  ;;  %v6897_v21 = vmul.f32 %v3338_v11, %v6681_v41  ;;  %v2002_v54 = vpop.f32.mrf.mxu2 }
 0x2c8   : > { %v3359_v2 = vand.u32 2147483647, %v6807_v4  ;;  %v6900_v14 = vmin.f32 %v3447_v50, 16.0  ;;  %v3980_v27 = vadd.f32 1.0, %v4876_v0  ;;  %v3318_v57 = vsel %vm6892_vm7, %v6791_v46, %v3314_v59 }
 0x2c9   : > { %v3352_v63 = vsub.f32 1.0, %v3351_v29  ;;  %v3361_v56 = vand.u32 2147483648, %v6807_v4  ;;  %v3425_v5 = vadd.f32 0.112945676, %v3424_v39  ;;  %v6912_v18 = vmul.f32 0.70710677, %v6886_v23 }
 0x2ca   : > { %v6906_v34 = vpop.eup %4944  ;;  %v3449_v58 = vmul.f32 2.1237322e-06, %v6900_v14  ;;  %v3460_v41 = vmul.f32 3.8918573e-05, %v6900_v14  ;;  %v4012_v35 = vmul.f32 %v3980_v27, %v6631_v51  ;;  %v3377_v40 = vmul.f32 %v3376_v1, %v6766_v48 }
 0x2cb   : > { %v3413_v36 = vmul.f32 %v3412_v7, %v6827_v38  ;;  %v3426_v46 = vmul.f32 %v3425_v5, %v6827_v38  ;;  %v1777_v6 = vadd.f32 %v1723_v45, %v5742_v25  ;;  %vm3355_vm8 = vweird.f32 %v6807_v4 }
 0x2cc   : > { %v3450_v19 = vadd.f32 0.00028619796, %v3449_v58  ;;  %v3461_v12 = vadd.f32 0.001143296, %v3460_v41  ;;  %v4057_v3 = vsel %vm4031_vm10, %v4012_v35, 0.0  ;;  %v4116_v20 = vmul.f32 %v4012_v35, %v4012_v35  ;;  %4218 = vxpose.xlu0.b32.cont [14/16] (narrow) %v4012_v35, 8 }
 0x2cd   : > { %v3353_v51 = vmul.f32 %v6853_v10, %v3352_v63  ;;  %v3391_v33 = vmul.f32 %v6906_v34, %v6857_v55  ;;  %v3427_v48 = vadd.f32 0.4994258, %v3426_v46  ;;  %v6923_v60 = vadd.f32 %v4057_v3, %v4056_v15  ;;  %v1726_v7 = vpop.f32.mrf.mxu1  ;;  %v2280_v63 = vpop.f32.mrf.mxu3 }
 0x2ce   : > { %v3451_v32 = vmul.f32 %v3450_v19, %v6900_v14  ;;  %v3462_v25 = vmul.f32 %v3461_v12, %v6900_v14  ;;  %v4160_v47 = vsel %vm4031_vm10, %v4116_v20, 0.0  ;;  %v3487_v28 = vmul.f32 %v6912_v18, %v6912_v18 }
 0x2cf   : > { %v3378_v17 = vadd.f32 1.1283791, %v3377_v40  ;;  %v3414_v52 = vadd.f32 0.05243302, %v3413_v36  ;;  %v3428_v11 = vmul.f32 %v3427_v48, %v6827_v38  ;;  %v6931_v62 = vadd.f32 %v4160_v47, %v4159_v13  ;;  %v7864_v48 = vld [vmem:[#allocation2_spill] sm:$0xff] }
 0x2d0   : > { %v3323_v15 = vsel %vm6881_vm1, %v3322_v16, %v3318_v57  ;;  %v3452_v59 = vadd.f32 0.0036580483, %v3451_v32  ;;  %v3463_v29 = vadd.f32 0.014752088, %v3462_v25  ;;  %v6935_v8 = vmin.f32 %v3487_v28, 16.0  ;;  %v2005_v25 = vpop.f32.mrf.mxu2 }
 0x2d1   : > { %v3354_v50 = vadd.f32 %v6853_v10, %v3353_v51  ;;  %vm3356_vm9 = vweird.f32 %v6853_v10  ;;  %v6939_v0 = vadd.f32 1.0, %v3428_v11  ;;  %v2056_v1 = vadd.f32 %v2002_v54, %v1777_v6  ;;  %v2558_v6 = vpop.f32.mrf.mxu0 }
 0x2d2   : > { %v3392_v39 = vsub.f32 1.0, %v3391_v33  ;;  %v3464_v45 = vmul.f32 %v3463_v29, %v6900_v14  ;;  %v3489_v13 = vmul.f32 2.1237322e-06, %v6935_v8  ;;  %v3500_v42 = vmul.f32 3.8918573e-05, %v6935_v8  ;;  %vm6964_vm12 = vmor %vm3355_vm8, %vm3356_vm9 }
 0x2d3   : > { %v6945_v16 = vmul.f32 %v3323_v15, %v6830_v26  ;;  %vm6947_vm11 = vcmp.eq.f32.partialorder %v3359_v2, 8.507059e+37  ;;  %v3362_v27 = vor.u32 1.1754944e-38, %v3361_v56  ;;  %v3415_v57 = vmul.f32 %v3414_v52, %v6827_v38 }
 0x2d4   : > { %v6953_v5 = vmul.f32 %v3378_v17, %v6731_v37  ;;  %v3399_v58 = vand.u32 2147483647, %v6857_v55  ;;  %v6957_v41 = vmul.f32 0.5, %v6833_v61  ;;  %v3453_v35 = vmul.f32 %v3452_v59, %v6900_v14  ;;  %v7861_v59 = vld [vmem:[#allocation16_spill] sm:$0xff] }
 0x2d5   : > { %4946 = vrcp.f32 %v6939_v0  ;;  %v3465_v2 = vadd.f32 0.112945676, %v3464_v45  ;;  %v3490_v37 = vadd.f32 0.00028619796, %v3489_v13  ;;  %v3501_v56 = vadd.f32 0.001143296, %v3500_v42 }
 0x2d6   : > { %v3358_v61 = vsel %vm6964_vm12, %v6853_v10, %v3354_v50  ;;  %v3393_v40 = vmul.f32 %v6906_v34, %v3392_v39  ;;  %v2334_v36 = vadd.f32 %v2280_v63, %v2056_v1  ;;  %v4877_v46 = vclamps-f32 %v6873_v30, 1.0  ;;  %v1729_v50 = vpop.f32.mrf.mxu1 }
 0x2d7   : > { %vm3395_vm13 = vweird.f32 %v6857_v55  ;;  %v3416_v4 = vadd.f32 0.18741608, %v3415_v57  ;;  %v3466_v19 = vmul.f32 %v3465_v2, %v6900_v14  ;;  %v3502_v12 = vmul.f32 %v3501_v56, %v6935_v8 }
 0x2d8   : > { %v3401_v3 = vand.u32 2147483648, %v6857_v55  ;;  %v3454_v20 = vadd.f32 0.05243302, %v3453_v35  ;;  %v3491_v51 = vmul.f32 %v3490_v37, %v6935_v8  ;;  %v3981_v33 = vadd.f32 1.0, %v4877_v46 }
 0x2d9   : > { %v3363_v10 = vsel %vm6947_vm11, %v3362_v27, %v3358_v61  ;;  %vm6981_vm14 = vcmp.eq.f32.partialorder %v3399_v58, 8.507059e+37  ;;  %v3467_v30 = vadd.f32 0.4994258, %v3466_v19  ;;  %v3503_v32 = vadd.f32 0.014752088, %v3502_v12  ;;  %v2283_v27 = vpop.f32.mrf.mxu3  ;;  %v2561_v61 = vpop.f32.mrf.mxu0 }
 0x2da   : > { %v3394_v47 = vadd.f32 %v6906_v34, %v3393_v40  ;;  %vm3396_vm15 = vweird.f32 %v6906_v34  ;;  %v4013_v28 = vmul.f32 %v3981_v33, %v6707_v9  ;;  %v6988_v54 = vadd.f32 %v2558_v6, %v2334_v36 }
 0x2db   : > { %v6990_v17 = vpop.eup %4946  ;;  %v3417_v52 = vmul.f32 %v3416_v4, %v6827_v38  ;;  %v3468_v11 = vmul.f32 %v3467_v30, %v6900_v14  ;;  %v3504_v15 = vmul.f32 %v3503_v32, %v6935_v8  ;;  %v1778_v29 = vadd.f32 %v1726_v7, %v7861_v59  ;;  %vm7000_vm0 = vmor %vm3395_vm13, %vm3396_vm15 }
 0x2dc   : > { %v3455_v1 = vmul.f32 %v3454_v20, %v6900_v14  ;;  %v3492_v39 = vadd.f32 0.0036580483, %v3491_v51  ;;  %v4059_v45 = vsel %vm4031_vm10, %v4013_v28, 0.0  ;;  %v4117_v13 = vmul.f32 %v4013_v28, %v4013_v28  ;;  %4219 = vxpose.xlu0.b32.cont [15/16] (narrow) %v4013_v28, 8  ;;  %v2008_v51 = vpop.f32.mrf.mxu2 }
 0x2dd   : > { %v7004_v38 = vadd.f32 1.0, %v3468_v11  ;;  %v3505_v42 = vadd.f32 0.112945676, %v3504_v15  ;;  %v7007_v49 = vadd.f32 %v4059_v45, %v6923_v60  ;;  %v2057_v7 = vadd.f32 %v2005_v25, %v1778_v29 }
 0x2de   : > { %v3398_v57 = vsel %vm7000_vm0, %v6906_v34, %v3394_v47  ;;  %v3431_v63 = vmul.f32 %v6990_v17, %v6939_v0  ;;  %v4162_v55 = vsel %vm4031_vm10, %v4117_v13, 0.0  ;;  %v7016_v58 = vmul.f32 0.70710677, %v6988_v54  ;;  %v1732_v28 = vpop.f32.mrf.mxu1  ;;  %v7865_v13 = vld [vmem:[#allocation5_spill] sm:$0xff] }
 0x2df   : > { %v7019_v35 = vmul.f32 %v3363_v10, %v6897_v21  ;;  %v3402_v26 = vor.u32 1.1754944e-38, %v3401_v3  ;;  %v3418_v60 = vadd.f32 1.1283791, %v3417_v52  ;;  %v7022_v2 = vmul.f32 0.5, %v6886_v23 }
 0x2e0   : > { %4948 = vrcp.f32 %v7004_v38  ;;  %v3493_v34 = vmul.f32 %v3492_v39, %v6935_v8  ;;  %v3506_v37 = vmul.f32 %v3505_v42, %v6935_v8  ;;  %v4163_v56 = vadd.f32 %v4162_v55, %v6931_v62 }
 0x2e1   : > { %v3403_v40 = vsel %vm6981_vm14, %v3402_v26, %v3398_v57  ;;  %v3456_v36 = vadd.f32 0.18741608, %v3455_v1  ;;  %v3527_v21 = vmul.f32 %v7016_v58, %v7016_v58  ;;  %v2335_v46 = vadd.f32 %v2283_v27, %v2057_v7 }
 0x2e2   : > { %v3432_v6 = vsub.f32 1.0, %v3431_v63  ;;  %v3441_v23 = vand.u32 2147483648, %v6939_v0  ;;  %v3507_v4 = vadd.f32 0.4994258, %v3506_v37  ;;  %v4878_v19 = vclamps-f32 %v6945_v16, 1.0 }
 0x2e3   : > { %v7035_v12 = vmul.f32 %v3418_v60, %v6802_v53  ;;  %v3439_v62 = vand.u32 2147483647, %v6939_v0  ;;  %v7038_v3 = vmin.f32 %v3527_v21, 16.0  ;;  %v7040_v20 = vadd.f32 %v2561_v61, %v2335_v46 }
 0x2e4   : > { %v3494_v33 = vadd.f32 0.05243302, %v3493_v34  ;;  %v3508_v10 = vmul.f32 %v3507_v4, %v6935_v8  ;;  %v1779_v30 = vadd.f32 %v1729_v50, %v7864_v48  ;;  %v3982_v32 = vadd.f32 1.0, %v4878_v19 }
 0x2e5   : > { %v7045_v25 = vmul.f32 %v3403_v40, %v6953_v5  ;;  %vm3435_vm2 = vweird.f32 %v6939_v0  ;;  %v3457_v53 = vmul.f32 %v3456_v36, %v6900_v14  ;;  %v3529_v16 = vmul.f32 2.1237322e-06, %v7038_v3  ;;  %v2286_v14 = vpop.f32.mrf.mxu3  ;;  %v2564_v36 = vpop.f32.mrf.mxu0 }
 0x2e6   : > { %v3540_v47 = vmul.f32 3.8918573e-05, %v7038_v3  ;;  %v7051_v52 = vpop.eup %4948  ;;  %v3433_v11 = vmul.f32 %v6990_v17, %v3432_v6  ;;  %v3442_v15 = vor.u32 1.1754944e-38, %v3441_v23  ;;  %v7054_v59 = vadd.f32 1.0, %v3508_v10 }
 0x2e7   : > { %v2058_v29 = vadd.f32 %v2008_v51, %v1779_v30  ;;  %v3530_v50 = vadd.f32 0.00028619796, %v3529_v16  ;;  %v4014_v1 = vmul.f32 %v3982_v32, %v6714_v44  ;;  %v7058_v39 = vmul.f32 0.70710677, %v7040_v20 }
 0x2e8   : > { %v3541_v5 = vadd.f32 0.001143296, %v3540_v47  ;;  %vm3436_vm3 = vweird.f32 %v6990_v17  ;;  %v3495_v45 = vmul.f32 %v3494_v33, %v6935_v8  ;;  %4950 = vrcp.f32 %v7054_v59 }
 0x2e9   : > { %v7064_v9 = vadd.f32 %v1732_v28, %v7865_v13  ;;  %v3458_v42 = vadd.f32 1.1283791, %v3457_v53  ;;  %v3471_v7 = vmul.f32 %v7051_v52, %v7004_v38  ;;  %v3531_v27 = vmul.f32 %v3530_v50, %v7038_v3  ;;  %4220 = vxpose.xlu0.b32.end [16/16] (narrow) %v4014_v1, 8  ;;  %vm7091_vm5 = vmor %vm3435_vm2, %vm3436_vm3 }
 0x2ea   : > { %v3542_v44 = vmul.f32 %v3541_v5, %v7038_v3  ;;  %vm7070_vm4 = vcmp.eq.f32.partialorder %v3439_v62, 8.507059e+37  ;;  %v4061_v63 = vsel %vm4031_vm10, %v4014_v1, 0.0  ;;  %v4118_v55 = vmul.f32 %v4014_v1, %v4014_v1 }
 0x2eb   : > { %v3567_v26 = vmul.f32 %v7058_v39, %v7058_v39  ;;  %v2336_v60 = vadd.f32 %v2286_v14, %v2058_v29  ;;  %v3434_v34 = vadd.f32 %v6990_v17, %v3433_v11  ;;  %v3481_v37 = vand.u32 2147483648, %v7004_v38 }
 0x2ec   : > { %v3532_v61 = vadd.f32 0.0036580483, %v3531_v27  ;;  %v3543_v40 = vadd.f32 0.014752088, %v3542_v44  ;;  %v3496_v21 = vadd.f32 0.18741608, %v3495_v45  ;;  %v4062_v6 = vadd.f32 %v4061_v63, %v7007_v49  ;;  %v2011_v63 = vpop.f32.mrf.mxu2 }
 0x2ed   : > { %v4164_v46 = vsel %vm4031_vm10, %v4118_v55, 0.0  ;;  %v7081_v23 = vmin.f32 %v3567_v26, 16.0  ;;  %v3472_v4 = vsub.f32 1.0, %v3471_v7  ;;  %v4879_v51 = vclamps-f32 %v7019_v35, 1.0 }
 0x2ee   : > { %v3544_v19 = vmul.f32 %v3543_v40, %v7038_v3  ;;  %v4165_v62 = vadd.f32 %v4164_v46, %v4163_v56  ;;  %v7085_v33 = vpop.eup %4950  ;;  %v7096_v49 = vmul.f32 0.5, %v6988_v54  ;;  %v7100_v56 = vadd.f32 %v2564_v36, %v2336_v60 }
 0x2ef   : > { %v3569_v48 = vmul.f32 2.1237322e-06, %v7081_v23  ;;  %v3580_v30 = vmul.f32 3.8918573e-05, %v7081_v23  ;;  %v3438_v35 = vsel %vm7091_vm5, %v6990_v17, %v3434_v34  ;;  %v7106_v32 = vmul.f32 %v3458_v42, %v6861_v31 }
 0x2f0   : > { %v3479_v0 = vand.u32 2147483647, %v7004_v38  ;;  %v3533_v53 = vmul.f32 %v3532_v61, %v7038_v3  ;;  %vm3475_vm6 = vweird.f32 %v7004_v38  ;;  %v3511_v54 = vmul.f32 %v7085_v33, %v7054_v59 }
 0x2f1   : > { %v3545_v16 = vadd.f32 0.112945676, %v3544_v19  ;;  %v3570_v47 = vadd.f32 0.00028619796, %v3569_v48  ;;  %v3581_v28 = vadd.f32 0.001143296, %v3580_v30  ;;  %v3473_v11 = vmul.f32 %v7051_v52, %v3472_v4  ;;  %v2289_v48 = vpop.f32.mrf.mxu3 }
 0x2f2   : > { %v3482_v29 = vor.u32 1.1754944e-38, %v3481_v37  ;;  %v3497_v17 = vmul.f32 %v3496_v21, %v6935_v8  ;;  %v3983_v50 = vadd.f32 1.0, %v4879_v51  ;;  %v7119_v14 = vmul.f32 0.70710677, %v7100_v56 }
 0x2f3   : > { %v3546_v31 = vmul.f32 %v3545_v16, %v7038_v3  ;;  %v3571_v5 = vmul.f32 %v3570_v47, %v7081_v23  ;;  %v3582_v1 = vmul.f32 %v3581_v28, %v7081_v23  ;;  %v3443_v45 = vsel %vm7070_vm4, %v3442_v15, %v3438_v35 }
 0x2f4   : > { %vm3476_vm1 = vweird.f32 %v7051_v52  ;;  %v3534_v13 = vadd.f32 0.05243302, %v3533_v53  ;;  %v4015_v42 = vmul.f32 %v3983_v50, %v6776_v22  ;;  %v3512_v7 = vsub.f32 1.0, %v3511_v54 }
 0x2f5   : > { %v3547_v8 = vadd.f32 0.4994258, %v3546_v31  ;;  %v3583_v27 = vadd.f32 0.014752088, %v3582_v1  ;;  %v3607_v44 = vmul.f32 %v7119_v14, %v7119_v14  ;;  %v3474_v55 = vadd.f32 %v7051_v52, %v3473_v11  ;;  %vm7152_vm8 = vmor %vm3475_vm6, %vm3476_vm1 }
 0x2f6   : > { %vm7128_vm7 = vcmp.eq.f32.partialorder %v3479_v0, 8.507059e+37  ;;  %v3498_v57 = vadd.f32 1.1283791, %v3497_v17  ;;  %4237 = vxpose.xlu1.b32.start [1/16] (narrow) %v4015_v42, 8  ;;  %v4063_v15 = vsel %vm4031_vm10, %v4015_v42, 0.0  ;;  %v4119_v60 = vmul.f32 %v4015_v42, %v4015_v42  ;;  %v2014_v42 = vpop.f32.mrf.mxu2 }
 0x2f7   : > { %v3548_v22 = vmul.f32 %v3547_v8, %v7038_v3  ;;  %v3572_v34 = vadd.f32 0.0036580483, %v3571_v5  ;;  %v3584_v37 = vmul.f32 %v3583_v27, %v7081_v23  ;;  %v7135_v61 = vadd.f32 %v4063_v15, %v4062_v6 }
 0x2f8   : > { %v7138_v40 = vmul.f32 %v3443_v45, %v7035_v12  ;;  %v3535_v36 = vmul.f32 %v3534_v13, %v7038_v3  ;;  %v4166_v21 = vsel %vm4031_vm10, %v4119_v60, 0.0  ;;  %v7142_v46 = vmin.f32 %v3607_v44, 16.0 }
 0x2f9   : > { %v3513_v4 = vmul.f32 %v7085_v33, %v3512_v7  ;;  %v7145_v19 = vadd.f32 1.0, %v3548_v22  ;;  %v3585_v51 = vadd.f32 0.112945676, %v3584_v37  ;;  %v2059_v10 = vadd.f32 %v2011_v63, %v7064_v9  ;;  %v7876_v63 = vld [vmem:[#allocation20_spill] sm:$0xff] }
 0x2fa   : > { %v3499_v6 = vmul.f32 %v3498_v57, %v6912_v18  ;;  %v7158_v30 = vmul.f32 0.5, %v7040_v20  ;;  %v7160_v35 = vadd.f32 %v4166_v21, %v4165_v62  ;;  %v3609_v0 = vmul.f32 2.1237322e-06, %v7142_v46  ;;  %v2567_v62 = vpop.f32.mrf.mxu0  ;;  %v2292_v21 = vpop.f32.mrf.mxu3 }
 0x2fb   : > { %v3478_v9 = vsel %vm7152_vm8, %v7051_v52, %v3474_v55  ;;  %vm3515_vm9 = vweird.f32 %v7054_v59  ;;  %4952 = vrcp.f32 %v7145_v19  ;;  %v3573_v38 = vmul.f32 %v3572_v34, %v7081_v23  ;;  %v1735_v52 = vpop.f32.mrf.mxu1 }
 0x2fc   : > { %v3536_v53 = vadd.f32 0.18741608, %v3535_v36  ;;  %v3586_v18 = vmul.f32 %v3585_v51, %v7081_v23  ;;  %v3610_v54 = vadd.f32 0.00028619796, %v3609_v0  ;;  %v3620_v20 = vmul.f32 3.8918573e-05, %v7142_v46 }
 0x2fd   : > { %v3514_v16 = vadd.f32 %v7085_v33, %v3513_v4  ;;  %vm3516_vm11 = vweird.f32 %v7085_v33  ;;  %v3519_v47 = vand.u32 2147483647, %v7054_v59  ;;  %v2337_v28 = vadd.f32 %v2289_v48, %v2059_v10 }
 0x2fe   : > { %v3521_v11 = vand.u32 2147483648, %v7054_v59  ;;  %v3587_v17 = vadd.f32 0.4994258, %v3586_v18  ;;  %v3611_v50 = vmul.f32 %v3610_v54, %v7142_v46  ;;  %v3621_v31 = vadd.f32 0.001143296, %v3620_v20  ;;  %vm7183_vm12 = vmor %vm3515_vm9, %vm3516_vm11 }
 0x2ff   : > { %v3483_v5 = vsel %vm7128_vm7, %v3482_v29, %v3478_v9  ;;  %v3574_v1 = vadd.f32 0.05243302, %v3573_v38  ;;  %v4880_v45 = vclamps-f32 %v7045_v25, 1.0  ;;  %v7179_v13 = vadd.f32 %v2567_v62, %v2337_v28 }
 0x300   : > { %v3537_v8 = vmul.f32 %v3536_v53, %v7038_v3  ;;  %v3588_v27 = vmul.f32 %v3587_v17, %v7081_v23  ;;  %v3622_v44 = vmul.f32 %v3621_v31, %v7142_v46  ;;  %v1781_v29 = vadd.f32 %v1735_v52, %v7876_v63 }
 0x301   : > { %v7191_v55 = vpop.eup %4952  ;;  %v3518_v25 = vsel %vm7183_vm12, %v7085_v33, %v3514_v16  ;;  %v3612_v26 = vadd.f32 0.0036580483, %v3611_v50  ;;  %v3984_v59 = vadd.f32 1.0, %v4880_v45  ;;  %v7197_v57 = vmul.f32 0.70710677, %v7179_v13 }
 0x302   : > { %vm3520_vm13 = vcmp.eq.f32.partialorder %v3519_v47, 8.507059e+37  ;;  %v3522_v15 = vor.u32 1.1754944e-38, %v3521_v11  ;;  %v7199_v3 = vadd.f32 1.0, %v3588_v27  ;;  %v2060_v60 = vadd.f32 %v2014_v42, %v1781_v29  ;;  %v2570_v62 = vpop.f32.mrf.mxu0  ;;  %v7877_v29 = vld [vmem:[#allocation3_spill] sm:$0xff] }
 0x303   : > { %v3575_v22 = vmul.f32 %v3574_v1, %v7081_v23  ;;  %v3623_v34 = vadd.f32 0.014752088, %v3622_v44  ;;  %v4016_v37 = vmul.f32 %v3984_v59, %v6819_v43  ;;  %v3647_v36 = vmul.f32 %v7197_v57, %v7197_v57  ;;  %v1738_v1 = vpop.f32.mrf.mxu1 }
 0x304   : > { %v7206_v33 = vmul.f32 %v3483_v5, %v7106_v32  ;;  %v3523_v4 = vsel %vm3520_vm13, %v3522_v15, %v3518_v25  ;;  %v3551_v51 = vmul.f32 %v7191_v55, %v7145_v19  ;;  %4954 = vrcp.f32 %v7199_v3 }
 0x305   : > { %v3538_v10 = vadd.f32 1.1283791, %v3537_v8  ;;  %v7212_v48 = vmul.f32 0.5, %v7100_v56  ;;  %v3613_v12 = vmul.f32 %v3612_v26, %v7142_v46  ;;  %v3624_v43 = vmul.f32 %v3623_v34, %v7142_v46  ;;  %4238 = vxpose.xlu1.b32.cont [2/16] (narrow) %v4016_v37, 8 }
 0x306   : > { %v4065_v0 = vsel %vm4031_vm10, %v4016_v37, 0.0  ;;  %v4120_v9 = vmul.f32 %v4016_v37, %v4016_v37  ;;  %v7217_v32 = vmin.f32 %v3647_v36, 16.0  ;;  %v2338_v38 = vadd.f32 %v2292_v21, %v2060_v60  ;;  %v2017_v36 = vpop.f32.mrf.mxu2 }
 0x307   : > { %v7219_v53 = vmul.f32 %v3523_v4, %v3499_v6  ;;  %v3561_v18 = vand.u32 2147483648, %v7145_v19  ;;  %v3576_v54 = vadd.f32 0.18741608, %v3575_v22  ;;  %v3625_v20 = vadd.f32 0.112945676, %v3624_v43 }
 0x308   : > { %v3552_v56 = vsub.f32 1.0, %v3551_v51  ;;  %v4168_v16 = vsel %vm4031_vm10, %v4120_v9, 0.0  ;;  %v4066_v47 = vadd.f32 %v4065_v0, %v7135_v61  ;;  %v3649_v52 = vmul.f32 2.1237322e-06, %v7217_v32 }
 0x309   : > { %v3614_v28 = vadd.f32 0.05243302, %v3613_v12  ;;  %v3626_v11 = vmul.f32 %v3625_v20, %v7142_v46  ;;  %v4169_v17 = vadd.f32 %v4168_v16, %v7160_v35  ;;  %v3660_v6 = vmul.f32 3.8918573e-05, %v7217_v32 }
 0x30a   : > { %v7228_v50 = vpop.eup %4954  ;;  %v7231_v31 = vmul.f32 %v3538_v10, %v7016_v58  ;;  %v3650_v5 = vadd.f32 0.00028619796, %v3649_v52  ;;  %v4881_v45 = vclamps-f32 %v7138_v40, 1.0  ;;  %v7234_v42 = vadd.f32 %v2570_v62, %v2338_v38  ;;  %v2295_v52 = vpop.f32.mrf.mxu3 }
 0x30b   : > { %vm3555_vm14 = vweird.f32 %v7145_v19  ;;  %v3559_v61 = vand.u32 2147483647, %v7145_v19  ;;  %v3577_v7 = vmul.f32 %v3576_v54, %v7081_v23  ;;  %v3591_v35 = vmul.f32 %v7228_v50, %v7199_v3 }
 0x30c   : > { %v3553_v8 = vmul.f32 %v7191_v55, %v3552_v56  ;;  %v3627_v27 = vadd.f32 0.4994258, %v3626_v11  ;;  %v3651_v58 = vmul.f32 %v3650_v5, %v7217_v32  ;;  %v3661_v44 = vadd.f32 0.001143296, %v3660_v6 }
 0x30d   : > { %v3562_v63 = vor.u32 1.1754944e-38, %v3561_v18  ;;  %v3615_v40 = vmul.f32 %v3614_v28, %v7142_v46  ;;  %v1782_v25 = vadd.f32 %v1738_v1, %v7877_v29  ;;  %v3985_v26 = vadd.f32 1.0, %v4881_v45  ;;  %v2573_v45 = vpop.f32.mrf.mxu0 }
 0x30e   : > { %v3592_v59 = vsub.f32 1.0, %v3591_v35  ;;  %v3628_v15 = vmul.f32 %v3627_v27, %v7142_v46  ;;  %v3662_v23 = vmul.f32 %v3661_v44, %v7217_v32  ;;  %v7248_v60 = vmul.f32 0.70710677, %v7234_v42  ;;  %v1741_v35 = vpop.f32.mrf.mxu1 }
 0x30f   : > { %vm3556_vm15 = vweird.f32 %v7191_v55  ;;  %v7252_v22 = vmul.f32 0.5, %v7179_v13  ;;  %v3652_v34 = vadd.f32 0.0036580483, %v3651_v58  ;;  %v4017_v37 = vmul.f32 %v3985_v26, %v6876_v24 }
 0x310   : > { %v3554_v21 = vadd.f32 %v7191_v55, %v3553_v8  ;;  %vm7256_vm0 = vcmp.eq.f32.partialorder %v3559_v61, 8.507059e+37  ;;  %v3578_v51 = vadd.f32 1.1283791, %v3577_v7  ;;  %v7260_v10 = vadd.f32 1.0, %v3628_v15  ;;  %vm7272_vm2 = vmor %vm3555_vm14, %vm3556_vm15  ;;  %v7886_v15 = vld [vmem:[#allocation8_spill] sm:$0xff] }
 0x311   : > { %v3663_v12 = vadd.f32 0.014752088, %v3662_v23  ;;  %v3599_v43 = vand.u32 2147483647, %v7199_v3  ;;  %v3616_v0 = vadd.f32 0.18741608, %v3615_v40  ;;  %v4121_v9 = vmul.f32 %v4017_v37, %v4017_v37 }
 0x312   : > { %v4067_v13 = vsel %vm4031_vm10, %v4017_v37, 0.0  ;;  %4239 = vxpose.xlu1.b32.cont [3/16] (narrow) %v4017_v37, 8  ;;  %v3593_v24 = vmul.f32 %v7228_v50, %v3592_v59  ;;  %4956 = vrcp.f32 %v7260_v10  ;;  %v3687_v38 = vmul.f32 %v7248_v60, %v7248_v60 }
 0x313   : > { %v2061_v18 = vadd.f32 %v2017_v36, %v1782_v25  ;;  %v3601_v20 = vand.u32 2147483648, %v7199_v3  ;;  %v3653_v62 = vmul.f32 %v3652_v34, %v7217_v32  ;;  %v3664_v56 = vmul.f32 %v3663_v12, %v7217_v32  ;;  %v2020_v34 = vpop.f32.mrf.mxu2 }
 0x314   : > { %v4170_v16 = vsel %vm4031_vm10, %v4121_v9, 0.0  ;;  %v3558_v28 = vsel %vm7272_vm2, %v7191_v55, %v3554_v21  ;;  %v7284_v11 = vmul.f32 %v3578_v51, %v7058_v39  ;;  %vm3595_vm3 = vweird.f32 %v7199_v3 }
 0x315   : > { %v4068_v19 = vadd.f32 %v4067_v13, %v4066_v47  ;;  %vm3596_vm4 = vweird.f32 %v7228_v50  ;;  %v3617_v6 = vmul.f32 %v3616_v0, %v7142_v46  ;;  %v3665_v5 = vadd.f32 0.112945676, %v3664_v56  ;;  %v2298_v56 = vpop.f32.mrf.mxu3  ;;  %v2576_v39 = vpop.f32.mrf.mxu0 }
 0x316   : > { %v4171_v1 = vadd.f32 %v4170_v16, %v4169_v17  ;;  %v3594_v61 = vadd.f32 %v7228_v50, %v3593_v24  ;;  %v7290_v7 = vmin.f32 %v3687_v38, 16.0  ;;  %v2339_v8 = vadd.f32 %v2295_v52, %v2061_v18  ;;  %vm7310_vm6 = vmor %vm3595_vm3, %vm3596_vm4 }
 0x317   : > { %v4882_v55 = vclamps-f32 %v7206_v33, 1.0  ;;  %vm7293_vm5 = vcmp.eq.f32.partialorder %v3599_v43, 8.507059e+37  ;;  %v3602_v47 = vor.u32 1.1754944e-38, %v3601_v20  ;;  %v3654_v27 = vadd.f32 0.05243302, %v3653_v62 }
 0x318   : > { %v3666_v58 = vmul.f32 %v3665_v5, %v7217_v32  ;;  %v7298_v46 = vpop.eup %4956  ;;  %v3689_v17 = vmul.f32 2.1237322e-06, %v7290_v7  ;;  %v3700_v44 = vmul.f32 3.8918573e-05, %v7290_v7  ;;  %v7302_v29 = vadd.f32 %v2573_v45, %v2339_v8 }
 0x319   : > { %v3986_v40 = vadd.f32 1.0, %v4882_v55  ;;  %v3563_v33 = vsel %vm7256_vm0, %v3562_v63, %v3558_v28  ;;  %v3618_v26 = vadd.f32 1.1283791, %v3617_v6  ;;  %v1783_v23 = vadd.f32 %v1741_v35, %v7886_v15  ;;  %v1744_v55 = vpop.f32.mrf.mxu1 }
 0x31a   : > { %v3667_v59 = vadd.f32 0.4994258, %v3666_v58  ;;  %v3598_v37 = vsel %vm7310_vm6, %v7228_v50, %v3594_v61  ;;  %v3690_v36 = vadd.f32 0.00028619796, %v3689_v17  ;;  %v3701_v21 = vadd.f32 0.001143296, %v3700_v44 }
 0x31b   : > { %v4018_v63 = vmul.f32 %v3986_v40, %v6957_v41  ;;  %v3631_v3 = vmul.f32 %v7298_v46, %v7260_v10  ;;  %v3655_v4 = vmul.f32 %v3654_v27, %v7217_v32  ;;  %v7324_v12 = vmul.f32 0.70710677, %v7302_v29  ;;  %v2023_v44 = vpop.f32.mrf.mxu2 }
 0x31c   : > { %v3668_v51 = vmul.f32 %v3667_v59, %v7217_v32  ;;  %v3691_v43 = vmul.f32 %v3690_v36, %v7290_v7  ;;  %v3702_v0 = vmul.f32 %v3701_v21, %v7290_v7  ;;  %v3641_v41 = vand.u32 2147483648, %v7260_v10 }
 0x31d   : > { %v4069_v50 = vsel %vm4031_vm10, %v4018_v63, 0.0  ;;  %v4122_v13 = vmul.f32 %v4018_v63, %v4018_v63  ;;  %4240 = vxpose.xlu1.b32.cont [4/16] (narrow) %v4018_v63, 8  ;;  %v2062_v38 = vadd.f32 %v2020_v34, %v1783_v23  ;;  %v3727_v62 = vmul.f32 %v7324_v12, %v7324_v12 }
 0x31e   : > { %v7330_v9 = vadd.f32 1.0, %v3668_v51  ;;  %v4070_v24 = vadd.f32 %v4069_v50, %v4068_v19  ;;  %v3692_v18 = vadd.f32 0.0036580483, %v3691_v43  ;;  %v3703_v54 = vadd.f32 0.014752088, %v3702_v0 }
 0x31f   : > { %v4172_v20 = vsel %vm4031_vm10, %v4122_v13, 0.0  ;;  %v7336_v16 = vmul.f32 %v3563_v33, %v7231_v31  ;;  %v3603_v52 = vsel %vm7293_vm5, %v3602_v47, %v3598_v37  ;;  %v4883_v28 = vclamps-f32 %v7219_v53, 1.0 }
 0x320   : > { %4958 = vrcp.f32 %v7330_v9  ;;  %v3632_v19 = vsub.f32 1.0, %v3631_v3  ;;  %v3656_v6 = vadd.f32 0.18741608, %v3655_v4  ;;  %v3704_v5 = vmul.f32 %v3703_v54, %v7290_v7 }
 0x321   : > { %v4173_v45 = vadd.f32 %v4172_v20, %v4171_v1  ;;  %v7344_v61 = vmul.f32 %v3618_v26, %v7119_v14  ;;  %v7347_v35 = vmul.f32 0.5, %v7234_v42  ;;  %v3693_v31 = vmul.f32 %v3692_v18, %v7290_v7  ;;  %v7887_v26 = vld [vmem:[#allocation24_spill] sm:$0xff] }
 0x322   : > { %v7350_v8 = vmin.f32 %v3727_v62, 16.0  ;;  %vm3635_vm1 = vweird.f32 %v7260_v10  ;;  %v3639_v53 = vand.u32 2147483647, %v7260_v10  ;;  %v3642_v47 = vor.u32 1.1754944e-38, %v3641_v41  ;;  %v2301_v41 = vpop.f32.mrf.mxu3 }
 0x323   : > { %v3705_v27 = vadd.f32 0.112945676, %v3704_v5  ;;  %v2340_v58 = vadd.f32 %v2298_v56, %v2062_v38  ;;  %v7355_v1 = vmul.f32 %v3603_v52, %v7284_v11  ;;  %v3987_v17 = vadd.f32 1.0, %v4883_v28 }
 0x324   : > { %v3729_v14 = vmul.f32 2.1237322e-06, %v7350_v8  ;;  %v3740_v42 = vmul.f32 3.8918573e-05, %v7350_v8  ;;  %v3633_v40 = vmul.f32 %v7298_v46, %v3632_v19  ;;  %v3657_v33 = vmul.f32 %v3656_v6, %v7217_v32 }
 0x325   : > { %v3706_v25 = vmul.f32 %v3705_v27, %v7290_v7  ;;  %v1784_v59 = vadd.f32 %v1744_v55, %v7887_v26  ;;  %v3694_v23 = vadd.f32 0.05243302, %v3693_v31  ;;  %v4019_v37 = vmul.f32 %v3987_v17, %v7022_v2  ;;  %v2579_v55 = vpop.f32.mrf.mxu0 }
 0x326   : > { %v7363_v15 = vpop.eup %4958  ;;  %v3730_v34 = vadd.f32 0.00028619796, %v3729_v14  ;;  %v3741_v11 = vadd.f32 0.001143296, %v3740_v42  ;;  %vm7366_vm7 = vcmp.eq.f32.partialorder %v3639_v53, 8.507059e+37  ;;  %v7372_v32 = vadd.f32 %v2576_v39, %v2340_v58 }
 0x327   : > { %v3671_v21 = vmul.f32 %v7363_v15, %v7330_v9  ;;  %v3707_v63 = vadd.f32 0.4994258, %v3706_v25  ;;  %v2063_v3 = vadd.f32 %v2023_v44, %v1784_v59  ;;  %v4071_v43 = vsel %vm4031_vm10, %v4019_v37, 0.0  ;;  %4241 = vxpose.xlu1.b32.cont [5/16] (narrow) %v4019_v37, 8 }
 0x328   : > { %v3731_v4 = vmul.f32 %v3730_v34, %v7350_v8  ;;  %v3742_v51 = vmul.f32 %v3741_v11, %v7350_v8  ;;  %v4123_v0 = vmul.f32 %v4019_v37, %v4019_v37  ;;  %v3634_v2 = vadd.f32 %v7298_v46, %v3633_v40 }
 0x329   : > { %vm3636_vm8 = vweird.f32 %v7298_v46  ;;  %v3708_v50 = vmul.f32 %v3707_v63, %v7290_v7  ;;  %v4072_v13 = vadd.f32 %v4071_v43, %v4070_v24  ;;  %v3672_v38 = vsub.f32 1.0, %v3671_v21 }
 0x32a   : > { %v3732_v18 = vadd.f32 0.0036580483, %v3731_v4  ;;  %v3743_v54 = vadd.f32 0.014752088, %v3742_v51  ;;  %v4174_v20 = vsel %vm4031_vm10, %v4123_v0, 0.0  ;;  %v3695_v56 = vmul.f32 %v3694_v23, %v7290_v7  ;;  %vm7388_vm9 = vmor %vm3635_vm1, %vm3636_vm8 }
 0x32b   : > { %v3658_v62 = vadd.f32 1.1283791, %v3657_v33  ;;  %v7382_v52 = vadd.f32 1.0, %v3708_v50  ;;  %v7384_v28 = vadd.f32 %v4174_v20, %v4173_v45  ;;  %v7395_v5 = vmul.f32 0.70710677, %v7372_v32 }
 0x32c   : > { %v3733_v24 = vmul.f32 %v3732_v18, %v7350_v8  ;;  %v3744_v6 = vmul.f32 %v3743_v54, %v7350_v8  ;;  %v2341_v31 = vadd.f32 %v2301_v41, %v2063_v3  ;;  %v3638_v45 = vsel %vm7388_vm9, %v7298_v46, %v3634_v2  ;;  %v1747_v46 = vpop.f32.mrf.mxu1 }
 0x32d   : > { %v3679_v39 = vand.u32 2147483647, %v7330_v9  ;;  %v3681_v10 = vand.u32 2147483648, %v7330_v9  ;;  %4960 = vrcp.f32 %v7382_v52  ;;  %v3673_v53 = vmul.f32 %v7363_v15, %v3672_v38 }
 0x32e   : > { %v7405_v27 = vmul.f32 0.5, %v7302_v29  ;;  %v3734_v58 = vadd.f32 0.05243302, %v3733_v24  ;;  %v3767_v14 = vmul.f32 %v7395_v5, %v7395_v5  ;;  %v7410_v42 = vmul.f32 %v3658_v62, %v7197_v57 }
 0x32f   : > { %v3745_v17 = vadd.f32 0.112945676, %v3744_v6  ;;  %v4884_v44 = vclamps-f32 %v7336_v16, 1.0  ;;  %v7413_v40 = vadd.f32 %v2579_v55, %v2341_v31  ;;  %v3643_v33 = vsel %vm7366_vm7, %v3642_v47, %v3638_v45  ;;  %v7894_v47 = vld [vmem:[#allocation6_spill] sm:$0xff] }
 0x330   : > { %vm3675_vm11 = vweird.f32 %v7330_v9  ;;  %v3696_v29 = vadd.f32 0.18741608, %v3695_v56  ;;  %v3735_v25 = vmul.f32 %v3734_v58, %v7350_v8  ;;  %vm7419_vm12 = vcmp.eq.f32.partialorder %v3679_v39, 8.507059e+37 }
 0x331   : > { %v3682_v57 = vor.u32 1.1754944e-38, %v3681_v10  ;;  %v3746_v59 = vmul.f32 %v3745_v17, %v7350_v8  ;;  %v7424_v23 = vmin.f32 %v3767_v14, 16.0  ;;  %v3988_v16 = vadd.f32 1.0, %v4884_v44 }
 0x332   : > { %v3674_v34 = vadd.f32 %v7363_v15, %v3673_v53  ;;  %vm3676_vm13 = vweird.f32 %v7363_v15  ;;  %v1785_v11 = vadd.f32 %v1747_v46, %v7894_v47  ;;  %v7430_v37 = vmul.f32 0.70710677, %v7413_v40 }
 0x333   : > { %v7432_v36 = vpop.eup %4960  ;;  %v3747_v21 = vadd.f32 0.4994258, %v3746_v59  ;;  %v3769_v63 = vmul.f32 2.1237322e-06, %v7424_v23  ;;  %v3780_v3 = vmul.f32 3.8918573e-05, %v7424_v23  ;;  %v4020_v4 = vmul.f32 %v3988_v16, %v7096_v49  ;;  %vm7444_vm14 = vmor %vm3675_vm11, %vm3676_vm13 }
 0x334   : > { %v3697_v51 = vmul.f32 %v3696_v29, %v7290_v7  ;;  %v3711_v43 = vmul.f32 %v7432_v36, %v7382_v52  ;;  %v3736_v0 = vadd.f32 0.18741608, %v3735_v25  ;;  %v3807_v2 = vmul.f32 %v7430_v37, %v7430_v37  ;;  %v2026_v7 = vpop.f32.mrf.mxu2 }
 0x335   : > { %v3748_v41 = vmul.f32 %v3747_v21, %v7350_v8  ;;  %v3770_v38 = vadd.f32 0.00028619796, %v3769_v63  ;;  %v3781_v18 = vadd.f32 0.001143296, %v3780_v3  ;;  %v4073_v49 = vsel %vm4031_vm10, %v4020_v4, 0.0  ;;  %4242 = vxpose.xlu1.b32.cont [6/16] (narrow) %v4020_v4, 8 }
 0x336   : > { %v3678_v54 = vsel %vm7444_vm14, %v7363_v15, %v3674_v34  ;;  %v3721_v20 = vand.u32 2147483648, %v7382_v52  ;;  %v4124_v62 = vmul.f32 %v4020_v4, %v4020_v4  ;;  %v7454_v9 = vadd.f32 %v4073_v49, %v4072_v13  ;;  %v7897_v63 = vld [vmem:[#allocation11_spill] sm:$0xff]  ;;  %v2582_v4 = vpop.f32.mrf.mxu0 }
 0x337   : > { %v7456_v56 = vadd.f32 1.0, %v3748_v41  ;;  %v3771_v19 = vmul.f32 %v3770_v38, %v7424_v23  ;;  %v3782_v24 = vmul.f32 %v3781_v18, %v7424_v23  ;;  %v7460_v6 = vmin.f32 %v3807_v2, 16.0 }
 0x338   : > { %v7463_v31 = vmul.f32 %v3643_v33, %v7344_v61  ;;  %v3712_v55 = vsub.f32 1.0, %v3711_v43  ;;  %v3737_v45 = vmul.f32 %v3736_v0, %v7350_v8  ;;  %v4176_v15 = vsel %vm4031_vm10, %v4124_v62, 0.0  ;;  %v2304_v8 = vpop.f32.mrf.mxu3  ;;  %v1750_v33 = vpop.f32.mrf.mxu1 }
 0x339   : > { %v7467_v39 = vadd.f32 1.1283791, %v3697_v51  ;;  %v3719_v13 = vand.u32 2147483647, %v7382_v52  ;;  %4962 = vrcp.f32 %v7456_v56  ;;  %v2064_v10 = vadd.f32 %v2026_v7, %v1785_v11 }
 0x33a   : > { %v7473_v53 = vsel %vm7419_vm12, %v3682_v57, %v3678_v54  ;;  %vm3715_vm15 = vweird.f32 %v7382_v52  ;;  %v3772_v61 = vadd.f32 0.0036580483, %v3771_v19  ;;  %v3783_v58 = vadd.f32 0.014752088, %v3782_v24 }
 0x33b   : > { %v4177_v14 = vadd.f32 %v4176_v15, %v7384_v28  ;;  %vm3716_vm0 = vweird.f32 %v7432_v36  ;;  %v7478_v17 = vor.u32 1.1754944e-38, %v3721_v20  ;;  %v3809_v46 = vmul.f32 2.1237322e-06, %v7460_v6 }
 0x33c   : > { %v3820_v44 = vmul.f32 3.8918573e-05, %v7460_v6  ;;  %v3713_v29 = vmul.f32 %v7432_v36, %v3712_v55  ;;  %v7483_v25 = vadd.f32 1.1283791, %v3737_v45  ;;  %v3773_v26 = vmul.f32 %v3772_v61, %v7424_v23  ;;  %v2029_v41 = vpop.f32.mrf.mxu2  ;;  %vm7507_vm2 = vmor %vm3715_vm15, %vm3716_vm0 }
 0x33d   : > { %v3784_v57 = vmul.f32 %v3783_v58, %v7424_v23  ;;  %v3810_v59 = vadd.f32 0.00028619796, %v3809_v46  ;;  %v2342_v16 = vadd.f32 %v2304_v8, %v2064_v10  ;;  %v4885_v34 = vclamps-f32 %v7355_v1, 1.0 }
 0x33e   : > { %v3821_v28 = vadd.f32 0.001143296, %v3820_v44  ;;  %v3759_v47 = vand.u32 2147483647, %v7456_v56  ;;  %v3774_v11 = vadd.f32 0.05243302, %v3773_v26  ;;  %v1786_v3 = vadd.f32 %v1750_v33, %v7897_v63 }
 0x33f   : > { %v3785_v21 = vadd.f32 0.112945676, %v3784_v57  ;;  %v7490_v51 = vpop.eup %4962  ;;  %v3761_v43 = vand.u32 2147483648, %v7456_v56  ;;  %v3811_v0 = vmul.f32 %v3810_v59, %v7460_v6  ;;  %v3989_v50 = vadd.f32 1.0, %v4885_v34 }
 0x340   : > { %v3822_v2 = vmul.f32 %v3821_v28, %v7460_v6  ;;  %v3714_v38 = vadd.f32 %v7432_v36, %v3713_v29  ;;  %v3751_v1 = vmul.f32 %v7490_v51, %v7456_v56  ;;  %v3775_v18 = vmul.f32 %v3774_v11, %v7424_v23  ;;  %v2307_v29 = vpop.f32.mrf.mxu3 }
 0x341   : > { %v3786_v49 = vmul.f32 %v3785_v21, %v7424_v23  ;;  %v3812_v7 = vadd.f32 0.0036580483, %v3811_v0  ;;  %v4021_v20 = vmul.f32 %v3989_v50, %v7158_v30  ;;  %v7501_v62 = vadd.f32 %v2582_v4, %v2342_v16 }
 0x342   : > { %v3823_v54 = vadd.f32 0.014752088, %v3822_v2  ;;  %v3752_v19 = vsub.f32 1.0, %v3751_v1  ;;  %v3776_v24 = vadd.f32 0.18741608, %v3775_v18  ;;  %v2065_v45 = vadd.f32 %v2029_v41, %v1786_v3  ;;  %v2585_v3 = vpop.f32.mrf.mxu0 }
 0x343   : > { %v3787_v55 = vadd.f32 0.4994258, %v3786_v49  ;;  %v3813_v10 = vmul.f32 %v3812_v7, %v7460_v6  ;;  %v4075_v30 = vsel %vm4031_vm10, %v4021_v20, 0.0  ;;  %v4125_v58 = vmul.f32 %v4021_v20, %v4021_v20  ;;  %4243 = vxpose.xlu1.b32.cont [7/16] (narrow) %v4021_v20, 8  ;;  %v7902_v7 = vld [vmem:[#allocation27_spill] sm:$0xff] }
 0x344   : > { %v3824_v61 = vmul.f32 %v3823_v54, %v7460_v6  ;;  %v3718_v8 = vsel %vm7507_vm2, %v7432_v36, %v3714_v38  ;;  %v3753_v46 = vmul.f32 %v7490_v51, %v3752_v19  ;;  %v7520_v33 = vadd.f32 %v4075_v30, %v7454_v9  ;;  %v2032_v20 = vpop.f32.mrf.mxu2 }
 0x345   : > { %v3788_v44 = vmul.f32 %v3787_v55, %v7424_v23  ;;  %v3777_v26 = vmul.f32 %v3776_v24, %v7424_v23  ;;  %v3814_v57 = vadd.f32 0.05243302, %v3813_v10  ;;  %v4178_v28 = vsel %vm4031_vm10, %v4125_v58, 0.0 }
 0x346   : > { %v3825_v59 = vadd.f32 0.112945676, %v3824_v61  ;;  %v3754_v16 = vadd.f32 %v7490_v51, %v3753_v46  ;;  %vm3756_vm3 = vweird.f32 %v7490_v51  ;;  %v4179_v36 = vadd.f32 %v4178_v28, %v4177_v14 }
 0x347   : > { %v7526_v34 = vadd.f32 1.0, %v3788_v44  ;;  %v7530_v21 = vmul.f32 0.70710677, %v7501_v62  ;;  %v2343_v9 = vadd.f32 %v2307_v29, %v2065_v45  ;;  %v4886_v63 = vclamps-f32 %v7463_v31, 1.0 }
 0x348   : > { %v3826_v11 = vmul.f32 %v3825_v59, %v7460_v6  ;;  %v3699_v23 = vmul.f32 %v7467_v39, %v7248_v60  ;;  %vm3720_vm4 = vcmp.eq.f32.partialorder %v3719_v13, 8.507059e+37  ;;  %vm3755_vm5 = vweird.f32 %v7456_v56  ;;  %v1753_v13 = vpop.f32.mrf.mxu1  ;;  %v2310_v46 = vpop.f32.mrf.mxu3 }
 0x349   : > { %4964 = vrcp.f32 %v7526_v34  ;;  %v3684_v14 = vmul.f32 %v7473_v53, %v7410_v42  ;;  %v3723_v4 = vsel %vm3720_vm4, %v7478_v17, %v3718_v8  ;;  %vm7542_vm6 = vmor %vm3755_vm5, %vm3756_vm3  ;;  %v3778_v31 = vadd.f32 1.1283791, %v3777_v26 }
 0x34a   : > { %v3815_v60 = vmul.f32 %v3814_v57, %v7460_v6  ;;  %v3758_v52 = vsel %vm7542_vm6, %v7490_v51, %v3754_v16  ;;  %v3827_v56 = vadd.f32 0.4994258, %v3826_v11  ;;  %v3847_v39 = vmul.f32 %v7530_v21, %v7530_v21 }
 0x34b   : > { %v3990_v2 = vadd.f32 1.0, %v4886_v63  ;;  %v3739_v42 = vmul.f32 %v7483_v25, %v7324_v12  ;;  %vm3760_vm1 = vcmp.eq.f32.partialorder %v3759_v47, 8.507059e+37  ;;  %v3762_v53 = vor.u32 1.1754944e-38, %v3761_v43 }
 0x34c   : > { %v7554_v17 = vadd.f32 %v2585_v3, %v2343_v9  ;;  %v3724_v50 = vmul.f32 %v3723_v4, %v3699_v23  ;;  %v3828_v41 = vmul.f32 %v3827_v56, %v7460_v6  ;;  %v7557_v38 = vmin.f32 %v3847_v39, 16.0  ;;  %v2588_v3 = vpop.f32.mrf.mxu0 }
 0x34d   : > { %v4022_v51 = vmul.f32 %v3990_v2, %v7212_v48  ;;  %v3763_v1 = vsel %vm3760_vm1, %v3762_v53, %v3758_v52  ;;  %v7561_v18 = vmul.f32 %v3778_v31, %v7395_v5  ;;  %v3816_v49 = vadd.f32 0.18741608, %v3815_v60 }
 0x34e   : > { %v1787_v54 = vadd.f32 %v1753_v13, %v7902_v7  ;;  %v3801_v25 = vand.u32 2147483648, %v7526_v34  ;;  %v7567_v47 = vadd.f32 1.0, %v3828_v41  ;;  %v3849_v43 = vmul.f32 2.1237322e-06, %v7557_v38 }
 0x34f   : > { %v7564_v12 = vpop.eup %4964  ;;  %v3860_v19 = vmul.f32 3.8918573e-05, %v7557_v38  ;;  %v4077_v5 = vsel %vm4031_vm10, %v4022_v51, 0.0  ;;  %v4126_v24 = vmul.f32 %v4022_v51, %v4022_v51  ;;  %4244 = vxpose.xlu1.b32.cont [8/16] (narrow) %v4022_v51, 8  ;;  %v7575_v55 = vmul.f32 0.70710677, %v7554_v17 }
 0x350   : > { %v3791_v48 = vmul.f32 %v7564_v12, %v7526_v34  ;;  %v3764_v45 = vmul.f32 %v3763_v1, %v3739_v42  ;;  %4966 = vrcp.f32 %v7567_v47  ;;  %v2066_v15 = vadd.f32 %v2032_v20, %v1787_v54 }
 0x351   : > { %v4887_v10 = vclamps-f32 %v3684_v14, 1.0  ;;  %vm3795_vm7 = vweird.f32 %v7526_v34  ;;  %v3850_v30 = vadd.f32 0.00028619796, %v3849_v43  ;;  %v3861_v58 = vadd.f32 0.001143296, %v3860_v19 }
 0x352   : > { %v3792_v61 = vsub.f32 1.0, %v3791_v48  ;;  %v4180_v8 = vsel %vm4031_vm10, %v4126_v24, 0.0  ;;  %v3799_v44 = vand.u32 2147483647, %v7526_v34  ;;  %v3817_v29 = vmul.f32 %v3816_v49, %v7460_v6 }
 0x353   : > { %v4078_v26 = vadd.f32 %v4077_v5, %v7520_v33  ;;  %v4181_v57 = vadd.f32 %v4180_v8, %v4179_v36  ;;  %v3851_v28 = vmul.f32 %v3850_v30, %v7557_v38  ;;  %v3862_v16 = vmul.f32 %v3861_v58, %v7557_v38 }
 0x354   : > { %v3793_v59 = vmul.f32 %v7564_v12, %v3792_v61  ;;  %v3887_v11 = vmul.f32 %v7575_v55, %v7575_v55  ;;  %v3802_v9 = vor.u32 1.1754944e-38, %v3801_v25  ;;  %v2344_v63 = vadd.f32 %v2310_v46, %v2066_v15 }
 0x355   : > { %v3991_v23 = vadd.f32 1.0, %v4887_v10  ;;  %v4888_v14 = vclamps-f32 %v3724_v50, 1.0  ;;  %v3852_v4 = vadd.f32 0.0036580483, %v3851_v28  ;;  %v3863_v0 = vadd.f32 0.014752088, %v3862_v16 }
 0x356   : > { %v7588_v6 = vmin.f32 %v3887_v11, 16.0  ;;  %v4889_v33 = vclamps-f32 %v3764_v45, 1.0  ;;  %v7590_v36 = vpop.eup %4966  ;;  %vm3796_vm8 = vweird.f32 %v7564_v12  ;;  %v7593_v31 = vadd.f32 1.1283791, %v3817_v29 }
 0x357   : > { %v3841_v60 = vand.u32 2147483648, %v7567_v47  ;;  %v4023_v52 = vmul.f32 %v3991_v23, %v7252_v22  ;;  %v3794_v56 = vadd.f32 %v7564_v12, %v3793_v59  ;;  %vm7598_vm9 = vcmp.eq.f32.partialorder %v3799_v44, 8.507059e+37  ;;  %vm7615_vm11 = vmor %vm3795_vm7, %vm3796_vm8 }
 0x358   : > { %v3831_v13 = vmul.f32 %v7590_v36, %v7567_v47  ;;  %v3853_v2 = vmul.f32 %v3852_v4, %v7557_v38  ;;  %v7605_v42 = vadd.f32 %v2588_v3, %v2344_v63  ;;  %v3864_v53 = vmul.f32 %v3863_v0, %v7557_v38 }
 0x359   : > { %v3889_v50 = vmul.f32 2.1237322e-06, %v7588_v6  ;;  %v3900_v41 = vmul.f32 3.8918573e-05, %v7588_v6  ;;  %4245 = vxpose.xlu1.b32.cont [9/16] (narrow) %v4023_v52, 8  ;;  %v3992_v22 = vadd.f32 1.0, %v4888_v14  ;;  %v4127_v19 = vmul.f32 %v4023_v52, %v4023_v52 }
 0x35a   : > { %v3832_v51 = vsub.f32 1.0, %v3831_v13  ;;  %v3854_v1 = vadd.f32 0.05243302, %v3853_v2  ;;  %v4079_v49 = vsel %vm4031_vm10, %v4023_v52, 0.0  ;;  %v3993_v7 = vadd.f32 1.0, %v4889_v33 }
 0x35b   : > { %v3865_v20 = vadd.f32 0.112945676, %v3864_v53  ;;  %v3890_v25 = vadd.f32 0.00028619796, %v3889_v50  ;;  %v3901_v43 = vadd.f32 0.001143296, %v3900_v41  ;;  %v3798_v48 = vsel %vm7615_vm11, %v7564_v12, %v3794_v56 }
 0x35c   : > { %v3833_v5 = vmul.f32 %v7590_v36, %v3832_v51  ;;  %v3855_v24 = vmul.f32 %v3854_v1, %v7557_v38  ;;  %v4080_v45 = vadd.f32 %v4079_v49, %v4078_v26  ;;  %v4182_v61 = vsel %vm4031_vm10, %v4127_v19, 0.0 }
 0x35d   : > { %v3866_v15 = vmul.f32 %v3865_v20, %v7557_v38  ;;  %v3891_v34 = vmul.f32 %v3890_v25, %v7588_v6  ;;  %v3902_v10 = vmul.f32 %v3901_v43, %v7588_v6  ;;  %vm3836_vm12 = vweird.f32 %v7590_v36 }
 0x35e   : > { %v3834_v30 = vadd.f32 %v7590_v36, %v3833_v5  ;;  %v4183_v58 = vadd.f32 %v4182_v61, %v4181_v57  ;;  %v7631_v12 = vmul.f32 0.70710677, %v7605_v42  ;;  %v4024_v29 = vmul.f32 %v3992_v22, %v7347_v35 }
 0x35f   : > { %v3867_v8 = vadd.f32 0.4994258, %v3866_v15  ;;  %v3892_v46 = vadd.f32 0.0036580483, %v3891_v34  ;;  %v3903_v44 = vadd.f32 0.014752088, %v3902_v10  ;;  %vm3835_vm13 = vweird.f32 %v7567_v47 }
 0x360   : > { %v3839_v26 = vand.u32 2147483647, %v7567_v47  ;;  %v3842_v59 = vor.u32 1.1754944e-38, %v3841_v60  ;;  %v3927_v28 = vmul.f32 %v7631_v12, %v7631_v12  ;;  %v3803_v16 = vsel %vm7598_vm9, %v3802_v9, %v3798_v48  ;;  %vm7640_vm14 = vmor %vm3835_vm13, %vm3836_vm12 }
 0x361   : > { %v3856_v11 = vadd.f32 0.18741608, %v3855_v24  ;;  %v3868_v63 = vmul.f32 %v3867_v8, %v7557_v38  ;;  %v3904_v35 = vmul.f32 %v3903_v44, %v7588_v6  ;;  %4246 = vxpose.xlu1.b32.cont [10/16] (narrow) %v4024_v29, 8  ;;  %v3838_v47 = vsel %vm7640_vm14, %v7590_v36, %v3834_v30 }
 0x362   : > { %v7649_v23 = vmin.f32 %v3927_v28, 16.0  ;;  %v4081_v3 = vsel %vm4031_vm10, %v4024_v29, 0.0  ;;  %v4025_v9 = vmul.f32 %v3993_v7, %v7405_v27  ;;  %v3893_v4 = vmul.f32 %v3892_v46, %v7588_v6 }
 0x363   : > { %v7653_v14 = vadd.f32 1.0, %v3868_v63  ;;  %v3905_v0 = vadd.f32 0.112945676, %v3904_v35  ;;  %v4128_v33 = vmul.f32 %v4024_v29, %v4024_v29  ;;  %vm3840_vm15 = vcmp.eq.f32.partialorder %v3839_v26, 8.507059e+37 }
 0x364   : > { %v3929_v60 = vmul.f32 2.1237322e-06, %v7649_v23  ;;  %v3940_v52 = vmul.f32 3.8918573e-05, %v7649_v23  ;;  %v4082_v56 = vadd.f32 %v4081_v3, %v4080_v45  ;;  %v3804_v36 = vmul.f32 %v3803_v16, %v7561_v18 }
 0x365   : > { %v3843_v39 = vsel %vm3840_vm15, %v3842_v59, %v3838_v47  ;;  %4968 = vrcp.f32 %v7653_v14  ;;  %v3819_v27 = vmul.f32 %v7593_v31, %v7430_v37  ;;  %v3906_v13 = vmul.f32 %v3905_v0, %v7588_v6 }
 0x366   : > { %v3930_v2 = vadd.f32 0.00028619796, %v3929_v60  ;;  %v3941_v53 = vadd.f32 0.001143296, %v3940_v52  ;;  %v3857_v50 = vmul.f32 %v3856_v11, %v7557_v38  ;;  %v3894_v41 = vadd.f32 0.05243302, %v3893_v4 }
 0x367   : > { %v4184_v22 = vsel %vm4031_vm10, %v4128_v33, 0.0  ;;  %v4083_v51 = vsel %vm4031_vm10, %v4025_v9, 0.0  ;;  %v3844_v1 = vmul.f32 %v3843_v39, %v3819_v27  ;;  %v3907_v49 = vadd.f32 0.4994258, %v3906_v13 }
 0x368   : > { %v3931_v18 = vmul.f32 %v3930_v2, %v7649_v23  ;;  %v3942_v7 = vmul.f32 %v3941_v53, %v7649_v23  ;;  %v4185_v54 = vadd.f32 %v4184_v22, %v4183_v58  ;;  %v4129_v20 = vmul.f32 %v4025_v9, %v4025_v9 }
 0x369   : > { %4247 = vxpose.xlu1.b32.cont [11/16] (narrow) %v4025_v9, 8  ;;  %v4084_v37 = vadd.f32 %v4083_v51, %v4082_v56  ;;  %v4890_v31 = vclamps-f32 %v3804_v36, 1.0  ;;  %v2650_v25 = vmul.f32 0.5, %v7372_v32  ;;  %v3908_v38 = vmul.f32 %v3907_v49, %v7588_v6 }
 0x36a   : > { %v3943_v43 = vadd.f32 0.014752088, %v3942_v7  ;;  %v3895_v48 = vmul.f32 %v3894_v41, %v7588_v6  ;;  %v3932_v5 = vadd.f32 0.0036580483, %v3931_v18  ;;  %v4186_v24 = vsel %vm4031_vm10, %v4129_v20, 0.0 }
 0x36b   : > { %v4969_v19 = vpop.eup %4968  ;;  %v3994_v45 = vadd.f32 1.0, %v4890_v31  ;;  %v3858_v15 = vadd.f32 1.1283791, %v3857_v50  ;;  %v7673_v10 = vadd.f32 1.0, %v3908_v38  ;;  %v4187_v30 = vadd.f32 %v4186_v24, %v4185_v54 }
 0x36c   : > { %v3871_v34 = vmul.f32 %v4969_v19, %v7653_v14  ;;  %v3944_v61 = vmul.f32 %v3943_v43, %v7649_v23  ;;  %v4891_v32 = vclamps-f32 %v3844_v1, 1.0  ;;  %v3879_v46 = vand.u32 2147483647, %v7653_v14 }
 0x36d   : > { %v4026_v58 = vmul.f32 %v3994_v45, %v2650_v25  ;;  %v3881_v44 = vand.u32 2147483648, %v7653_v14  ;;  %4970 = vrcp.f32 %v7673_v10  ;;  %vm3876_vm0 = vweird.f32 %v4969_v19 }
 0x36e   : > { %v3872_v8 = vsub.f32 1.0, %v3871_v34  ;;  %v3896_v29 = vadd.f32 0.18741608, %v3895_v48  ;;  %v3933_v26 = vmul.f32 %v3932_v5, %v7649_v23  ;;  %v3945_v16 = vadd.f32 0.112945676, %v3944_v61 }
 0x36f   : > { %v4085_v59 = vsel %vm4031_vm10, %v4026_v58, 0.0  ;;  %v4130_v57 = vmul.f32 %v4026_v58, %v4026_v58  ;;  %v2651_v63 = vmul.f32 0.5, %v7413_v40  ;;  %v3859_v35 = vmul.f32 %v3858_v15, %v7530_v21 }
 0x370   : > { %v3873_v28 = vmul.f32 %v4969_v19, %v3872_v8  ;;  %v4086_v11 = vadd.f32 %v4085_v59, %v4084_v37  ;;  %v3995_v47 = vadd.f32 1.0, %v4891_v32  ;;  %vm3875_vm2 = vweird.f32 %v7653_v14 }
 0x371   : > { %4248 = vxpose.xlu1.b32.cont [12/16] (narrow) %v4026_v58, 8  ;;  %v3946_v9 = vmul.f32 %v3945_v16, %v7649_v23  ;;  %v4188_v4 = vsel %vm4031_vm10, %v4130_v57, 0.0  ;;  %vm3877_vm3 = vmor %vm3875_vm2, %vm3876_vm0  ;;  %v3882_v0 = vor.u32 1.1754944e-38, %v3881_v44  ;;  %v3897_v33 = vmul.f32 %v3896_v29, %v7588_v6 }
 0x372   : > { %v3874_v3 = vadd.f32 %v4969_v19, %v3873_v28  ;;  %v4189_v60 = vadd.f32 %v4188_v4, %v4187_v30  ;;  %v4027_v52 = vmul.f32 %v3995_v47, %v2651_v63  ;;  %vm3880_vm4 = vcmp.eq.f32.partialorder %v3879_v46, 8.507059e+37 }
 0x373   : > { %v4971_v56 = vpop.eup %4970  ;;  %v3934_v21 = vadd.f32 0.05243302, %v3933_v26  ;;  %v3947_v36 = vadd.f32 0.4994258, %v3946_v9  ;;  %v3898_v50 = vadd.f32 1.1283791, %v3897_v33  ;;  %vm3915_vm6 = vweird.f32 %v7673_v10 }
 0x374   : > { %v3878_v40 = vsel %vm3877_vm3, %v4969_v19, %v3874_v3  ;;  %v3911_v27 = vmul.f32 %v4971_v56, %v7673_v10  ;;  %v4087_v2 = vsel %vm4031_vm10, %v4027_v52, 0.0  ;;  %v4131_v53 = vmul.f32 %v4027_v52, %v4027_v52 }
 0x375   : > { %v3883_v39 = vsel %vm3880_vm4, %v3882_v0, %v3878_v40  ;;  %v3948_v13 = vmul.f32 %v3947_v36, %v7649_v23  ;;  %v3921_v6 = vand.u32 2147483648, %v7673_v10  ;;  %v4088_v22 = vadd.f32 %v4087_v2, %v4086_v11 }
 0x376   : > { %v3884_v14 = vmul.f32 %v3883_v39, %v3859_v35  ;;  %v3912_v41 = vsub.f32 1.0, %v3911_v27  ;;  %v3935_v51 = vmul.f32 %v3934_v21, %v7649_v23  ;;  %v4190_v49 = vsel %vm4031_vm10, %v4131_v53, 0.0 }
 0x377   : > { %v3949_v1 = vadd.f32 1.0, %v3948_v13  ;;  %vm3916_vm5 = vweird.f32 %v4971_v56  ;;  %v3919_v54 = vand.u32 2147483647, %v7673_v10  ;;  %v4191_v20 = vadd.f32 %v4190_v49, %v4189_v60 }
 0x378   : > { %v4892_v18 = vclamps-f32 %v3884_v14, 1.0  ;;  %v3913_v7 = vmul.f32 %v4971_v56, %v3912_v41  ;;  %v2652_v37 = vmul.f32 0.5, %v7501_v62  ;;  %vm3917_vm1 = vmor %vm3915_vm6, %vm3916_vm5  ;;  %v3922_v38 = vor.u32 1.1754944e-38, %v3921_v6 }
 0x379   : > { %4249 = vxpose.xlu1.b32.cont [13/16] (narrow) %v4027_v52, 8  ;;  %4972 = vrcp.f32 %v3949_v1  ;;  %v3936_v43 = vadd.f32 0.18741608, %v3935_v51  ;;  %v3899_v19 = vmul.f32 %v3898_v50, %v7575_v55  ;;  %vm3920_vm7 = vcmp.eq.f32.partialorder %v3919_v54, 8.507059e+37 }
 0x37a   : > { %v3914_v31 = vadd.f32 %v4971_v56, %v3913_v7  ;;  %v3996_v25 = vadd.f32 1.0, %v4892_v18  ;;  %v2653_v55 = vmul.f32 0.5, %v7554_v17  ;;  %v3961_v26 = vand.u32 2147483648, %v3949_v1 }
 0x37b   : > { %v3937_v62 = vmul.f32 %v3936_v43, %v7649_v23  ;;  %v3959_v28 = vand.u32 2147483647, %v3949_v1  ;;  %vm3955_vm9 = vweird.f32 %v3949_v1  ;;  %v2654_v60 = vmul.f32 0.5, %v7605_v42 }
 0x37c   : > { %v3918_v48 = vsel %vm3917_vm1, %v4971_v56, %v3914_v31  ;;  %v4028_v5 = vmul.f32 %v3996_v25, %v2652_v37  ;;  %v3962_v63 = vor.u32 1.1754944e-38, %v3961_v26 }
 0x37d   : > { %v3923_v24 = vsel %vm3920_vm7, %v3922_v38, %v3918_v48  ;;  %v3938_v29 = vadd.f32 1.1283791, %v3937_v62  ;;  %vm3960_vm12 = vcmp.eq.f32.partialorder %v3959_v28, 8.507059e+37 }
 0x37e   : > { %v3924_v45 = vmul.f32 %v3923_v24, %v3899_v19  ;;  %v4089_v15 = vsel %vm4031_vm10, %v4028_v5, 0.0  ;;  %v4132_v34 = vmul.f32 %v4028_v5, %v4028_v5 }
 0x37f   : > { %v4973_v61 = vpop.eup %4972  ;;  %v4090_v30 = vadd.f32 %v4089_v15, %v4088_v22  ;;  %v3939_v47 = vmul.f32 %v3938_v29, %v7631_v12 }
 0x380   : > { %v3951_v58 = vmul.f32 %v4973_v61, %v3949_v1  ;;  %v4192_v10 = vsel %vm4031_vm10, %v4132_v34, 0.0  ;;  %v4893_v32 = vclamps-f32 %v3924_v45, 1.0  ;;  %vm3956_vm8 = vweird.f32 %v4973_v61  ;;  %v4221_v1 = vpop.trf.xlu0 }
 0x381   : > { %4250 = vxpose.xlu1.b32.cont [14/16] (narrow) %v4028_v5, 8  ;;  %v4193_v8 = vadd.f32 %v4192_v10, %v4191_v20  ;;  %vm3957_vm11 = vmor %vm3955_vm9, %vm3956_vm8  ;;  %4269 = vst [vmem:[%s177_s15] sm:$0xff] %v4221_v1 }
 0x382   : > { %v3952_v46 = vsub.f32 1.0, %v3951_v58  ;;  %v3997_v44 = vadd.f32 1.0, %v4893_v32 }
 0x384   : > { %v3953_v59 = vmul.f32 %v4973_v61, %v3952_v46  ;;  %v4029_v16 = vmul.f32 %v3997_v44, %v2653_v55 }
 0x386   : > { %v3954_v57 = vadd.f32 %v4973_v61, %v3953_v59  ;;  %v4091_v23 = vsel %vm4031_vm10, %v4029_v16, 0.0  ;;  %v4133_v11 = vmul.f32 %v4029_v16, %v4029_v16 }
 0x387   : > { %v4092_v35 = vadd.f32 %v4091_v23, %v4090_v30 }
 0x388   : > { %v3958_v3 = vsel %vm3957_vm11, %v4973_v61, %v3954_v57  ;;  %v4194_v17 = vsel %vm4031_vm10, %v4133_v11, 0.0 }
 0x389   : > { %4251 = vxpose.xlu1.b32.cont [15/16] (narrow) %v4029_v16, 8  ;;  %v3963_v9 = vsel %vm3960_vm12, %v3962_v63, %v3958_v3  ;;  %v4195_v4 = vadd.f32 %v4194_v17, %v4193_v8 }
 0x38a   : > { %v3964_v0 = vmul.f32 %v3963_v9, %v3939_v47 }
 0x38c   : > { %v4894_v33 = vclamps-f32 %v3964_v0, 1.0 }
 0x38e   : > { %v3998_v52 = vadd.f32 1.0, %v4894_v33 }
 0x390   : > { %v4030_v56 = vmul.f32 %v3998_v52, %v2654_v60 }
 0x392   : > { %v4093_v40 = vsel %vm4031_vm10, %v4030_v56, 0.0  ;;  %v4134_v21 = vmul.f32 %v4030_v56, %v4030_v56  ;;  %4252 = vxpose.xlu1.b32.end [16/16] (narrow) %v4030_v56, 8 }
 0x393   : > { %v4094_v12 = vadd.f32 %v4093_v40, %v4092_v35 }
 0x394   : > { %v4196_v36 = vsel %vm4031_vm10, %v4134_v21, 0.0  ;;  %vm4101_vm10 = vcmask 57344  }
 0x395   : > { %v4095_v39 = vrot.slane %v4094_v12, 4  ;;  %v4197_v27 = vadd.f32 %v4196_v36, %v4195_v4 }
 0x397   : > { %v4096_v14 = vadd.f32 %v4095_v39, %v4094_v12  ;;  %v4198_v13 = vrot.slane %v4197_v27, 4 }
 0x399   : > { %v4097_v2 = vrot.slane %v4096_v14, 2  ;;  %v4199_v53 = vadd.f32 %v4198_v13, %v4197_v27 }
 0x39b   : > { %v4098_v50 = vadd.f32 %v4097_v2, %v4096_v14  ;;  %v4200_v41 = vrot.slane %v4199_v53, 2 }
 0x39d   : > { %v4099_v42 = vrot.slane %v4098_v50, 1  ;;  %v4201_v6 = vadd.f32 %v4200_v41, %v4199_v53 }
 0x39f   : > { %v4100_v22 = vadd.f32 %v4099_v42, %v4098_v50  ;;  %v4202_v51 = vrot.slane %v4201_v6, 1 }
 0x3a1   : > { %4102 = vst.msk [vmem:[%s181_s18] sm:$0x1] %vm4101_vm10, %v4100_v22  ;;  %v4203_v49 = vadd.f32 %v4202_v51, %v4201_v6 }
 0x3a3   : > { %4204 = vst.msk [vmem:[%s181_s18 + $0x1] sm:$0x1] %vm4101_vm10, %v4203_v49 }
 0x3be   : > { %v4253_v18 = vpop.trf.xlu1 }
 0x3bf   : > { %4270 = vst [vmem:[%s177_s15 + $0x8] sm:$0xff] %v4253_v18 }
 0x3c0 PF: > { %s14_s12 = sadd.s32 1, %s4980_s12  }
 0x3c1   : > { %p11_p4 = scmp.ge.s32.totalorder %s14_s12, 4  }
 0x3c3   :  { %13 = sbr.rel (!%p11_p4) target bundleno = 1 (0x1), region = 80 }

</bundles_post_ra>
